<compile_context>
chip_gen: v7x
topology: tpu7x:2x2x1
jax: 0.10.0
libtpu: 0.0.40
codegen_flags: <defaults>
</compile_context>

<pallas_src>
import functools

import jax
import jax.numpy as jnp
from jax import lax
from jax.experimental import pallas as pl
from jax.experimental.pallas import tpu as pltpu


LEAKY_SLOPE = 0.01  # nn.LeakyReLU() default negative_slope


def _leaky_relu(y):
    # 2 VPU ops (mul + max) instead of cmp+select+mul.
    return jnp.maximum(y, LEAKY_SLOPE * y)


# ----------------------------------------------------------------------------
# Fused Pallas kernel:
#   conv3x3(reflect) -> LeakyReLU -> conv3x3(reflect) -> LeakyReLU
# Everything lives in a channel-folded, lane-dense layout (rows, W*C).
# ----------------------------------------------------------------------------
def _bottleneck_kernel(x_ref, w1_ref, w2_ref, o_ref, xpad_scr, y1p_scr,
                       *, H, TH, num_tiles):
    """One (batch, row-tile) grid step.

    x_ref    : (H, W*Cin)          folded input image (bf16), resident per batch
    w1_ref   : (3, W*Cin, W*Cbn)   conv1 Toeplitz-folded weights (bf16)
    w2_ref   : (3, W*Cbn, W*Cbn)   conv2 Toeplitz-folded weights (bf16)
    o_ref    : (TH, W*Cbn)         lane-dense output row tile (bf16)
    xpad_scr : (H+4, W*Cin)        row-reflect-padded input (+1 filler row each end)
    y1p_scr  : (TH+2, W*Cbn)       row-reflect-padded conv1+LeakyReLU window (bf16)
    """
    THw = TH + 2
    t = pl.program_id(1)

    # ---- reflect-pad the input rows once per batch element (ref stores) ----
    # xpad_scr row i holds padded-input row (i - 1); rows 0 and H+3 are fillers
    # that only feed the two boundary rows fixed up after conv1.
    @pl.when(t == 0)
    def _build_padded_input():
        xpad_scr[2:H + 2, :] = x_ref[...]
        xpad_scr[1:2, :] = x_ref[1:2, :]                     # padded row 0   = row 1
        xpad_scr[0:1, :] = x_ref[1:2, :]                     # filler
        xpad_scr[H + 2:H + 3, :] = x_ref[H - 2:H - 1, :]     # padded row H+1 = row H-2
        xpad_scr[H + 3:H + 4, :] = x_ref[H - 2:H - 1, :]     # filler

    h0 = 0 if num_tiles == 1 else t * TH                     # first output row

    # ---- conv1 + LeakyReLU: 3 dense MXU matmuls (K = W*Cin, N = W*Cbn) ------
    # Row j of the result is intermediate row (h0 - 1 + j); rows 0 / TH+1 are
    # only meaningful after the boundary-reflection fixups below.
    acc = jnp.dot(xpad_scr[pl.ds(h0 + 0, THw), :], w1_ref[0],
                  preferred_element_type=jnp.float32)
    acc = acc + jnp.dot(xpad_scr[pl.ds(h0 + 1, THw), :], w1_ref[1],
                        preferred_element_type=jnp.float32)
    acc = acc + jnp.dot(xpad_scr[pl.ds(h0 + 2, THw), :], w1_ref[2],
                        preferred_element_type=jnp.float32)
    acc = _leaky_relu(acc)                                   # f32 epilogue
    # TODO(synk): intermediate rounded to bf16 here (MXU operands are bf16 anyway);
    # switch this scratch to f32 if tighter accuracy is ever required.
    y1p_scr[...] = acc.astype(y1p_scr.dtype)

    # ---- reflect the intermediate rows at the *global* image boundary ------
    @pl.when(t == 0)
    def _reflect_top():
        y1p_scr[0:1, :] = y1p_scr[2:3, :]                    # pad row -1 = row 1
    @pl.when(t == num_tiles - 1)
    def _reflect_bottom():
        y1p_scr[THw - 1:THw, :] = y1p_scr[THw - 3:THw - 2, :]  # pad row H = row H-2

    # ---- conv2 + LeakyReLU: 3 dense MXU matmuls (K = W*Cbn, N = W*Cbn) ------
    acc2 = jnp.dot(y1p_scr[0:TH, :], w2_ref[0],
                   preferred_element_type=jnp.float32)
    acc2 = acc2 + jnp.dot(y1p_scr[1:TH + 1, :], w2_ref[1],
                          preferred_element_type=jnp.float32)
    acc2 = acc2 + jnp.dot(y1p_scr[2:TH + 2, :], w2_ref[2],
                          preferred_element_type=jnp.float32)
    acc2 = _leaky_relu(acc2)
    o_ref[...] = acc2.astype(o_ref.dtype)                    # dense bf16 store


# ----------------------------------------------------------------------------
# Host-side weight folding: 3x3 'reflect'-padded conv -> 3 dense matrices.
# ----------------------------------------------------------------------------
def _fold_conv3x3_reflect(w_oihw, W, dtype):
    """Return wf (3, W*Cin, W*Cout) such that, for a row-padded channel-folded
    input slab X (rows, W*Cin):  out(rows, W*Cout) = sum_kh X[kh-shifted] @ wf[kh].
    Column reflect padding is encoded in the band structure of wf."""
    wt = jnp.transpose(w_oihw, (2, 3, 1, 0)).astype(jnp.float32)  # (3,3,Cin,Cout)
    cols = jnp.arange(W)
    mats = []
    for kh in range(3):
        m = jnp.zeros((W * w_oihw.shape[1], W * w_oihw.shape[0]), jnp.float32)
        for kw in range(3):
            src = cols + (kw - 1)
            src = jnp.abs(src)                                     # reflect -1 -> 1
            src = jnp.where(src > W - 1, 2 * (W - 1) - src, src)   # reflect  W -> W-2
            band = jnp.zeros((W, W), jnp.float32).at[src, cols].set(1.0)
            m = m + jnp.kron(band, wt[kh, kw])
        mats.append(m)
    return jnp.stack(mats).astype(dtype)


def _pick_tile_h(H, tile_h):
    if tile_h is None:
        if H <= 64:
            return H
        for cand in (64, 56, 48, 40, 32, 24, 16, 8):   # keep scratch / acc modest
            if H % cand == 0:
                return cand
        return H
    if tile_h >= H:
        return H
    if H % tile_h != 0 or tile_h % 8 != 0:
        raise ValueError(
            f"tile_h={tile_h} must divide H={H} and be a multiple of 8 (or None).")
    return tile_h


def _vmem_limit_bytes():
    # ~5/8 of physical VMEM: ~40 MiB on v7x (64 MiB), ~80 MiB on v5e/v6e (128 MiB).
    try:
        cap = int(pltpu.get_tpu_info().vmem_capacity_bytes)
    except Exception:
        cap = 64 * 1024 * 1024
    return min(cap * 5 // 8, 96 * 1024 * 1024)


# ----------------------------------------------------------------------------
# Host wrapper
# ----------------------------------------------------------------------------
def bottleneck_forward(params, x_nchw, *, tile_h=None,
                       compute_dtype=jnp.bfloat16):
    """BottleNeck forward (eval mode).

    Input is NCHW (like PyTorch); output is lane-dense NHWC bf16
    (B, H, W, Cbn) — the layout/dtype a fused downstream consumer would take.
    """
    w1, w2 = params["w1"], params["w2"]
    B, Cin, H, W = x_nchw.shape
    Cbn = w1.shape[0]
    if H < 2 or W < 2:
        raise ValueError("reflect padding needs H >= 2 and W >= 2")
    w2_bytes = 3 * (W * Cbn) ** 2 * jnp.dtype(compute_dtype).itemsize
    if w2_bytes > 16 * 1024 * 1024:
        # TODO(synk): very wide images need a W-tiled / im2col fallback path.
        raise ValueError("spatial width too large for the folded-weight kernel")

    TH = _pick_tile_h(H, tile_h)
    num_tiles = H // TH

    # Host-side layout glue: NCHW -> channel-folded rows (B, H, W*Cin), bf16.
    # TODO(synk): a layout-native pipeline would feed NHWC/bf16 directly and skip this.
    xf = jnp.transpose(x_nchw, (0, 2, 3, 1)).reshape(B, H, W * Cin).astype(compute_dtype)
    # In a real model these folded weights would be precomputed once.
    w1f = _fold_conv3x3_reflect(w1, W, compute_dtype)   # (3, W*Cin, W*Cbn)
    w2f = _fold_conv3x3_reflect(w2, W, compute_dtype)   # (3, W*Cbn, W*Cbn)

    kern = functools.partial(_bottleneck_kernel, H=H, TH=TH, num_tiles=num_tiles)
    yf = pl.pallas_call(
        kern,
        out_shape=jax.ShapeDtypeStruct((B, H, W * Cbn), compute_dtype),
        grid=(B, num_tiles),
        in_specs=[
            # Folded image per batch element; block index ignores t so the block
            # stays VMEM-resident across the inner row-tile loop.
            pl.BlockSpec((pl.Squeezed(), H, W * Cin), lambda b, t: (b, 0, 0)),
            pl.BlockSpec((3, W * Cin, W * Cbn), lambda b, t: (0, 0, 0)),
            pl.BlockSpec((3, W * Cbn, W * Cbn), lambda b, t: (0, 0, 0)),
        ],
        out_specs=pl.BlockSpec((pl.Squeezed(), TH, W * Cbn),
                               lambda b, t: (b, t, 0)),
        scratch_shapes=[
            pltpu.VMEM((H + 4, W * Cin), compute_dtype),    # row-padded input
            pltpu.VMEM((TH + 2, W * Cbn), compute_dtype),   # row-padded intermediate
        ],
        compiler_params=pltpu.CompilerParams(
            dimension_semantics=("parallel", "arbitrary"),
            vmem_limit_bytes=_vmem_limit_bytes()),
    )(xf, w1f, w2f)

    return yf.reshape(B, H, W, Cbn)


# ----------------------------------------------------------------------------
# Parameters (mirrors initialize_weights: xavier_normal_, bias=False default)
# ----------------------------------------------------------------------------
def make_bottleneck_params(key, channels_net=8, channels_bn=48,
                           compression_level=3, channels_expansion=1):
    cin = channels_net * channels_expansion ** compression_level
    k1, k2 = jax.random.split(key)

    def xavier(k, cout, cin_):
        std = (2.0 / ((cin_ + cout) * 3 * 3)) ** 0.5
        return std * jax.random.normal(k, (cout, cin_, 3, 3), jnp.float32)

    return {"w1": xavier(k1, channels_bn, cin),
            "w2": xavier(k2, channels_bn, channels_bn)}


# ----------------------------------------------------------------------------
# Pure-JAX f32 reference (for validation), NCHW in / NCHW out
# ----------------------------------------------------------------------------
def bottleneck_reference(params, x_nchw):
    def conv(x, w):
        xpad = jnp.pad(x, ((0, 0), (0, 0), (1, 1), (1, 1)), mode="reflect")
        return lax.conv_general_dilated(
            xpad, w, window_strides=(1, 1), padding="VALID",
            dimension_numbers=("NCHW", "OIHW", "NCHW"),
            preferred_element_type=jnp.float32)

    y = _leaky_relu(conv(x_nchw.astype(jnp.float32),
                         params["w1"].astype(jnp.float32)))
    y = _leaky_relu(conv(y, params["w2"].astype(jnp.float32)))
    return y


# ----------------------------------------------------------------------------
if __name__ == "__main__":
    key = jax.random.PRNGKey(0)
    kp, kx = jax.random.split(key)

    params = make_bottleneck_params(kp)                       # Cin=8, Cbn=48
    x = jax.random.normal(kx, (2, 8, 16, 16), jnp.float32)    # NCHW like PyTorch

    # Default: single row tile per batch element.
    fwd = jax.jit(bottleneck_forward)
    y_nhwc = jax.block_until_ready(fwd(params, x))            # (2, 16, 16, 48) bf16
    assert y_nhwc.shape == (2, 16, 16, 48), y_nhwc.shape
    assert y_nhwc.dtype == jnp.bfloat16, y_nhwc.dtype
    assert bool(jnp.all(jnp.isfinite(y_nhwc.astype(jnp.float32))))

    ref = jax.block_until_ready(jax.jit(bottleneck_reference)(params, x))
    y_nchw = jnp.transpose(y_nhwc.astype(jnp.float32), (0, 3, 1, 2))
    max_err = float(jnp.max(jnp.abs(y_nchw - ref)))
    # bf16 MXU operands + bf16 intermediate/output vs the f32 reference.
    assert max_err < 7.5e-2, max_err

    # Row-tiled variant (exercises the halo / boundary-reflection path).
    fwd_tiled = jax.jit(functools.partial(bottleneck_forward, tile_h=8))
    y_tiled = jax.block_until_ready(fwd_tiled(params, x))
    max_err_t = float(jnp.max(jnp.abs(
        jnp.transpose(y_tiled.astype(jnp.float32), (0, 3, 1, 2)) - ref)))
    assert max_err_t < 7.5e-2, max_err_t

    print("KERNEL_OK")
</pallas_src>

<mosaic_0001>
module attributes {stable_mosaic.version = 11 : i64} {
  func.func @_bottleneck_kernel(%arg0: i32, %arg1: i32, %arg2: memref<1x16x128xbf16, #tpu.memory_space<vmem>>, %arg3: memref<3x128x768xbf16, #tpu.memory_space<vmem>>, %arg4: memref<3x768x768xbf16, #tpu.memory_space<vmem>>, %arg5: memref<1x16x768xbf16, #tpu.memory_space<vmem>>, %arg6: memref<20x128xbf16, #tpu.memory_space<vmem>>, %arg7: memref<18x768xbf16, #tpu.memory_space<vmem>>) attributes {dimension_semantics = [#tpu.dimension_semantics<parallel>, #tpu.dimension_semantics<arbitrary>], iteration_bounds = array<i64: 2, 1>, scalar_prefetch = 0 : i64, scratch_operands = 2 : i64, tpu.core_type = #tpu.core_type<tc>, window_params = [{transform_indices = @transform_0, window_bounds = array<i64: 1, 16, 128>}, {pipeline_mode = #tpu.pipeline_mode<synchronous>, transform_indices = @transform_1, window_bounds = array<i64: 3, 128, 768>}, {pipeline_mode = #tpu.pipeline_mode<synchronous>, transform_indices = @transform_2, window_bounds = array<i64: 3, 768, 768>}, {transform_indices = @transform_3, window_bounds = array<i64: 1, 16, 768>}]} {
    %c0_i32 = arith.constant 0 : i32
    %0 = arith.cmpi eq, %arg1, %c0_i32 : i32
    %1 = arith.extui %0 : i1 to i32
    %c0_i32_0 = arith.constant 0 : i32
    %2 = arith.cmpi ne, %1, %c0_i32_0 : i32
    scf.if %2 {
      %c0_44 = arith.constant 0 : index
      %c0_45 = arith.constant 0 : index
      %c0_46 = arith.constant 0 : index
      %49 = vector.load %arg2[%c0_44, %c0_45, %c0_46] : memref<1x16x128xbf16, #tpu.memory_space<vmem>>, vector<1x16x128xbf16>
      %50 = vector.shape_cast %49 : vector<1x16x128xbf16> to vector<16x128xbf16>
      %c2_47 = arith.constant 2 : index
      %c0_48 = arith.constant 0 : index
      %51 = vector.load %arg6[%c2_47, %c0_48] : memref<20x128xbf16, #tpu.memory_space<vmem>>, vector<16x128xbf16>
      tpu.vector_store %arg6[%c2_47, %c0_48], %50 {strides = array<i32>} : memref<20x128xbf16, #tpu.memory_space<vmem>>, vector<16x128xbf16>,
      %c0_49 = arith.constant 0 : index
      %c1_50 = arith.constant 1 : index
      %c0_51 = arith.constant 0 : index
      %52 = vector.load %arg2[%c0_49, %c1_50, %c0_51] : memref<1x16x128xbf16, #tpu.memory_space<vmem>>, vector<1x1x128xbf16>
      %53 = vector.shape_cast %52 : vector<1x1x128xbf16> to vector<1x128xbf16>
      %c1_52 = arith.constant 1 : index
      %c0_53 = arith.constant 0 : index
      %54 = vector.load %arg6[%c1_52, %c0_53] : memref<20x128xbf16, #tpu.memory_space<vmem>>, vector<1x128xbf16>
      tpu.vector_store %arg6[%c1_52, %c0_53], %53 {strides = array<i32>} : memref<20x128xbf16, #tpu.memory_space<vmem>>, vector<1x128xbf16>,
      %c0_54 = arith.constant 0 : index
      %c1_55 = arith.constant 1 : index
      %c0_56 = arith.constant 0 : index
      %55 = vector.load %arg2[%c0_54, %c1_55, %c0_56] : memref<1x16x128xbf16, #tpu.memory_space<vmem>>, vector<1x1x128xbf16>
      %56 = vector.shape_cast %55 : vector<1x1x128xbf16> to vector<1x128xbf16>
      %c0_57 = arith.constant 0 : index
      %c0_58 = arith.constant 0 : index
      %57 = vector.load %arg6[%c0_57, %c0_58] : memref<20x128xbf16, #tpu.memory_space<vmem>>, vector<1x128xbf16>
      tpu.vector_store %arg6[%c0_57, %c0_58], %56 {strides = array<i32>} : memref<20x128xbf16, #tpu.memory_space<vmem>>, vector<1x128xbf16>,
      %c0_59 = arith.constant 0 : index
      %c14 = arith.constant 14 : index
      %c0_60 = arith.constant 0 : index
      %58 = vector.load %arg2[%c0_59, %c14, %c0_60] : memref<1x16x128xbf16, #tpu.memory_space<vmem>>, vector<1x1x128xbf16>
      %59 = vector.shape_cast %58 : vector<1x1x128xbf16> to vector<1x128xbf16>
      %c18 = arith.constant 18 : index
      %c0_61 = arith.constant 0 : index
      %60 = vector.load %arg6[%c18, %c0_61] : memref<20x128xbf16, #tpu.memory_space<vmem>>, vector<1x128xbf16>
      tpu.vector_store %arg6[%c18, %c0_61], %59 {strides = array<i32>} : memref<20x128xbf16, #tpu.memory_space<vmem>>, vector<1x128xbf16>,
      %c0_62 = arith.constant 0 : index
      %c14_63 = arith.constant 14 : index
      %c0_64 = arith.constant 0 : index
      %61 = vector.load %arg2[%c0_62, %c14_63, %c0_64] : memref<1x16x128xbf16, #tpu.memory_space<vmem>>, vector<1x1x128xbf16>
      %62 = vector.shape_cast %61 : vector<1x1x128xbf16> to vector<1x128xbf16>
      %c19 = arith.constant 19 : index
      %c0_65 = arith.constant 0 : index
      %63 = vector.load %arg6[%c19, %c0_65] : memref<20x128xbf16, #tpu.memory_space<vmem>>, vector<1x128xbf16>
      tpu.vector_store %arg6[%c19, %c0_65], %62 {strides = array<i32>} : memref<20x128xbf16, #tpu.memory_space<vmem>>, vector<1x128xbf16>,
    } else {
    }
    %c0 = arith.constant 0 : index
    %c0_1 = arith.constant 0 : index
    %3 = vector.load %arg6[%c0, %c0_1] : memref<20x128xbf16, #tpu.memory_space<vmem>>, vector<18x128xbf16>
    %c0_2 = arith.constant 0 : index
    %c0_3 = arith.constant 0 : index
    %c0_4 = arith.constant 0 : index
    %4 = vector.load %arg3[%c0_2, %c0_3, %c0_4] : memref<3x128x768xbf16, #tpu.memory_space<vmem>>, vector<1x128x768xbf16>
    %5 = vector.shape_cast %4 : vector<1x128x768xbf16> to vector<128x768xbf16>
    %cst = arith.constant dense<0.000000e+00> : vector<18x768xf32>
    %6 = tpu.matmul %3, %5, %cst {dimension_numbers = #tpu.dot_dimension_numbers<[1], [0], [0], [1], [0, 0, 1, 1], [], []>} : vector<18x128xbf16>, vector<128x768xbf16>, vector<18x768xf32> -> vector<18x768xf32>
    %c1 = arith.constant 1 : index
    %c0_5 = arith.constant 0 : index
    %7 = vector.load %arg6[%c1, %c0_5] : memref<20x128xbf16, #tpu.memory_space<vmem>>, vector<18x128xbf16>
    %c1_6 = arith.constant 1 : index
    %c0_7 = arith.constant 0 : index
    %c0_8 = arith.constant 0 : index
    %8 = vector.load %arg3[%c1_6, %c0_7, %c0_8] : memref<3x128x768xbf16, #tpu.memory_space<vmem>>, vector<1x128x768xbf16>
    %9 = vector.shape_cast %8 : vector<1x128x768xbf16> to vector<128x768xbf16>
    %cst_9 = arith.constant dense<0.000000e+00> : vector<18x768xf32>
    %10 = tpu.matmul %7, %9, %cst_9 {dimension_numbers = #tpu.dot_dimension_numbers<[1], [0], [0], [1], [0, 0, 1, 1], [], []>} : vector<18x128xbf16>, vector<128x768xbf16>, vector<18x768xf32> -> vector<18x768xf32>
    %11 = arith.addf %6, %10 : vector<18x768xf32>
    %c2 = arith.constant 2 : index
    %c0_10 = arith.constant 0 : index
    %12 = vector.load %arg6[%c2, %c0_10] : memref<20x128xbf16, #tpu.memory_space<vmem>>, vector<18x128xbf16>
    %c2_11 = arith.constant 2 : index
    %c0_12 = arith.constant 0 : index
    %c0_13 = arith.constant 0 : index
    %13 = vector.load %arg3[%c2_11, %c0_12, %c0_13] : memref<3x128x768xbf16, #tpu.memory_space<vmem>>, vector<1x128x768xbf16>
    %14 = vector.shape_cast %13 : vector<1x128x768xbf16> to vector<128x768xbf16>
    %cst_14 = arith.constant dense<0.000000e+00> : vector<18x768xf32>
    %15 = tpu.matmul %12, %14, %cst_14 {dimension_numbers = #tpu.dot_dimension_numbers<[1], [0], [0], [1], [0, 0, 1, 1], [], []>} : vector<18x128xbf16>, vector<128x768xbf16>, vector<18x768xf32> -> vector<18x768xf32>
    %16 = arith.addf %11, %15 : vector<18x768xf32>
    %cst_15 = arith.constant 0.00999999977 : f32
    %17 = vector.broadcast %cst_15 : f32 to vector<18x768xf32>
    %18 = arith.mulf %17, %16 : vector<18x768xf32>
    %19 = arith.maximumf %16, %18 : vector<18x768xf32>
    %20 = arith.truncf %19 : vector<18x768xf32> to vector<18x768xbf16>
    %c0_16 = arith.constant 0 : index
    %c0_17 = arith.constant 0 : index
    %21 = vector.load %arg7[%c0_16, %c0_17] : memref<18x768xbf16, #tpu.memory_space<vmem>>, vector<18x768xbf16>
    tpu.vector_store %arg7[%c0_16, %c0_17], %20 {strides = array<i32>} : memref<18x768xbf16, #tpu.memory_space<vmem>>, vector<18x768xbf16>,
    %c0_i32_18 = arith.constant 0 : i32
    %22 = arith.cmpi eq, %arg1, %c0_i32_18 : i32
    %23 = arith.extui %22 : i1 to i32
    %c0_i32_19 = arith.constant 0 : i32
    %24 = arith.cmpi ne, %23, %c0_i32_19 : i32
    scf.if %24 {
      %c2_44 = arith.constant 2 : index
      %c0_45 = arith.constant 0 : index
      %49 = vector.load %arg7[%c2_44, %c0_45] : memref<18x768xbf16, #tpu.memory_space<vmem>>, vector<1x768xbf16>
      %c0_46 = arith.constant 0 : index
      %c0_47 = arith.constant 0 : index
      %50 = vector.load %arg7[%c0_46, %c0_47] : memref<18x768xbf16, #tpu.memory_space<vmem>>, vector<1x768xbf16>
      tpu.vector_store %arg7[%c0_46, %c0_47], %49 {strides = array<i32>} : memref<18x768xbf16, #tpu.memory_space<vmem>>, vector<1x768xbf16>,
    } else {
    }
    %c0_i32_20 = arith.constant 0 : i32
    %25 = arith.cmpi eq, %arg1, %c0_i32_20 : i32
    %26 = arith.extui %25 : i1 to i32
    %c0_i32_21 = arith.constant 0 : i32
    %27 = arith.cmpi ne, %26, %c0_i32_21 : i32
    scf.if %27 {
      %c15 = arith.constant 15 : index
      %c0_44 = arith.constant 0 : index
      %49 = vector.load %arg7[%c15, %c0_44] : memref<18x768xbf16, #tpu.memory_space<vmem>>, vector<1x768xbf16>
      %c17 = arith.constant 17 : index
      %c0_45 = arith.constant 0 : index
      %50 = vector.load %arg7[%c17, %c0_45] : memref<18x768xbf16, #tpu.memory_space<vmem>>, vector<1x768xbf16>
      tpu.vector_store %arg7[%c17, %c0_45], %49 {strides = array<i32>} : memref<18x768xbf16, #tpu.memory_space<vmem>>, vector<1x768xbf16>,
    } else {
    }
    %c0_22 = arith.constant 0 : index
    %c0_23 = arith.constant 0 : index
    %28 = vector.load %arg7[%c0_22, %c0_23] : memref<18x768xbf16, #tpu.memory_space<vmem>>, vector<16x768xbf16>
    %c0_24 = arith.constant 0 : index
    %c0_25 = arith.constant 0 : index
    %c0_26 = arith.constant 0 : index
    %29 = vector.load %arg4[%c0_24, %c0_25, %c0_26] : memref<3x768x768xbf16, #tpu.memory_space<vmem>>, vector<1x768x768xbf16>
    %30 = vector.shape_cast %29 : vector<1x768x768xbf16> to vector<768x768xbf16>
    %cst_27 = arith.constant dense<0.000000e+00> : vector<16x768xf32>
    %31 = tpu.matmul %28, %30, %cst_27 {dimension_numbers = #tpu.dot_dimension_numbers<[1], [0], [0], [1], [0, 0, 1, 1], [], []>} : vector<16x768xbf16>, vector<768x768xbf16>, vector<16x768xf32> -> vector<16x768xf32>
    %c1_28 = arith.constant 1 : index
    %c0_29 = arith.constant 0 : index
    %32 = vector.load %arg7[%c1_28, %c0_29] : memref<18x768xbf16, #tpu.memory_space<vmem>>, vector<16x768xbf16>
    %c1_30 = arith.constant 1 : index
    %c0_31 = arith.constant 0 : index
    %c0_32 = arith.constant 0 : index
    %33 = vector.load %arg4[%c1_30, %c0_31, %c0_32] : memref<3x768x768xbf16, #tpu.memory_space<vmem>>, vector<1x768x768xbf16>
    %34 = vector.shape_cast %33 : vector<1x768x768xbf16> to vector<768x768xbf16>
    %cst_33 = arith.constant dense<0.000000e+00> : vector<16x768xf32>
    %35 = tpu.matmul %32, %34, %cst_33 {dimension_numbers = #tpu.dot_dimension_numbers<[1], [0], [0], [1], [0, 0, 1, 1], [], []>} : vector<16x768xbf16>, vector<768x768xbf16>, vector<16x768xf32> -> vector<16x768xf32>
    %36 = arith.addf %31, %35 : vector<16x768xf32>
    %c2_34 = arith.constant 2 : index
    %c0_35 = arith.constant 0 : index
    %37 = vector.load %arg7[%c2_34, %c0_35] : memref<18x768xbf16, #tpu.memory_space<vmem>>, vector<16x768xbf16>
    %c2_36 = arith.constant 2 : index
    %c0_37 = arith.constant 0 : index
    %c0_38 = arith.constant 0 : index
    %38 = vector.load %arg4[%c2_36, %c0_37, %c0_38] : memref<3x768x768xbf16, #tpu.memory_space<vmem>>, vector<1x768x768xbf16>
    %39 = vector.shape_cast %38 : vector<1x768x768xbf16> to vector<768x768xbf16>
    %cst_39 = arith.constant dense<0.000000e+00> : vector<16x768xf32>
    %40 = tpu.matmul %37, %39, %cst_39 {dimension_numbers = #tpu.dot_dimension_numbers<[1], [0], [0], [1], [0, 0, 1, 1], [], []>} : vector<16x768xbf16>, vector<768x768xbf16>, vector<16x768xf32> -> vector<16x768xf32>
    %41 = arith.addf %36, %40 : vector<16x768xf32>
    %cst_40 = arith.constant 0.00999999977 : f32
    %42 = vector.broadcast %cst_40 : f32 to vector<16x768xf32>
    %43 = arith.mulf %42, %41 : vector<16x768xf32>
    %44 = arith.maximumf %41, %43 : vector<16x768xf32>
    %45 = arith.truncf %44 : vector<16x768xf32> to vector<16x768xbf16>
    %c0_41 = arith.constant 0 : index
    %c0_42 = arith.constant 0 : index
    %c0_43 = arith.constant 0 : index
    %46 = vector.load %arg5[%c0_41, %c0_42, %c0_43] : memref<1x16x768xbf16, #tpu.memory_space<vmem>>, vector<1x16x768xbf16>
    %47 = vector.shape_cast %46 : vector<1x16x768xbf16> to vector<16x768xbf16>
    %48 = vector.shape_cast %45 : vector<16x768xbf16> to vector<1x16x768xbf16>
    tpu.vector_store %arg5[%c0_41, %c0_42, %c0_43], %48 {strides = array<i32>} : memref<1x16x768xbf16, #tpu.memory_space<vmem>>, vector<1x16x768xbf16>,
    return
  }
  func.func @transform_0(%arg0: i32, %arg1: i32) -> (i32, i32, i32) {
    %c0_i32 = arith.constant 0 : i32
    %c0_i32_0 = arith.constant 0 : i32
    %c0_i32_1 = arith.constant 0 : i32
    return %arg0, %c0_i32, %c0_i32_0 : i32, i32, i32
  }
  func.func @transform_1(%arg0: i32, %arg1: i32) -> (i32, i32, i32) {
    %c0_i32 = arith.constant 0 : i32
    %c0_i32_0 = arith.constant 0 : i32
    %c0_i32_1 = arith.constant 0 : i32
    %c0_i32_2 = arith.constant 0 : i32
    return %c0_i32, %c0_i32_0, %c0_i32_1 : i32, i32, i32
  }
  func.func @transform_2(%arg0: i32, %arg1: i32) -> (i32, i32, i32) {
    %c0_i32 = arith.constant 0 : i32
    %c0_i32_0 = arith.constant 0 : i32
    %c0_i32_1 = arith.constant 0 : i32
    %c0_i32_2 = arith.constant 0 : i32
    return %c0_i32, %c0_i32_0, %c0_i32_1 : i32, i32, i32
  }
  func.func @transform_3(%arg0: i32, %arg1: i32) -> (i32, i32, i32) {
    %c0_i32 = arith.constant 0 : i32
    %c0_i32_0 = arith.constant 0 : i32
    return %arg0, %arg1, %c0_i32 : i32, i32, i32
  }
}

</mosaic_0001>

<bundles_post_ra>
// kernel: bottleneck_forward.1
= control target key start
LH: loop header
LB: loop body
LE: loop exit
PB: predicated region body
PF: predicated region fallthrough
CT: control target
= control target key end

     0   :  { %s11991_s12 = smov 0   ;;  %s11993_s13 = smov 0   ;;  %s15347_s0 = inlined_call_operand.vmem [shape: bf16[2,16,128], index: 0, kind: input, shape index: {}]   ;;  %s15348_s1 = inlined_call_operand.vmem [shape: bf16[3,128,768], index: 1, kind: input, shape index: {}]   ;;  %s15349_s2 = inlined_call_operand.vmem [shape: bf16[3,768,768], index: 2, kind: input, shape index: {}]   ;;  %s15350_s3 = inlined_call_operand.vmem [shape: bf16[2,16,768], index: 3, kind: output, shape index: {}]  }
   0x1   :  { %s11995_s14 = smov 0  }
   0x2 LB: > { %s25_s15 = sadd.s32 1, %s11964_s13  ;;  %p8506_p0 = scmp.ge.s32.totalorder %s11968_s14, 1  ;;  %s11968_s14 = sphi %s11995_s14, %s13_s14   ;;  %s11964_s13 = sphi %s11993_s13, %s15362_s13   ;;  %s11960_s12 = sphi %s11991_s12, %s15361_s12  }
   0x3   : > { %p27_p1 = scmp.ge.s32.totalorder %s25_s15, 2  ;;  %p151_p2 = scmp.lt.s32.totalorder %s11968_s14, 3 }
   0x5   : > { %s15364_s15 = smov (%p27_p1, %s25_s15), 0  ;;  %p152_p3 = pnand %p8506_p0, %p151_p2 }
   0x6   : > { %v10422_v0 = vld [vmem:[%s15348_s1 + $0x184] ss:$24 sps:$4 sm:$0xff] (!%p152_p3)   ;;  %v11970_v2 = vmov (!%p152_p3), 0   ;;  %v10426_v3 = vld [vmem:[%s15348_s1 + $0x180] ss:$24 sps:$4 sm:$0xff] (!%p152_p3)   ;;  %p180_p4 = scmp.lt.s32.totalorder (!%p152_p3), %s11960_s12, 1 }
   0x7   : > { %155 = sbr.rel (%p152_p3) target bundleno = 1579 (0x62b), region = 32  ;;  %v10424_v1 = vld [vmem:[%s15348_s1 + $0xc] ss:$24 sps:$4 sm:$0xff] (!%p152_p3)   ;;  %659 = vmatprep.mubr.bf16.mxu0 (!%p152_p3), %v11970_v2  ;;  %1108 = vmatprep.mubr.bf16.mxu1 (!%p152_p3), %v11970_v2  ;;  %v10427_v4 = vld [vmem:[%s15348_s1 + $0x8] ss:$24 sps:$4 sm:$0xff] (!%p152_p3)   ;;  %vm205_vm0 = vcmask (!%p152_p3), 1040384  }
   0x8   : > { %627 = vmatprep.subr.bf16.mxu0 (!%p152_p3), %v10422_v0  ;;  %1076 = vmatprep.subr.bf16.mxu1 (!%p152_p3), %v10424_v1  ;;  %v10428_v5 = vld [vmem:[%s15348_s1 + $0x1b4] ss:$24 sps:$4 sm:$0xff] (!%p152_p3)   ;;  %v10432_v7 = vld [vmem:[%s15348_s1 + $0x1b0] ss:$24 sps:$4 sm:$0xff] (!%p152_p3)   ;;  %v10434_v9 = vld [vmem:[%s15348_s1 + $0x1e4] ss:$24 sps:$4 sm:$0xff] (!%p152_p3)  }
   0x9   : > { %628 = vmatpush1.bf16.msra.mxu0 (!%p152_p3), %v10426_v3  ;;  %1077 = vmatpush1.bf16.msra.mxu1 (!%p152_p3), %v10427_v4  ;;  %v10430_v6 = vld [vmem:[%s15348_s1 + $0x3c] ss:$24 sps:$4 sm:$0xff] (!%p152_p3)   ;;  %v10433_v8 = vld [vmem:[%s15348_s1 + $0x38] ss:$24 sps:$4 sm:$0xff] (!%p152_p3)   ;;  %v10436_v10 = vld [vmem:[%s15348_s1 + $0x6c] ss:$24 sps:$4 sm:$0xff] (!%p152_p3)  }
   0xa   : > { %629 = vmatprep.subr.bf16.mxu0 (!%p152_p3), %v10428_v5  ;;  %1078 = vmatprep.subr.bf16.mxu1 (!%p152_p3), %v10430_v6  ;;  %v10438_v11 = vld [vmem:[%s15348_s1 + $0x1e0] ss:$24 sps:$4 sm:$0xff] (!%p152_p3)   ;;  %v10440_v13 = vld [vmem:[%s15348_s1 + $0x214] ss:$24 sps:$4 sm:$0xff] (!%p152_p3)   ;;  %v10444_v15 = vld [vmem:[%s15348_s1 + $0x210] ss:$24 sps:$4 sm:$0xff] (!%p152_p3)  }
   0xb   : > { %v10439_v12 = vld [vmem:[%s15348_s1 + $0x68] ss:$24 sps:$4 sm:$0xff] (!%p152_p3)   ;;  %v10442_v14 = vld [vmem:[%s15348_s1 + $0x9c] ss:$24 sps:$4 sm:$0xff] (!%p152_p3)   ;;  %v10445_v16 = vld [vmem:[%s15348_s1 + $0x98] ss:$24 sps:$4 sm:$0xff] (!%p152_p3)  }
   0xc   : > { %v10446_v17 = vld [vmem:[%s15348_s1 + $0x244] ss:$24 sps:$4 sm:$0xff] (!%p152_p3)   ;;  %v10450_v19 = vld [vmem:[%s15348_s1 + $0x240] ss:$24 sps:$4 sm:$0xff] (!%p152_p3)   ;;  %v10452_v21 = vld [vmem:[%s15348_s1 + $0x274] ss:$24 sps:$4 sm:$0xff] (!%p152_p3)  }
   0xd   : > { %630 = vmatpush1.bf16.msra.mxu0 (!%p152_p3), %v10432_v7  ;;  %1079 = vmatpush1.bf16.msra.mxu1 (!%p152_p3), %v10433_v8  ;;  %v10448_v18 = vld [vmem:[%s15348_s1 + $0xcc] ss:$24 sps:$4 sm:$0xff] (!%p152_p3)   ;;  %v10451_v20 = vld [vmem:[%s15348_s1 + $0xc8] ss:$24 sps:$4 sm:$0xff] (!%p152_p3)   ;;  %v10454_v22 = vld [vmem:[%s15348_s1 + $0xfc] ss:$24 sps:$4 sm:$0xff] (!%p152_p3)  }
   0xe   : > { %631 = vmatprep.subr.bf16.mxu0 %v10434_v9  ;;  %1080 = vmatprep.subr.bf16.mxu1 %v10436_v10  ;;  %s15366_s12 = smov (!%p180_p4, %s11960_s12), 1  ;;  %v10456_v23 = vld [vmem:[%s15348_s1 + $0x270] ss:$24 sps:$4 sm:$0xff]   ;;  %v10458_v25 = vld [vmem:[%s15348_s1 + $0x2a4] ss:$24 sps:$4 sm:$0xff]   ;;  %vm206_vm2 = vcmask 1044484  }
   0xf   : > { %s10238_s16 = sshll.u32 %s15366_s12, 3  ;;  %v10457_v24 = vld [vmem:[%s15348_s1 + $0xf8] ss:$24 sps:$4 sm:$0xff]   ;;  %v10460_v26 = vld [vmem:[%s15348_s1 + $0x12c] ss:$24 sps:$4 sm:$0xff]   ;;  %vm242_vm4 = vcmask 1041409   ;;  %vm12130_vm6 = vmor %vm205_vm0, %vm206_vm2 }
  0x10   : > { %vm220_vm1 = vsmask.f32 7938  ;;  %v10462_v27 = vld [vmem:[%s15348_s1 + $0x2a0] ss:$24 sps:$4 sm:$0xff]   ;;  %s12102_s27 = scalar_lea.vmem %s15347_s0, %s10238_s16  ;;  %vm243_vm3 = vsmask.f32 1280 }
  0x11   : > { %632 = vmatpush1.bf16.msra.mxu0 %v10438_v11  ;;  %1081 = vmatpush1.bf16.msra.mxu1 %v10439_v12  ;;  %v10463_v28 = vld [vmem:[%s15348_s1 + $0x128] ss:$24 sps:$4 sm:$0xff]   ;;  %v10464_v29 = vld [vmem:[%s15348_s1 + $0x2d4] ss:$24 sps:$4 sm:$0xff]   ;;  %v202_v32 = vld [vmem:[%s12102_s27 + $0x4] sm:$0xf] }
  0x12   : > { %633 = vmatprep.subr.bf16.mxu0 %v10440_v13  ;;  %1082 = vmatprep.subr.bf16.mxu1 %v10442_v14  ;;  %v10466_v30 = vld [vmem:[%s15348_s1 + $0x15c] ss:$24 sps:$4 sm:$0xff]   ;;  %v201_v31 = vld [vmem:[%s12102_s27] sm:$0xf]  ;;  %v210_v34 = vrot.slane %v202_v32, 7  ;;  %vm12118_vm5 = vmand %vm205_vm0, %vm220_vm1  ;;  %vm1231_vm13 = vcmask 1046528  }
  0x13   : > { %v208_v33 = vrot.slane %v201_v31, 7  ;;  %v219_v35 = vld [vmem:[%s12102_s27] sm:$0x1]  ;;  %v10468_v38 = vld [vmem:[%s15348_s1 + $0x2d0] ss:$24 sps:$4 sm:$0xff]   ;;  %vm244_vm8 = vmand %vm242_vm4, %vm243_vm3  ;;  %s10396_s8 = smul.u32 48, %s15366_s12 }
  0x14   : > { %v222_v37 = vld [vmem:[#allocation2] sm:$0x1]  ;;  %v10469_v39 = vld [vmem:[%s15348_s1 + $0x158] ss:$24 sps:$4 sm:$0xff]   ;;  %vm232_vm7 = vsmask.f32 256 }
  0x15   : > { %634 = vmatpush1.bf16.msra.mxu0 %v10444_v15  ;;  %1083 = vmatpush1.bf16.msra.mxu1 %v10445_v16  ;;  %v223_v41 = vsel %vm12118_vm5, %v219_v35, %v222_v37  ;;  %v237_v42 = vld [vmem:[%s12102_s27 + $0x4] sm:$0x8]  ;;  %v209_v43 = vrot.slane %v208_v33, 4  ;;  %v212_v44 = vrot.slane %v210_v34, 4  ;;  %216 = vst [vmem:[#allocation2] sm:$0xe] %v208_v33  ;;  %vm12151_vm9 = vmand %vm205_vm0, %vm232_vm7  ;;  %s15329_s10 = scalar_lea.vmem %s15350_s3, %s10396_s8 }
  0x16   : > { %635 = vmatprep.subr.bf16.mxu0 %v10446_v17  ;;  %1084 = vmatprep.subr.bf16.mxu1 %v10448_v18  ;;  %224 = vst [vmem:[#allocation2] sm:$0x1] %v223_v41  ;;  %v8511_v45 = vrot.slane %v237_v42, 10  ;;  %v245_v46 = vld [vmem:[#allocation2 + $0x8] sm:$0x2] }
  0x17   : > { %v225_v47 = vld [vmem:[%s12102_s27] sm:$0x1]  ;;  %v248_v48 = vld [vmem:[%s12102_s27 + $0x4] sm:$0x8]  ;;  %v211_v51 = vsel %vm12130_vm6, %v209_v43, %v210_v34  ;;  %218 = vst [vmem:[#allocation2 + $0x8] sm:$0x1] %v212_v44 }
  0x18   : > { %v10472_v49 = vld [vmem:[%s15348_s1 + $0x18c] ss:$24 sps:$4 sm:$0xff]   ;;  %v246_v52 = vsel %vm244_vm8, %v8511_v45, %v245_v46  ;;  %217 = vst [vmem:[#allocation2 + $0x4] sm:$0xf] %v211_v51  ;;  %v250_v53 = vshll.u32 %v248_v48, 16  ;;  %v227_v54 = vshrl.u32 %v225_v47, 16 }
  0x19   : > { %636 = vmatpush1.bf16.msra.mxu0 %v10450_v19  ;;  %1085 = vmatpush1.bf16.msra.mxu1 %v10451_v20  ;;  %v10475_v50 = vld [vmem:[%s15348_s1 + $0x30c] ss:$24 sps:$4 sm:$0xff]   ;;  %247 = vst [vmem:[#allocation2 + $0x8] sm:$0x2] %v246_v52  ;;  %vm255_vm10 = vsmask.f32 7942 }
  0x1a   : > { %637 = vmatprep.subr.bf16.mxu0 %v10452_v21  ;;  %1086 = vmatprep.subr.bf16.mxu1 %v10454_v22  ;;  %v8512_v57 = vrot.slane %v250_v53, 10  ;;  %vm256_vm11 = vmand %vm242_vm4, %vm255_vm10  ;;  %v10473_v62 = vld [vmem:[%s15348_s1 + $0x308] ss:$24 sps:$4 sm:$0xff]   ;;  %v10483_v1 = vld [vmem:[%s15348_s1 + $0x33c] ss:$24 sps:$4 sm:$0xff]  }
  0x1b   : > { %v10481_v6 = vld [vmem:[%s15348_s1 + $0x338] ss:$24 sps:$4 sm:$0xff]   ;;  %v10489_v8 = vld [vmem:[%s15348_s1 + $0x36c] ss:$24 sps:$4 sm:$0xff]   ;;  %vm369_vm12 = vsmask.f32 7424 }
  0x1c   : > { %v10470_v12 = vld [vmem:[%s15348_s1 + $0x188] ss:$24 sps:$4 sm:$0xff]   ;;  %v10480_v14 = vld [vmem:[%s15348_s1 + $0x1bc] ss:$24 sps:$4 sm:$0xff]   ;;  %v10478_v18 = vld [vmem:[%s15348_s1 + $0x1b8] ss:$24 sps:$4 sm:$0xff]  }
  0x1d   : > { %638 = vmatpush1.bf16.msra.mxu0 %v10456_v23  ;;  %1087 = vmatpush1.bf16.msra.mxu1 %v10457_v24  ;;  %v234_v56 = vld [vmem:[#allocation2] sm:$0x1]  ;;  %v10495_v16 = vld [vmem:[%s15348_s1 + $0x39c] ss:$24 sps:$4 sm:$0xff]   ;;  %v10486_v20 = vld [vmem:[%s15348_s1 + $0x1ec] ss:$24 sps:$4 sm:$0xff]  }
  0x1e   : > { %639 = vmatprep.subr.bf16.mxu0 %v10458_v25  ;;  %1088 = vmatprep.subr.bf16.mxu1 %v10460_v26  ;;  %v235_v58 = vsel %vm12151_vm9, %v227_v54, %v234_v56  ;;  %v12169_v3 = vld [vmem:[#allocation2 + $0x8] ss:$0 sps:$4 sm:$0x33]   ;;  %v10493_v21 = vld [vmem:[%s15348_s1 + $0x398] ss:$24 sps:$4 sm:$0xff]  }
  0x1f   : > { %236 = vst [vmem:[#allocation2] sm:$0x1] %v235_v58  ;;  %v12158_v61 = vld [vmem:[#allocation2 + $0x4] sm:$0xf]  ;;  %v378_v7 = vshll.u32 %v12169_v3, 16  ;;  %v382_v19 = vshrl.u32 %v12169_v3, 16 }
  0x20   : > { %v257_v59 = vld [vmem:[#allocation2 + $0x8] sm:$0x2]  ;;  %v12182_v11 = vld [vmem:[#allocation2 + $0x8] ss:$0 sps:$4 sm:$0x11]   ;;  %v12264_v42 = vrot.slane %v12169_v3, 1 }
  0x21   : > { %640 = vmatpush1.bf16.msra.mxu0 %v10462_v27  ;;  %1089 = vmatpush1.bf16.msra.mxu1 %v10463_v28  ;;  %v258_v60 = vsel %vm256_vm11, %v8512_v57, %v257_v59  ;;  %v380_v10 = vrot.slane %v378_v7, 1  ;;  %v10487_v15 = vld [vmem:[%s15348_s1 + $0x368] ss:$24 sps:$4 sm:$0xff]   ;;  %v10501_v22 = vld [vmem:[%s15348_s1 + $0x3cc] ss:$24 sps:$4 sm:$0xff]  }
  0x22   : > { %641 = vmatprep.subr.bf16.mxu0 %v10464_v29  ;;  %1090 = vmatprep.subr.bf16.mxu1 %v10466_v30  ;;  %259 = vst [vmem:[#allocation2 + $0x8] sm:$0x2] %v258_v60  ;;  %v10484_v23 = vld [vmem:[%s15348_s1 + $0x1e8] ss:$24 sps:$4 sm:$0xff]   ;;  %v10492_v25 = vld [vmem:[%s15348_s1 + $0x21c] ss:$24 sps:$4 sm:$0xff]  }
  0x23   : > { %v12219_v24 = vor.u32 %v382_v19, %v380_v10  ;;  %v10499_v26 = vld [vmem:[%s15348_s1 + $0x3c8] ss:$24 sps:$4 sm:$0xff]   ;;  %v10507_v27 = vld [vmem:[%s15348_s1 + $0x3fc] ss:$24 sps:$4 sm:$0xff]   ;;  %v10490_v28 = vld [vmem:[%s15348_s1 + $0x218] ss:$24 sps:$4 sm:$0xff]  }
  0x24   : > { %v10498_v29 = vld [vmem:[%s15348_s1 + $0x24c] ss:$24 sps:$4 sm:$0xff]   ;;  %v10505_v30 = vld [vmem:[%s15348_s1 + $0x3f8] ss:$24 sps:$4 sm:$0xff]   ;;  %v1178_v32 = vld [vmem:[#allocation2] sm:$0xe] }
  0x25   : > { %642 = vmatpush1.bf16.msra.mxu0 %v10468_v38  ;;  %1091 = vmatpush1.bf16.msra.mxu1 %v10469_v39  ;;  %v10514_v31 = vld [vmem:[%s15348_s1 + $0x42c] ss:$24 sps:$4 sm:$0xff]   ;;  %v10496_v33 = vld [vmem:[%s15348_s1 + $0x248] ss:$24 sps:$4 sm:$0xff]   ;;  %v10504_v34 = vld [vmem:[%s15348_s1 + $0x27c] ss:$24 sps:$4 sm:$0xff]   ;;  %v8708_v37 = vcombine.low %v1178_v32, %v12158_v61 }
  0x26   : > { %678 = vmatprep.subr.bf16.mxu0 %v10472_v49  ;;  %1528 = vmatprep.subr.bf16.mxu1 %v10475_v50  ;;  %v260_v63 = vld [vmem:[#allocation2] sm:$0xf]  ;;  %v10520_v38 = vld [vmem:[%s15348_s1 + $0x45c] ss:$24 sps:$4 sm:$0xff]   ;;  %v10502_v39 = vld [vmem:[%s15348_s1 + $0x278] ss:$24 sps:$4 sm:$0xff]  }
  0x27   : > { %v12164_v0 = vcombine.low %v260_v63, %v12158_v61  ;;  %v10512_v35 = vld [vmem:[%s15348_s1 + $0x428] ss:$24 sps:$4 sm:$0xff]   ;;  %v10518_v40 = vld [vmem:[%s15348_s1 + $0x458] ss:$24 sps:$4 sm:$0xff]   ;;  %v1232_v41 = vrot.slane %v8708_v37, 1 }
  0x28   : > { %v10510_v43 = vld [vmem:[%s15348_s1 + $0x2ac] ss:$24 sps:$4 sm:$0xff]   ;;  %v10508_v44 = vld [vmem:[%s15348_s1 + $0x2a8] ss:$24 sps:$4 sm:$0xff]   ;;  %v10517_v46 = vld [vmem:[%s15348_s1 + $0x2dc] ss:$24 sps:$4 sm:$0xff]  }
  0x29   : > { %1109 = vmatmul.mubr.bf16.vlgmr.msra.gmra.mrb[0].mxu1 %v12164_v0  ;;  %v371_v4 = vshrl.u32 %v12164_v0, 16  ;;  %v373_v5 = vshll.u32 %v12164_v0, 16  ;;  %v12274_v45 = vsel %vm1231_vm13, %v1232_v41, %v12264_v42  ;;  %v10515_v47 = vld [vmem:[%s15348_s1 + $0x2d8] ss:$24 sps:$4 sm:$0xff]   ;;  %v10523_v48 = vld [vmem:[%s15348_s1 + $0x194] ss:$24 sps:$4 sm:$0xff]  }
  0x2a   : > { %1529 = vmatpush1.bf16.msra.mxu1 %v10473_v62  ;;  %1118 = vmatprep.mubr.bf16.mxu1 %v11970_v2  ;;  %v10521_v49 = vld [vmem:[%s15348_s1 + $0x190] ss:$24 sps:$4 sm:$0xff]   ;;  %v10527_v50 = vld [vmem:[%s15348_s1 + $0x1c4] ss:$24 sps:$4 sm:$0xff]   ;;  %v10525_v51 = vld [vmem:[%s15348_s1 + $0x1c0] ss:$24 sps:$4 sm:$0xff]  }
  0x2b   : > { %1530 = vmatprep.subr.bf16.mxu1 %v10483_v1  ;;  %v375_v9 = vrot.slane %v373_v5, 1  ;;  %v10530_v52 = vld [vmem:[%s15348_s1 + $0x1f4] ss:$24 sps:$4 sm:$0xff]   ;;  %v10528_v53 = vld [vmem:[%s15348_s1 + $0x1f0] ss:$24 sps:$4 sm:$0xff]  }
  0x2c   : > { %v10533_v54 = vld [vmem:[%s15348_s1 + $0x224] ss:$24 sps:$4 sm:$0xff]   ;;  %v10531_v56 = vld [vmem:[%s15348_s1 + $0x220] ss:$24 sps:$4 sm:$0xff]   ;;  %v10536_v57 = vld [vmem:[%s15348_s1 + $0x254] ss:$24 sps:$4 sm:$0xff]  }
  0x2d   : > { %v376_v13 = vor.u32 %v375_v9, %v371_v4  ;;  %v10534_v58 = vld [vmem:[%s15348_s1 + $0x250] ss:$24 sps:$4 sm:$0xff]   ;;  %v10539_v59 = vld [vmem:[%s15348_s1 + $0x284] ss:$24 sps:$4 sm:$0xff]   ;;  %v10537_v60 = vld [vmem:[%s15348_s1 + $0x280] ss:$24 sps:$4 sm:$0xff]  }
  0x2e   : > { %1531 = vmatpush1.bf16.msra.mxu1 %v10481_v6  ;;  %v10542_v61 = vld [vmem:[%s15348_s1 + $0x2b4] ss:$24 sps:$4 sm:$0xff]   ;;  %v10540_v62 = vld [vmem:[%s15348_s1 + $0x2b0] ss:$24 sps:$4 sm:$0xff]   ;;  %v10545_v63 = vld [vmem:[%s15348_s1 + $0x2e4] ss:$24 sps:$4 sm:$0xff]  }
  0x2f   : > { %1532 = vmatprep.subr.bf16.mxu1 %v10489_v8  ;;  %v12197_v17 = vsel %vm369_vm12, %v376_v13, %v380_v10  ;;  %v10543_v1 = vld [vmem:[%s15348_s1 + $0x2e0] ss:$24 sps:$4 sm:$0xff]   ;;  %v10548_v3 = vld [vmem:[%s15348_s1 + $0x4] ss:$24 sps:$4 sm:$0xff]   ;;  %v10551_v5 = vld [vmem:[%s15348_s1 + $0x34] ss:$24 sps:$4 sm:$0xff]  }
  0x30   : > { %660 = vmatmul.mubr.bf16.vlgmr.msra.gmra.mrb[0].mxu0 %v12197_v17  ;;  %v10546_v4 = vld [vmem:[%s15348_s1] ss:$24 sps:$4 sm:$0xff]   ;;  %v10549_v6 = vld [vmem:[%s15348_s1 + $0x30] ss:$24 sps:$4 sm:$0xff]   ;;  %v10554_v7 = vld [vmem:[%s15348_s1 + $0x64] ss:$24 sps:$4 sm:$0xff]  }
  0x31   : > { %1119 = vmatmul.mubr.bf16.gmra.mrb[4].mxu1 %v12182_v11  ;;  %679 = vmatpush1.bf16.msra.mxu0 %v10470_v12  ;;  %v10552_v8 = vld [vmem:[%s15348_s1 + $0x60] ss:$24 sps:$4 sm:$0xff]   ;;  %v10557_v9 = vld [vmem:[%s15348_s1 + $0x94] ss:$24 sps:$4 sm:$0xff]   ;;  %v10555_v10 = vld [vmem:[%s15348_s1 + $0x90] ss:$24 sps:$4 sm:$0xff]  }
  0x32   : > { %1533 = vmatpush1.bf16.msra.mxu1 %v10487_v15  ;;  %680 = vmatprep.subr.bf16.mxu0 %v10480_v14  ;;  %v10560_v12 = vld [vmem:[%s15348_s1 + $0xc4] ss:$24 sps:$4 sm:$0xff]   ;;  %v10558_v13 = vld [vmem:[%s15348_s1 + $0xc0] ss:$24 sps:$4 sm:$0xff]   ;;  %v10563_v14 = vld [vmem:[%s15348_s1 + $0xf4] ss:$24 sps:$4 sm:$0xff]  }
  0x33   : > { %1534 = vmatprep.subr.bf16.mxu1 %v10495_v16  ;;  %669 = vmatprep.mubr.bf16.mxu0 %v11970_v2  ;;  %v10561_v15 = vld [vmem:[%s15348_s1 + $0xf0] ss:$24 sps:$4 sm:$0xff]   ;;  %v10566_v16 = vld [vmem:[%s15348_s1 + $0x124] ss:$24 sps:$4 sm:$0xff]   ;;  %v10594_v37 = vld [vmem:[%s15348_s1 + $0x300] ss:$24 sps:$4 sm:$0xff]  }
  0x34   : > { %1560 = vmatprep.mubr.bf16.mxu1 %v11970_v2  ;;  %v10567_v19 = vld [vmem:[%s15348_s1 + $0x150] ss:$24 sps:$4 sm:$0xff]   ;;  %v10600_v41 = vld [vmem:[%s15348_s1 + $0x360] ss:$24 sps:$4 sm:$0xff]   ;;  %vm1775_vm14 = vsmask.f32 4352 }
  0x35   : > { %681 = vmatpush1.bf16.msra.mxu0 %v10478_v18  ;;  %v10569_v18 = vld [vmem:[%s15348_s1 + $0x154] ss:$24 sps:$4 sm:$0xff]   ;;  %v10588_v32 = vld [vmem:[%s15348_s1 + $0x130] ss:$24 sps:$4 sm:$0xff]   ;;  %vm1776_vm15 = vmand %vm206_vm2, %vm1775_vm14  ;;  %vm1804_vm0 = vsmask.f32 7954 }
  0x36   : > { %1535 = vmatpush1.bf16.msra.mxu1 %v10493_v21  ;;  %682 = vmatprep.subr.bf16.mxu0 %v10486_v20  ;;  %v10572_v20 = vld [vmem:[%s15348_s1 + $0x14] ss:$24 sps:$4 sm:$0xff]   ;;  %v10570_v21 = vld [vmem:[%s15348_s1 + $0x10] ss:$24 sps:$4 sm:$0xff]   ;;  %vm12659_vm1 = vmor %vm1776_vm15, %vm12151_vm9 }
  0x37   : > { %1536 = vmatprep.subr.bf16.mxu1 %v10501_v22  ;;  %v10575_v22 = vld [vmem:[%s15348_s1 + $0x44] ss:$24 sps:$4 sm:$0xff]   ;;  %vm1805_vm3 = vmand %vm206_vm2, %vm1804_vm0  ;;  %v10710_v36 = vld [vmem:[%s15349_s2 + $0xb14] ss:$24 sps:$4 sm:$0xff]  }
  0x38   : > { %670 = vmatmul.mubr.bf16.gmra.mrb[4].mxu0 %v12219_v24  ;;  %v10701_v55 = vld [vmem:[%s15349_s2 + $0xac4] ss:$24 sps:$4 sm:$0xff]   ;;  %vm12688_vm2 = vmor %vm1805_vm3, %vm12118_vm5 }
  0x39   : > { %683 = vmatpush1.bf16.msra.mxu0 %v10484_v23  ;;  %710 = vmatprep.mubr.bf16.mxu0 %v11970_v2  ;;  %v10573_v23 = vld [vmem:[%s15348_s1 + $0x40] ss:$24 sps:$4 sm:$0xff]  }
  0x3a   : > { %1537 = vmatpush1.bf16.msra.mxu1 %v10499_v26  ;;  %684 = vmatprep.subr.bf16.mxu0 %v10492_v25  ;;  %v10576_v25 = vld [vmem:[%s15348_s1 + $0x70] ss:$24 sps:$4 sm:$0xff]   ;;  %v10581_v26 = vld [vmem:[%s15348_s1 + $0xa4] ss:$24 sps:$4 sm:$0xff]  }
  0x3b   : > { %1538 = vmatprep.subr.bf16.mxu1 %v10507_v27  ;;  %v10579_v27 = vld [vmem:[%s15348_s1 + $0xa0] ss:$24 sps:$4 sm:$0xff]  }
  0x3d   : > { %685 = vmatpush1.bf16.msra.mxu0 %v10490_v28  ;;  %v10584_v28 = vld [vmem:[%s15348_s1 + $0xd4] ss:$24 sps:$4 sm:$0xff]  }
  0x3e   : > { %1539 = vmatpush1.bf16.msra.mxu1 %v10505_v30  ;;  %686 = vmatprep.subr.bf16.mxu0 %v10498_v29  ;;  %v10582_v29 = vld [vmem:[%s15348_s1 + $0xd0] ss:$24 sps:$4 sm:$0xff]   ;;  %v10587_v30 = vld [vmem:[%s15348_s1 + $0x104] ss:$24 sps:$4 sm:$0xff]  }
  0x3f   : > { %1540 = vmatprep.subr.bf16.mxu1 %v10514_v31  ;;  %v10585_v31 = vld [vmem:[%s15348_s1 + $0x100] ss:$24 sps:$4 sm:$0xff]  }
  0x41   : > { %687 = vmatpush1.bf16.msra.mxu0 %v10496_v33  ;;  %v10593_v33 = vld [vmem:[%s15348_s1 + $0x164] ss:$24 sps:$4 sm:$0xff]  }
  0x42   : > { %1541 = vmatpush1.bf16.msra.mxu1 %v10512_v35  ;;  %688 = vmatprep.subr.bf16.mxu0 %v10504_v34  ;;  %v10591_v34 = vld [vmem:[%s15348_s1 + $0x160] ss:$24 sps:$4 sm:$0xff]   ;;  %v10596_v35 = vld [vmem:[%s15348_s1 + $0x304] ss:$24 sps:$4 sm:$0xff]  }
  0x43   : > { %1542 = vmatprep.subr.bf16.mxu1 %v10520_v38  ;;  %v10599_v38 = vld [vmem:[%s15348_s1 + $0x334] ss:$24 sps:$4 sm:$0xff]  }
  0x45   : > { %689 = vmatpush1.bf16.msra.mxu0 %v10502_v39  ;;  %v10597_v39 = vld [vmem:[%s15348_s1 + $0x330] ss:$24 sps:$4 sm:$0xff]  }
  0x46   : > { %1543 = vmatpush1.bf16.msra.mxu1 %v10518_v40  ;;  %690 = vmatprep.subr.bf16.mxu0 %v10510_v43  ;;  %v10602_v40 = vld [vmem:[%s15348_s1 + $0x364] ss:$24 sps:$4 sm:$0xff]   ;;  %v10605_v43 = vld [vmem:[%s15348_s1 + $0x394] ss:$24 sps:$4 sm:$0xff]  }
  0x49   : > { %1561 = vmatmul.mubr.bf16.vlgmr.msra.gmra.mrb[0].mxu1 %v12274_v45  ;;  %691 = vmatpush1.bf16.msra.mxu0 %v10508_v44  ;;  %v11944_v44 = vld [vmem:[#allocation2 + $0x8] ss:$0 sps:$4 sm:$0x11]  }
  0x4a   : > { %1570 = vmatprep.mubr.bf16.mxu1 %v11970_v2  ;;  %692 = vmatprep.subr.bf16.mxu0 %v10517_v46  ;;  %v10608_v46 = vld [vmem:[%s15348_s1 + $0x3c4] ss:$24 sps:$4 sm:$0xff]  }
  0x4d   : > { %693 = vmatpush1.bf16.msra.mxu0 %v10515_v47  ;;  %v10606_v47 = vld [vmem:[%s15348_s1 + $0x3c0] ss:$24 sps:$4 sm:$0xff]  }
  0x4e   : > { %729 = vmatprep.subr.bf16.mxu0 %v10523_v48  ;;  %v10611_v48 = vld [vmem:[%s15348_s1 + $0x3f4] ss:$24 sps:$4 sm:$0xff]  }
  0x50   : > { %711 = vmatmul.mubr.bf16.vlgmr.msra.gmra.mrb[8].mxu0 %v12197_v17 }
  0x51   : > { %1571 = vmatmul.mubr.bf16.gmra.mrb[4].mxu1 %v12264_v42  ;;  %730 = vmatpush1.bf16.msra.mxu0 %v10521_v49  ;;  %v10645_v49 = vld [vmem:[%s15349_s2 + $0x910] ss:$24 sps:$4 sm:$0xff]  }
  0x52   : > { %720 = vmatprep.mubr.bf16.mxu0 %v11970_v2  ;;  %731 = vmatprep.subr.bf16.mxu0 %v10527_v50  ;;  %v10647_v50 = vld [vmem:[%s15349_s2 + $0x914] ss:$24 sps:$4 sm:$0xff]  }
  0x53   : > { %4217 = vmatprep.subr.bf16.mxu1 %v10647_v50 }
  0x54   : > { %4218 = vmatpush1.bf16.msra.mxu1 %v10645_v49 }
  0x55   : > { %732 = vmatpush1.bf16.msra.mxu0 %v10525_v51  ;;  %v10653_v51 = vld [vmem:[%s15349_s2 + $0x944] ss:$24 sps:$4 sm:$0xff]  }
  0x56   : > { %733 = vmatprep.subr.bf16.mxu0 %v10530_v52  ;;  %v10609_v52 = vld [vmem:[%s15348_s1 + $0x3f0] ss:$24 sps:$4 sm:$0xff]   ;;  %4219 = vmatprep.subr.bf16.mxu1 %v10653_v51 }
  0x58   : > { %721 = vmatmul.mubr.bf16.gmra.mrb[12].mxu0 %v12219_v24 }
  0x59   : > { %734 = vmatpush1.bf16.msra.mxu0 %v10528_v53  ;;  %761 = vmatprep.mubr.bf16.mxu0 %v11970_v2  ;;  %v10614_v53 = vld [vmem:[%s15348_s1 + $0x424] ss:$24 sps:$4 sm:$0xff]  }
  0x5a   : > { %735 = vmatprep.subr.bf16.mxu0 %v10533_v54  ;;  %v10651_v54 = vld [vmem:[%s15349_s2 + $0x940] ss:$24 sps:$4 sm:$0xff]  }
  0x5b   : > { %4220 = vmatpush1.bf16.msra.mxu1 %v10651_v54 }
  0x5d   : > { %736 = vmatpush1.bf16.msra.mxu0 %v10531_v56  ;;  %v10659_v56 = vld [vmem:[%s15349_s2 + $0x974] ss:$24 sps:$4 sm:$0xff]  }
  0x5e   : > { %737 = vmatprep.subr.bf16.mxu0 %v10536_v57  ;;  %v10612_v57 = vld [vmem:[%s15348_s1 + $0x420] ss:$24 sps:$4 sm:$0xff]   ;;  %4221 = vmatprep.subr.bf16.mxu1 %v10659_v56 }
  0x61   : > { %738 = vmatpush1.bf16.msra.mxu0 %v10534_v58  ;;  %v10617_v58 = vld [vmem:[%s15348_s1 + $0x454] ss:$24 sps:$4 sm:$0xff]  }
  0x62   : > { %739 = vmatprep.subr.bf16.mxu0 %v10539_v59  ;;  %v10657_v59 = vld [vmem:[%s15349_s2 + $0x970] ss:$24 sps:$4 sm:$0xff]  }
  0x63   : > { %4222 = vmatpush1.bf16.msra.mxu1 %v10657_v59 }
  0x65   : > { %740 = vmatpush1.bf16.msra.mxu0 %v10537_v60  ;;  %v10665_v60 = vld [vmem:[%s15349_s2 + $0x9a4] ss:$24 sps:$4 sm:$0xff]  }
  0x66   : > { %741 = vmatprep.subr.bf16.mxu0 %v10542_v61  ;;  %v10615_v61 = vld [vmem:[%s15348_s1 + $0x450] ss:$24 sps:$4 sm:$0xff]   ;;  %4223 = vmatprep.subr.bf16.mxu1 %v10665_v60 }
  0x69   : > { %742 = vmatpush1.bf16.msra.mxu0 %v10540_v62  ;;  %v10620_v62 = vld [vmem:[%s15348_s1 + $0x314] ss:$24 sps:$4 sm:$0xff]  }
  0x6a   : > { %743 = vmatprep.subr.bf16.mxu0 %v10545_v63  ;;  %v10663_v63 = vld [vmem:[%s15349_s2 + $0x9a0] ss:$24 sps:$4 sm:$0xff]  }
  0x6b   : > { %4224 = vmatpush1.bf16.msra.mxu1 %v10663_v63  ;;  %v10692_v63 = vld [vmem:[%s15349_s2 + $0xa84] ss:$24 sps:$4 sm:$0xff]  }
  0x6d   : > { %744 = vmatpush1.bf16.msra.mxu0 %v10543_v1  ;;  %v10671_v1 = vld [vmem:[%s15349_s2 + $0x9d4] ss:$24 sps:$4 sm:$0xff]  }
  0x6e   : > { %1025 = vmatprep.subr.bf16.mxu0 %v10548_v3  ;;  %v10618_v3 = vld [vmem:[%s15348_s1 + $0x310] ss:$24 sps:$4 sm:$0xff]   ;;  %4225 = vmatprep.subr.bf16.mxu1 %v10671_v1  ;;  %v10695_v1 = vld [vmem:[%s15349_s2 + $0xa94] ss:$24 sps:$4 sm:$0xff]  }
  0x70   : > { %762 = vmatmul.mubr.bf16.vlgmr.msra.gmra.mrb[16].mxu0 %v12197_v17  ;;  %v10564_v17 = vld [vmem:[%s15348_s1 + $0x120] ss:$24 sps:$4 sm:$0xff]  }
  0x71   : > { %1026 = vmatpush1.bf16.msra.mxu0 %v10546_v4  ;;  %771 = vmatprep.mubr.bf16.mxu0 %v11970_v2  ;;  %v10623_v4 = vld [vmem:[%s15348_s1 + $0x344] ss:$24 sps:$4 sm:$0xff]  }
  0x72   : > { %1027 = vmatprep.subr.bf16.mxu0 %v10551_v5  ;;  %v10669_v5 = vld [vmem:[%s15349_s2 + $0x9d0] ss:$24 sps:$4 sm:$0xff]  }
  0x73   : > { %4226 = vmatpush1.bf16.msra.mxu1 %v10669_v5  ;;  %v10693_v5 = vld [vmem:[%s15349_s2 + $0xa90] ss:$24 sps:$4 sm:$0xff]  }
  0x75   : > { %1028 = vmatpush1.bf16.msra.mxu0 %v10549_v6  ;;  %v10677_v6 = vld [vmem:[%s15349_s2 + $0xa04] ss:$24 sps:$4 sm:$0xff]  }
  0x76   : > { %1029 = vmatprep.subr.bf16.mxu0 %v10554_v7  ;;  %v10621_v7 = vld [vmem:[%s15348_s1 + $0x340] ss:$24 sps:$4 sm:$0xff]   ;;  %4227 = vmatprep.subr.bf16.mxu1 %v10677_v6 }
  0x78   : > { %772 = vmatmul.mubr.bf16.gmra.mrb[20].mxu0 %v12219_v24  ;;  %v10578_v24 = vld [vmem:[%s15348_s1 + $0x74] ss:$24 sps:$4 sm:$0xff]  }
  0x79   : > { %1030 = vmatpush1.bf16.msra.mxu0 %v10552_v8  ;;  %1057 = vmatprep.mubr.bf16.mxu0 %v11970_v2  ;;  %v10626_v8 = vld [vmem:[%s15348_s1 + $0x374] ss:$24 sps:$4 sm:$0xff]  }
  0x7a   : > { %1031 = vmatprep.subr.bf16.mxu0 %v10557_v9  ;;  %v10675_v9 = vld [vmem:[%s15349_s2 + $0xa00] ss:$24 sps:$4 sm:$0xff]  }
  0x7b   : > { %4228 = vmatpush1.bf16.msra.mxu1 %v10675_v9  ;;  %v10770_v9 = vld [vmem:[%s15349_s2 + $0xcd4] ss:$24 sps:$4 sm:$0xff]  }
  0x7d   : > { %1032 = vmatpush1.bf16.msra.mxu0 %v10555_v10  ;;  %v10624_v10 = vld [vmem:[%s15348_s1 + $0x370] ss:$24 sps:$4 sm:$0xff]  }
  0x7e   : > { %1033 = vmatprep.subr.bf16.mxu0 %v10560_v12  ;;  %v10629_v12 = vld [vmem:[%s15348_s1 + $0x3a4] ss:$24 sps:$4 sm:$0xff]  }
  0x81   : > { %1034 = vmatpush1.bf16.msra.mxu0 %v10558_v13  ;;  %v10627_v13 = vld [vmem:[%s15348_s1 + $0x3a0] ss:$24 sps:$4 sm:$0xff]  }
  0x82   : > { %1035 = vmatprep.subr.bf16.mxu0 %v10563_v14  ;;  %v10632_v14 = vld [vmem:[%s15348_s1 + $0x3d4] ss:$24 sps:$4 sm:$0xff]  }
  0x85   : > { %1036 = vmatpush1.bf16.msra.mxu0 %v10561_v15  ;;  %v10630_v15 = vld [vmem:[%s15348_s1 + $0x3d0] ss:$24 sps:$4 sm:$0xff]  }
  0x86   : > { %1037 = vmatprep.subr.bf16.mxu0 %v10566_v16  ;;  %v10635_v16 = vld [vmem:[%s15348_s1 + $0x404] ss:$24 sps:$4 sm:$0xff]  }
  0x89   : > { %1038 = vmatpush1.bf16.msra.mxu0 %v10564_v17  ;;  %v10633_v17 = vld [vmem:[%s15348_s1 + $0x400] ss:$24 sps:$4 sm:$0xff]  }
  0x8a   : > { %1039 = vmatprep.subr.bf16.mxu0 %v10569_v18  ;;  %v10638_v18 = vld [vmem:[%s15348_s1 + $0x434] ss:$24 sps:$4 sm:$0xff]  }
  0x8d   : > { %1040 = vmatpush1.bf16.msra.mxu0 %v10567_v19  ;;  %v10636_v19 = vld [vmem:[%s15348_s1 + $0x430] ss:$24 sps:$4 sm:$0xff]  }
  0x8e   : > { %1127 = vmatprep.subr.bf16.mxu0 %v10572_v20  ;;  %v10641_v20 = vld [vmem:[%s15348_s1 + $0x464] ss:$24 sps:$4 sm:$0xff]  }
  0x90   : > { %1058 = vmatmul.mubr.bf16.vlgmr.msra.gmra.mrb[0].mxu0 %v12164_v0 }
  0x91   : > { %1128 = vmatpush1.bf16.msra.mxu0 %v10570_v21  ;;  %1067 = vmatprep.mubr.bf16.mxu0 %v11970_v2  ;;  %v10639_v21 = vld [vmem:[%s15348_s1 + $0x460] ss:$24 sps:$4 sm:$0xff]  }
  0x92   : > { %1129 = vmatprep.subr.bf16.mxu0 %v10575_v22  ;;  %v10644_v22 = vld [vmem:[%s15349_s2 + $0x904] ss:$24 sps:$4 sm:$0xff]  }
  0x95   : > { %1130 = vmatpush1.bf16.msra.mxu0 %v10573_v23  ;;  %v10642_v23 = vld [vmem:[%s15349_s2 + $0x900] ss:$24 sps:$4 sm:$0xff]  }
  0x96   : > { %1131 = vmatprep.subr.bf16.mxu0 %v10578_v24  ;;  %v10650_v24 = vld [vmem:[%s15349_s2 + $0x934] ss:$24 sps:$4 sm:$0xff]  }
  0x98   : > { %1068 = vmatmul.mubr.bf16.gmra.mrb[4].mxu0 %v12182_v11  ;;  %v10590_v11 = vld [vmem:[%s15348_s1 + $0x134] ss:$24 sps:$4 sm:$0xff]  }
  0x99   : > { %1132 = vmatpush1.bf16.msra.mxu0 %v10576_v25  ;;  %1159 = vmatprep.mubr.bf16.mxu0 %v11970_v2  ;;  %v10648_v25 = vld [vmem:[%s15349_s2 + $0x930] ss:$24 sps:$4 sm:$0xff]  }
  0x9a   : > { %1133 = vmatprep.subr.bf16.mxu0 %v10581_v26  ;;  %v10656_v26 = vld [vmem:[%s15349_s2 + $0x964] ss:$24 sps:$4 sm:$0xff]  }
  0x9d   : > { %1134 = vmatpush1.bf16.msra.mxu0 %v10579_v27  ;;  %v10654_v27 = vld [vmem:[%s15349_s2 + $0x960] ss:$24 sps:$4 sm:$0xff]  }
  0x9e   : > { %1135 = vmatprep.subr.bf16.mxu0 %v10584_v28  ;;  %v10662_v28 = vld [vmem:[%s15349_s2 + $0x994] ss:$24 sps:$4 sm:$0xff]  }
  0xa1   : > { %1136 = vmatpush1.bf16.msra.mxu0 %v10582_v29  ;;  %v10666_v29 = vld [vmem:[%s15349_s2 + $0x9c0] ss:$24 sps:$4 sm:$0xff]  }
  0xa2   : > { %1137 = vmatprep.subr.bf16.mxu0 %v10587_v30  ;;  %v10674_v30 = vld [vmem:[%s15349_s2 + $0x9f4] ss:$24 sps:$4 sm:$0xff]  }
  0xa5   : > { %1138 = vmatpush1.bf16.msra.mxu0 %v10585_v31 }
  0xa6   : > { %1139 = vmatprep.subr.bf16.mxu0 %v10590_v11 }
  0xa9   : > { %1140 = vmatpush1.bf16.msra.mxu0 %v10588_v32 }
  0xaa   : > { %1141 = vmatprep.subr.bf16.mxu0 %v10593_v33 }
  0xad   : > { %1142 = vmatpush1.bf16.msra.mxu0 %v10591_v34  ;;  %v10680_v34 = vld [vmem:[%s15349_s2 + $0xa24] ss:$24 sps:$4 sm:$0xff]  }
  0xae   : > { %1477 = vmatprep.subr.bf16.mxu0 %v10596_v35  ;;  %v10683_v35 = vld [vmem:[%s15349_s2 + $0xa34] ss:$24 sps:$4 sm:$0xff]  }
  0xaf   : > { %4229 = vmatprep.subr.bf16.mxu1 %v10683_v35  ;;  %v10719_v35 = vld [vmem:[%s15349_s2 + $0xb54] ss:$24 sps:$4 sm:$0xff]  }
  0xb0   : > { %1160 = vmatmul.mubr.bf16.vlgmr.msra.gmra.mrb[16].mxu0 %v12164_v0  ;;  %v10603_v0 = vld [vmem:[%s15348_s1 + $0x390] ss:$24 sps:$4 sm:$0xff]  }
  0xb1   : > { %1478 = vmatpush1.bf16.msra.mxu0 %v10594_v37  ;;  %1169 = vmatprep.mubr.bf16.mxu0 %v11970_v2  ;;  %v10678_v37 = vld [vmem:[%s15349_s2 + $0xa20] ss:$24 sps:$4 sm:$0xff]  }
  0xb2   : > { %1479 = vmatprep.subr.bf16.mxu0 %v10599_v38  ;;  %v10681_v38 = vld [vmem:[%s15349_s2 + $0xa30] ss:$24 sps:$4 sm:$0xff]  }
  0xb3   : > { %4230 = vmatpush1.bf16.msra.mxu1 %v10681_v38  ;;  %v10717_v38 = vld [vmem:[%s15349_s2 + $0xb50] ss:$24 sps:$4 sm:$0xff]  }
  0xb5   : > { %1480 = vmatpush1.bf16.msra.mxu0 %v10597_v39 }
  0xb6   : > { %1481 = vmatprep.subr.bf16.mxu0 %v10602_v40 }
  0xb8   : > { %1170 = vmatmul.mubr.bf16.gmra.mrb[20].mxu0 %v11944_v44 }
  0xb9   : > { %1482 = vmatpush1.bf16.msra.mxu0 %v10600_v41  ;;  %1509 = vmatprep.mubr.bf16.mxu0 %v11970_v2 }
  0xba   : > { %1483 = vmatprep.subr.bf16.mxu0 %v10605_v43 }
  0xbd   : > { %1484 = vmatpush1.bf16.msra.mxu0 %v10603_v0 }
  0xbe   : > { %1485 = vmatprep.subr.bf16.mxu0 %v10608_v46 }
  0xc1   : > { %1486 = vmatpush1.bf16.msra.mxu0 %v10606_v47  ;;  %v10686_v47 = vld [vmem:[%s15349_s2 + $0xa54] ss:$24 sps:$4 sm:$0xff]  }
  0xc2   : > { %1487 = vmatprep.subr.bf16.mxu0 %v10611_v48  ;;  %v10689_v48 = vld [vmem:[%s15349_s2 + $0xa64] ss:$24 sps:$4 sm:$0xff]  }
  0xc3   : > { %4231 = vmatprep.subr.bf16.mxu1 %v10689_v48  ;;  %v10731_v48 = vld [vmem:[%s15349_s2 + $0xbb4] ss:$24 sps:$4 sm:$0xff]  }
  0xc5   : > { %1488 = vmatpush1.bf16.msra.mxu0 %v10609_v52 }
  0xc6   : > { %1489 = vmatprep.subr.bf16.mxu0 %v10614_v53  ;;  %v10684_v53 = vld [vmem:[%s15349_s2 + $0xa50] ss:$24 sps:$4 sm:$0xff]  }
  0xc9   : > { %1490 = vmatpush1.bf16.msra.mxu0 %v10612_v57 }
  0xca   : > { %1491 = vmatprep.subr.bf16.mxu0 %v10617_v58  ;;  %v10687_v58 = vld [vmem:[%s15349_s2 + $0xa60] ss:$24 sps:$4 sm:$0xff]  }
  0xcb   : > { %4232 = vmatpush1.bf16.msra.mxu1 %v10687_v58 }
  0xcc   : > { %4233 = vmatprep.subr.bf16.mxu1 %v10695_v1 }
  0xcd   : > { %1492 = vmatpush1.bf16.msra.mxu0 %v10615_v61 }
  0xce   : > { %1579 = vmatprep.subr.bf16.mxu0 %v10620_v62 }
  0xcf   : > { %4234 = vmatpush1.bf16.msra.mxu1 %v10693_v5 }
  0xd0   : > { %1510 = vmatmul.mubr.bf16.vlgmr.msra.gmra.mrb[0].mxu0 %v12274_v45  ;;  %4235 = vmatprep.subr.bf16.mxu1 %v10701_v55 }
  0xd1   : > { %1580 = vmatpush1.bf16.msra.mxu0 %v10618_v3  ;;  %1519 = vmatprep.mubr.bf16.mxu0 %v11970_v2 }
  0xd2   : > { %1581 = vmatprep.subr.bf16.mxu0 %v10623_v4  ;;  %v10690_v4 = vld [vmem:[%s15349_s2 + $0xa80] ss:$24 sps:$4 sm:$0xff]  }
  0xd5   : > { %1582 = vmatpush1.bf16.msra.mxu0 %v10621_v7 }
  0xd6   : > { %1583 = vmatprep.subr.bf16.mxu0 %v10626_v8 }
  0xd8   : > { %1520 = vmatmul.mubr.bf16.gmra.mrb[4].mxu0 %v12264_v42 }
  0xd9   : > { %1584 = vmatpush1.bf16.msra.mxu0 %v10624_v10  ;;  %1611 = vmatprep.mubr.bf16.mxu0 %v11970_v2 }
  0xda   : > { %1585 = vmatprep.subr.bf16.mxu0 %v10629_v12 }
  0xdd   : > { %1586 = vmatpush1.bf16.msra.mxu0 %v10627_v13 }
  0xde   : > { %1587 = vmatprep.subr.bf16.mxu0 %v10632_v14 }
  0xe1   : > { %1588 = vmatpush1.bf16.msra.mxu0 %v10630_v15 }
  0xe2   : > { %1589 = vmatprep.subr.bf16.mxu0 %v10635_v16  ;;  %v10698_v16 = vld [vmem:[%s15349_s2 + $0xab4] ss:$24 sps:$4 sm:$0xff]  }
  0xe5   : > { %1590 = vmatpush1.bf16.msra.mxu0 %v10633_v17 }
  0xe6   : > { %1591 = vmatprep.subr.bf16.mxu0 %v10638_v18 }
  0xe9   : > { %1592 = vmatpush1.bf16.msra.mxu0 %v10636_v19  ;;  %v10696_v19 = vld [vmem:[%s15349_s2 + $0xab0] ss:$24 sps:$4 sm:$0xff]  }
  0xea   : > { %1593 = vmatprep.subr.bf16.mxu0 %v10641_v20 }
  0xed   : > { %1594 = vmatpush1.bf16.msra.mxu0 %v10639_v21  ;;  %v10699_v21 = vld [vmem:[%s15349_s2 + $0xac0] ss:$24 sps:$4 sm:$0xff]  }
  0xee   : > { %3959 = vmatprep.subr.bf16.mxu0 %v10644_v22  ;;  %4236 = vmatpush1.bf16.msra.mxu1 %v10699_v21 }
  0xf0   : > { %1612 = vmatmul.mubr.bf16.vlgmr.msra.gmra.mrb[16].mxu0 %v12274_v45  ;;  %v10660_v45 = vld [vmem:[%s15349_s2 + $0x990] ss:$24 sps:$4 sm:$0xff]  }
  0xf1   : > { %1621 = vmatprep.mubr.bf16.mxu0 %v11970_v2  ;;  %3960 = vmatpush1.bf16.msra.mxu0 %v10642_v23  ;;  %v10668_v2 = vld [vmem:[%s15349_s2 + $0x9c4] ss:$24 sps:$4 sm:$0xff]  }
  0xf2   : > { %3961 = vmatprep.subr.bf16.mxu0 %v10650_v24  ;;  %v10704_v24 = vld [vmem:[%s15349_s2 + $0xae4] ss:$24 sps:$4 sm:$0xff]  }
  0xf5   : > { %3962 = vmatpush1.bf16.msra.mxu0 %v10648_v25  ;;  %v10707_v25 = vld [vmem:[%s15349_s2 + $0xaf4] ss:$24 sps:$4 sm:$0xff]  }
  0xf6   : > { %3963 = vmatprep.subr.bf16.mxu0 %v10656_v26  ;;  %4237 = vmatprep.subr.bf16.mxu1 %v10707_v25  ;;  %v10782_v26 = vld [vmem:[%s15349_s2 + $0xd34] ss:$24 sps:$4 sm:$0xff]  }
  0xf8   : > { %1622 = vmatmul.mubr.bf16.gmra.mrb[20].mxu0 %v12264_v42  ;;  %v10672_v42 = vld [vmem:[%s15349_s2 + $0x9f0] ss:$24 sps:$4 sm:$0xff]  }
  0xf9   : > { %3964 = vmatpush1.bf16.msra.mxu0 %v10654_v27  ;;  %v10702_v27 = vld [vmem:[%s15349_s2 + $0xae0] ss:$24 sps:$4 sm:$0xff]  }
  0xfa   : > { %3965 = vmatprep.subr.bf16.mxu0 %v10662_v28  ;;  %v10705_v28 = vld [vmem:[%s15349_s2 + $0xaf0] ss:$24 sps:$4 sm:$0xff]  }
  0xfb   : > { %4238 = vmatpush1.bf16.msra.mxu1 %v10705_v28 }
  0xfd   : > { %3966 = vmatpush1.bf16.msra.mxu0 %v10660_v45 }
  0xfe   : > { %3967 = vmatprep.subr.bf16.mxu0 %v10668_v2 }
 0x101   : > { %3968 = vmatpush1.bf16.msra.mxu0 %v10666_v29 }
 0x102   : > { %3969 = vmatprep.subr.bf16.mxu0 %v10674_v30 }
 0x105   : > { %3970 = vmatpush1.bf16.msra.mxu0 %v10672_v42  ;;  %v10713_v42 = vld [vmem:[%s15349_s2 + $0xb24] ss:$24 sps:$4 sm:$0xff]  }
 0x106   : > { %3971 = vmatprep.subr.bf16.mxu0 %v10680_v34  ;;  %4239 = vmatprep.subr.bf16.mxu1 %v10713_v42  ;;  %v10716_v34 = vld [vmem:[%s15349_s2 + $0xb44] ss:$24 sps:$4 sm:$0xff]  }
 0x109   : > { %3972 = vmatpush1.bf16.msra.mxu0 %v10678_v37  ;;  %v10714_v37 = vld [vmem:[%s15349_s2 + $0xb40] ss:$24 sps:$4 sm:$0xff]  }
 0x10a   : > { %3973 = vmatprep.subr.bf16.mxu0 %v10686_v47  ;;  %v10728_v47 = vld [vmem:[%s15349_s2 + $0xba4] ss:$24 sps:$4 sm:$0xff]  }
 0x10d   : > { %3974 = vmatpush1.bf16.msra.mxu0 %v10684_v53  ;;  %v10732_v53 = vld [vmem:[%s15349_s2 + $0xbd0] ss:$24 sps:$4 sm:$0xff]  }
 0x10e   : > { %3975 = vmatprep.subr.bf16.mxu0 %v10692_v63 }
 0x111   : > { %3976 = vmatpush1.bf16.msra.mxu0 %v10690_v4 }
 0x112   : > { %3977 = vmatprep.subr.bf16.mxu0 %v10698_v16 }
 0x115   : > { %3978 = vmatpush1.bf16.msra.mxu0 %v10696_v19 }
 0x116   : > { %3979 = vmatprep.subr.bf16.mxu0 %v10704_v24 }
 0x119   : > { %3980 = vmatpush1.bf16.msra.mxu0 %v10702_v27 }
 0x11a   : > { %3981 = vmatprep.subr.bf16.mxu0 %v10710_v36 }
 0x11c   : > { %v1562_v31 = vpop.f32.mrb[0].mxu1 }
 0x11d   : > { %v1564_v11 = vpop.f32.mrb[1].mxu1 }
 0x11e   : > { %v1566_v32 = vpop.f32.mrb[2].mxu1 }
 0x11f   : > { %v1568_v33 = vpop.f32.mrb[3].mxu1 }
 0x123   : > { %v712_v39 = vpop.f32.mrb[8].mxu0 }
 0x124   : > { %v1572_v40 = vpop.f32.mrb[4].mxu1  ;;  %v10254_v41 = vadd.f32 %v1562_v31, %v712_v39  ;;  %v714_v43 = vpop.f32.mrb[9].mxu0 }
 0x125   : > { %v1574_v44 = vpop.f32.mrb[5].mxu1  ;;  %v10255_v0 = vadd.f32 %v1564_v11, %v714_v43  ;;  %v716_v46 = vpop.f32.mrb[10].mxu0  ;;  %v10708_v11 = vld [vmem:[%s15349_s2 + $0xb10] ss:$24 sps:$4 sm:$0xff]   ;;  %v10722_v43 = vld [vmem:[%s15349_s2 + $0xb74] ss:$24 sps:$4 sm:$0xff]  }
 0x126   : > { %v1576_v49 = vpop.f32.mrb[6].mxu1  ;;  %v1650_v50 = vmul.f32 0.01, %v10254_v41  ;;  %v10256_v51 = vadd.f32 %v1566_v32, %v716_v46  ;;  %v718_v52 = vpop.f32.mrb[11].mxu0  ;;  %v10711_v32 = vld [vmem:[%s15349_s2 + $0xb20] ss:$24 sps:$4 sm:$0xff]   ;;  %3982 = vmatpush1.bf16.msra.mxu0 %v10708_v11 }
 0x127   : > { %v1577_v54 = vpop.f32.mrb[7].mxu1  ;;  %v1651_v56 = vmul.f32 0.01, %v10255_v0  ;;  %v10257_v57 = vadd.f32 %v1568_v33, %v718_v52  ;;  %4240 = vmatpush1.bf16.msra.mxu1 %v10711_v32  ;;  %3983 = vmatprep.subr.bf16.mxu0 %v10716_v34  ;;  %v10725_v46 = vld [vmem:[%s15349_s2 + $0xb84] ss:$24 sps:$4 sm:$0xff]  }
 0x128   : > { %v1668_v59 = vmax.f32 %v10254_v41, %v1650_v50  ;;  %v1656_v60 = vmul.f32 0.01, %v10256_v51  ;;  %4241 = vmatprep.subr.bf16.mxu1 %v10719_v35  ;;  %v10720_v41 = vld [vmem:[%s15349_s2 + $0xb70] ss:$24 sps:$4 sm:$0xff]   ;;  %v10726_v49 = vld [vmem:[%s15349_s2 + $0xba0] ss:$24 sps:$4 sm:$0xff]  }
 0x129   : > { %v1669_v61 = vmax.f32 %v10255_v0, %v1651_v56  ;;  %v1657_v62 = vmul.f32 0.01, %v10257_v57  ;;  %v10723_v0 = vld [vmem:[%s15349_s2 + $0xb80] ss:$24 sps:$4 sm:$0xff]   ;;  %v10729_v50 = vld [vmem:[%s15349_s2 + $0xbb0] ss:$24 sps:$4 sm:$0xff]  }
 0x12a   : > { %v1674_v3 = vmax.f32 %v10256_v51, %v1656_v60  ;;  %3984 = vmatpush1.bf16.msra.mxu0 %v10714_v37  ;;  %v10734_v51 = vld [vmem:[%s15349_s2 + $0xbd4] ss:$24 sps:$4 sm:$0xff]   ;;  %v10737_v52 = vld [vmem:[%s15349_s2 + $0xbe4] ss:$24 sps:$4 sm:$0xff]   ;;  %v10735_v54 = vld [vmem:[%s15349_s2 + $0xbe0] ss:$24 sps:$4 sm:$0xff]  }
 0x12b   : > { %v10240_v6 = vpack.c.bf16 %v1669_v61, %v1668_v59  ;;  %v1675_v7 = vmax.f32 %v10257_v57, %v1657_v62  ;;  %v722_v8 = vpop.f32.mrb[12].mxu0  ;;  %4242 = vmatpush1.bf16.msra.mxu1 %v10717_v38  ;;  %3985 = vmatprep.subr.bf16.mxu0 %v10722_v43  ;;  %v10742_v56 = vld [vmem:[%s15349_s2 + $0xc04] ss:$24 sps:$4 sm:$0xff]   ;;  %v10745_v57 = vld [vmem:[%s15349_s2 + $0xc14] ss:$24 sps:$4 sm:$0xff]  }
 0x12c   : > { %v10258_v10 = vadd.f32 %v1572_v40, %v722_v8  ;;  %v724_v12 = vpop.f32.mrb[13].mxu0  ;;  %4243 = vmatprep.subr.bf16.mxu1 %v10725_v46 }
 0x12d   : > { %1745 = vst [vmem:[#allocation3 + $0x8] sm:$0xff] %v10240_v6  ;;  %v12663_v13 = vpack.c.bf16 %v1675_v7, %v1674_v3  ;;  %v10259_v14 = vadd.f32 %v1574_v44, %v724_v12  ;;  %v726_v15 = vpop.f32.mrb[14].mxu0 }
 0x12e   : > { %v1662_v17 = vmul.f32 0.01, %v10258_v10  ;;  %v727_v18 = vpop.f32.mrb[15].mxu0  ;;  %3986 = vmatpush1.bf16.msra.mxu0 %v10720_v41 }
 0x12f   : > { %1748 = vst [vmem:[#allocation3 + $0x20] sm:$0xff] %v12663_v13  ;;  %v1663_v20 = vmul.f32 0.01, %v10259_v14  ;;  %4244 = vmatpush1.bf16.msra.mxu1 %v10723_v0  ;;  %3987 = vmatprep.subr.bf16.mxu0 %v10728_v47 }
 0x130   : > { %v1680_v22 = vmax.f32 %v10258_v10, %v1662_v17  ;;  %4245 = vmatprep.subr.bf16.mxu1 %v10731_v48 }
 0x131   : > { %v1681_v23 = vmax.f32 %v10259_v14, %v1663_v20 }
 0x132   : > { %3988 = vmatpush1.bf16.msra.mxu0 %v10726_v49 }
 0x133   : > { %v10246_v45 = vpack.c.bf16 %v1681_v23, %v1680_v22  ;;  %4246 = vmatpush1.bf16.msra.mxu1 %v10729_v50  ;;  %3989 = vmatprep.subr.bf16.mxu0 %v10734_v51 }
 0x134   : > { %v1757_v2 = vld [vmem:[#allocation3 + $0x8] sm:$0x22]  ;;  %v1781_v29 = vld [vmem:[#allocation3 + $0x8] sm:$0x11]  ;;  %4247 = vmatprep.subr.bf16.mxu1 %v10737_v52 }
 0x135   : > { %v8767_v30 = vrot.slane %v1757_v2, 9  ;;  %1751 = vst [vmem:[#allocation3 + $0x38] sm:$0x11] %v10246_v45  ;;  %v6180_v61 = vld [vmem:[#allocation3 + $0x8] sm:$0xee] }
 0x136   : > { %v1788_v31 = vld [vmem:[#allocation3 + $0x20] sm:$0x88]  ;;  %3990 = vmatpush1.bf16.msra.mxu0 %v10732_v53  ;;  %v9939_v62 = vcombine.high %v6180_v61, %v12663_v13  ;;  %v9938_v1 = vcombine.low %v6180_v61, %v12663_v13 }
 0x137   : > { %v1782_v33 = vsel %vm12659_vm1, %v8767_v30, %v1781_v29  ;;  %v8770_v39 = vrot.slane %v1788_v31, 11  ;;  %4248 = vmatpush1.bf16.msra.mxu1 %v10735_v54  ;;  %4002 = vmatprep.subr.bf16.mxu0 %v10742_v56 }
 0x138   : > { %1783 = vst [vmem:[#allocation3 + $0x8] sm:$0x11] %v1782_v33  ;;  %4260 = vmatprep.subr.bf16.mxu1 %v10745_v57  ;;  %v6495_v4 = vrot.slane %v9939_v62, 1  ;;  %v6492_v5 = vrot.slane %v9938_v1, 1 }
 0x13c   : > { %v1810_v40 = vld [vmem:[#allocation3 + $0x38] sm:$0x11] }
 0x13d   : > { %v1811_v44 = vsel %vm12688_vm2, %v8770_v39, %v1810_v40 }
 0x13e   : > { %1812 = vst [vmem:[#allocation3 + $0x38] sm:$0x11] %v1811_v44 }
 0x13f   : > { %v12781_v34 = vld [vmem:[#allocation3 + $0x8] sm:$0xff] }
 0x140   : > { %v12785_v37 = vcombine.high %v12781_v34, %v12663_v13 }
 0x142   : > { %v2480_v43 = vshll.u32 %v12785_v37, 16  ;;  %v2478_v49 = vshrl.u32 %v12785_v37, 16 }
 0x144   : > { %v2482_v51 = vrot.slane %v2480_v43, 1 }
 0x145   : > { %v2111_v58 = vld [vmem:[#allocation3 + $0x38] sm:$0x11] }
 0x146   : > { %v9069_v59 = vcombine.high %v2111_v58, %v2111_v58  ;;  %v12768_v60 = vcombine.low %v2111_v58, %v2111_v58 }
 0x148   : > { %v6496_v63 = vrot.slane %v9069_v59, 1  ;;  %v6493_v3 = vrot.slane %v12768_v60, 1  ;;  %v2485_v46 = vshll.u32 %v9069_v59, 16 }
 0x14a   : > { %v12774_v6 = vsel %vm1231_vm13, %v6495_v4, %v6496_v63  ;;  %v12777_v7 = vsel %vm1231_vm13, %v6492_v5, %v6493_v3  ;;  %v2487_v52 = vrot.slane %v2485_v46, 1 }
 0x1a3   : > { %v1511_v8 = vpop.f32.mrb[0].mxu0 }
 0x1a4   : > { %v1648_v10 = vmul.f32 0.01, %v1511_v8  ;;  %v1513_v12 = vpop.f32.mrb[1].mxu0 }
 0x1a5   : > { %v1649_v14 = vmul.f32 0.01, %v1513_v12  ;;  %v1515_v15 = vpop.f32.mrb[2].mxu0 }
 0x1a6   : > { %v1666_v16 = vmax.f32 %v1511_v8, %v1648_v10  ;;  %v1654_v55 = vmul.f32 0.01, %v1515_v15  ;;  %v1517_v17 = vpop.f32.mrb[3].mxu0 }
 0x1a7   : > { %v1667_v18 = vmax.f32 %v1513_v12, %v1649_v14  ;;  %v1655_v19 = vmul.f32 0.01, %v1517_v17 }
 0x1a8   : > { %v1672_v20 = vmax.f32 %v1515_v15, %v1654_v55 }
 0x1a9   : > { %v10239_v21 = vpack.c.bf16 %v1667_v18, %v1666_v16  ;;  %v1673_v22 = vmax.f32 %v1517_v17, %v1655_v19 }
 0x1ab   : > { %1744 = vst [vmem:[#allocation3] sm:$0xff] %v10239_v21  ;;  %v10242_v23 = vpack.c.bf16 %v1673_v22, %v1672_v20  ;;  %v1521_v24 = vpop.f32.mrb[4].mxu0  ;;  %v10740_v21 = vld [vmem:[%s15349_s2 + $0xc00] ss:$24 sps:$4 sm:$0xff]   ;;  %v10743_v22 = vld [vmem:[%s15349_s2 + $0xc10] ss:$24 sps:$4 sm:$0xff]  }
 0x1ac   : > { %v1660_v25 = vmul.f32 0.01, %v1521_v24  ;;  %v1523_v27 = vpop.f32.mrb[5].mxu0 }
 0x1ad   : > { %1747 = vst [vmem:[#allocation3 + $0x18] sm:$0xff] %v10242_v23  ;;  %v1661_v28 = vmul.f32 0.01, %v1523_v27  ;;  %v1525_v45 = vpop.f32.mrb[6].mxu0 }
 0x1ae   : > { %v1678_v2 = vmax.f32 %v1521_v24, %v1660_v25  ;;  %v1526_v29 = vpop.f32.mrb[7].mxu0  ;;  %v10752_v45 = vld [vmem:[%s15349_s2 + $0xc44] ss:$24 sps:$4 sm:$0xff]  }
 0x1af   : > { %v1679_v30 = vmax.f32 %v1523_v27, %v1661_v28  ;;  %v10749_v28 = vld [vmem:[%s15349_s2 + $0xc34] ss:$24 sps:$4 sm:$0xff]  }
 0x1b1   : > { %v10245_v36 = vpack.c.bf16 %v1679_v30, %v1678_v2 }
 0x1b2   : > { %v1756_v42 = vld [vmem:[#allocation3] sm:$0x22]  ;;  %v1778_v11 = vld [vmem:[#allocation3] sm:$0x11] }
 0x1b3   : > { %v8766_v31 = vrot.slane %v1756_v42, 9  ;;  %1750 = vst [vmem:[#allocation3 + $0x30] sm:$0x11] %v10245_v36  ;;  %v6179_v40 = vld [vmem:[#allocation3] sm:$0xee]  ;;  %v2483_v42 = vor.u32 %v2482_v51, %v2478_v49 }
 0x1b4   : > { %v1787_v33 = vld [vmem:[#allocation3 + $0x18] sm:$0x88]  ;;  %v9937_v47 = vcombine.high %v6179_v40, %v10242_v23  ;;  %v9936_v61 = vcombine.low %v6179_v40, %v10242_v23 }
 0x1b5   : > { %v1779_v32 = vsel %vm12659_vm1, %v8766_v31, %v1778_v11  ;;  %v8769_v35 = vrot.slane %v1787_v33, 11  ;;  %v10750_v33 = vld [vmem:[%s15349_s2 + $0xc40] ss:$24 sps:$4 sm:$0xff]  }
 0x1b6   : > { %1780 = vst [vmem:[#allocation3] sm:$0x11] %v1779_v32  ;;  %v6489_v53 = vrot.slane %v9937_v47, 1  ;;  %v6486_v18 = vrot.slane %v9936_v61, 1  ;;  %v10747_v32 = vld [vmem:[%s15349_s2 + $0xc30] ss:$24 sps:$4 sm:$0xff]   ;;  %v12840_v47 = vsel %vm369_vm12, %v2483_v42, %v2487_v52 }
 0x1b7   : > { %v10753_v52 = vld [vmem:[%s15349_s2 + $0xc60] ss:$24 sps:$4 sm:$0xff]   ;;  %v10794_v42 = vld [vmem:[%s15349_s2 + $0xd94] ss:$24 sps:$4 sm:$0xff]  }
 0x1ba   : > { %v1807_v38 = vld [vmem:[#allocation3 + $0x30] sm:$0x11] }
 0x1bb   : > { %v1808_v39 = vsel %vm12688_vm2, %v8769_v35, %v1807_v38 }
 0x1bc   : > { %1809 = vst [vmem:[#allocation3 + $0x30] sm:$0x11] %v1808_v39 }
 0x1bd   : > { %v1816_v41 = vld [vmem:[#allocation3] sm:$0xff] }
 0x1be   : > { %v12790_v44 = vcombine.low %v1816_v41, %v10242_v23  ;;  %v12792_v0 = vcombine.high %v1816_v41, %v10242_v23  ;;  %v10755_v41 = vld [vmem:[%s15349_s2 + $0xc64] ss:$24 sps:$4 sm:$0xff]  }
 0x1c0   : > { %v2456_v48 = vshll.u32 %v12792_v0, 16  ;;  %v2444_v13 = vshll.u32 %v12790_v44, 16  ;;  %v2454_v50 = vshrl.u32 %v12792_v0, 16  ;;  %v2442_v58 = vshrl.u32 %v12790_v44, 16 }
 0x1c2   : > { %v2458_v57 = vrot.slane %v2456_v48, 1  ;;  %v2446_v3 = vrot.slane %v2444_v13, 1  ;;  %v10758_v48 = vld [vmem:[%s15349_s2 + $0xc74] ss:$24 sps:$4 sm:$0xff]  }
 0x1c3   : > { %v1613_v54 = vpop.f32.mrb[16].mxu0  ;;  %v2110_v56 = vld [vmem:[#allocation3 + $0x30] sm:$0x11] }
 0x1c4   : > { %v1652_v62 = vmul.f32 0.01, %v1613_v54  ;;  %v1615_v59 = vpop.f32.mrb[17].mxu0  ;;  %v9066_v63 = vcombine.low %v2110_v56, %v2110_v56  ;;  %v9067_v1 = vcombine.high %v2110_v56, %v2110_v56  ;;  %v2459_v17 = vor.u32 %v2458_v57, %v2454_v50  ;;  %v10761_v56 = vld [vmem:[%s15349_s2 + $0xc94] ss:$24 sps:$4 sm:$0xff]  }
 0x1c5   : > { %v1653_v4 = vmul.f32 0.01, %v1615_v59  ;;  %v1617_v5 = vpop.f32.mrb[18].mxu0  ;;  %v2447_v23 = vor.u32 %v2446_v3, %v2442_v58  ;;  %v10764_v57 = vld [vmem:[%s15349_s2 + $0xca4] ss:$24 sps:$4 sm:$0xff]  }
 0x1c6   : > { %v1670_v8 = vmax.f32 %v1613_v54, %v1652_v62  ;;  %v1658_v10 = vmul.f32 0.01, %v1617_v5  ;;  %v1619_v12 = vpop.f32.mrb[19].mxu0  ;;  %v2461_v14 = vshll.u32 %v9067_v1, 16  ;;  %v2449_v15 = vshll.u32 %v9066_v63, 16 }
 0x1c7   : > { %v1671_v16 = vmax.f32 %v1615_v59, %v1653_v4  ;;  %v1659_v55 = vmul.f32 0.01, %v1619_v12  ;;  %v6490_v2 = vrot.slane %v9067_v1, 1  ;;  %v6487_v29 = vrot.slane %v9066_v63, 1  ;;  %v10759_v59 = vld [vmem:[%s15349_s2 + $0xc90] ss:$24 sps:$4 sm:$0xff]  }
 0x1c8   : > { %v1676_v19 = vmax.f32 %v1617_v5, %v1658_v10  ;;  %v2463_v20 = vrot.slane %v2461_v14, 1  ;;  %v2451_v24 = vrot.slane %v2449_v15, 1  ;;  %v10762_v63 = vld [vmem:[%s15349_s2 + $0xca0] ss:$24 sps:$4 sm:$0xff]   ;;  %v10767_v3 = vld [vmem:[%s15349_s2 + $0xcc4] ss:$24 sps:$4 sm:$0xff]  }
 0x1c9   : > { %v10241_v25 = vpack.c.bf16 %v1671_v16, %v1670_v8  ;;  %v1677_v27 = vmax.f32 %v1619_v12, %v1659_v55  ;;  %v12828_v35 = vsel %vm1231_vm13, %v6489_v53, %v6490_v2  ;;  %v12831_v38 = vsel %vm1231_vm13, %v6486_v18, %v6487_v29  ;;  %v10756_v53 = vld [vmem:[%s15349_s2 + $0xc70] ss:$24 sps:$4 sm:$0xff]   ;;  %v10765_v5 = vld [vmem:[%s15349_s2 + $0xcc0] ss:$24 sps:$4 sm:$0xff]   ;;  %v10773_v12 = vld [vmem:[%s15349_s2 + $0xcf4] ss:$24 sps:$4 sm:$0xff]  }
 0x1ca   : > { %v12812_v30 = vsel %vm369_vm12, %v2459_v17, %v2463_v20  ;;  %v12815_v36 = vsel %vm369_vm12, %v2447_v23, %v2451_v24  ;;  %v10768_v8 = vld [vmem:[%s15349_s2 + $0xcd0] ss:$24 sps:$4 sm:$0xff]   ;;  %v10776_v14 = vld [vmem:[%s15349_s2 + $0xd04] ss:$24 sps:$4 sm:$0xff]   ;;  %v10774_v55 = vld [vmem:[%s15349_s2 + $0xd00] ss:$24 sps:$4 sm:$0xff]  }
 0x1cb   : > { %1746 = vst [vmem:[#allocation3 + $0x10] sm:$0xff] %v10241_v25  ;;  %v12817_v31 = vpack.c.bf16 %v1677_v27, %v1676_v19  ;;  %v1623_v11 = vpop.f32.mrb[20].mxu0  ;;  %3991 = vmatprep.mubr.bf16.mxu0 %v12812_v30  ;;  %4249 = vmatprep.mubr.bf16.mxu1 %v12812_v30  ;;  %v10771_v16 = vld [vmem:[%s15349_s2 + $0xcf0] ss:$24 sps:$4 sm:$0xff]   ;;  %v10779_v17 = vld [vmem:[%s15349_s2 + $0xd24] ss:$24 sps:$4 sm:$0xff]  }
 0x1cc   : > { %v1664_v39 = vmul.f32 0.01, %v1623_v11  ;;  %v1625_v40 = vpop.f32.mrb[21].mxu0  ;;  %3992 = vmatmul.mubr.bf16.vlgmr.msra.gmra.mrb[24].mxu0 %v12815_v36  ;;  %4250 = vmatmul.mubr.bf16.vlgmr.msra.gmra.mrb[8].mxu1 %v12815_v36  ;;  %v10777_v19 = vld [vmem:[%s15349_s2 + $0xd20] ss:$24 sps:$4 sm:$0xff]  }
 0x1cd   : > { %1749 = vst [vmem:[#allocation3 + $0x28] sm:$0xff] %v12817_v31  ;;  %v1665_v43 = vmul.f32 0.01, %v1625_v40  ;;  %4003 = vmatpush1.bf16.msra.mxu0 %v10740_v21  ;;  %4261 = vmatpush1.bf16.msra.mxu1 %v10743_v22  ;;  %v1627_v46 = vpop.f32.mrb[22].mxu0  ;;  %v10780_v20 = vld [vmem:[%s15349_s2 + $0xd30] ss:$24 sps:$4 sm:$0xff]  }
 0x1ce   : > { %v1682_v13 = vmax.f32 %v1623_v11, %v1664_v39  ;;  %4034 = vmatprep.mubr.bf16.mxu0 %v12840_v47  ;;  %4292 = vmatprep.mubr.bf16.mxu1 %v12840_v47  ;;  %v1628_v49 = vpop.f32.mrb[23].mxu0  ;;  %v10785_v21 = vld [vmem:[%s15349_s2 + $0xd54] ss:$24 sps:$4 sm:$0xff]   ;;  %v10788_v22 = vld [vmem:[%s15349_s2 + $0xd64] ss:$24 sps:$4 sm:$0xff]  }
 0x1cf   : > { %v1683_v50 = vmax.f32 %v1625_v40, %v1665_v43  ;;  %4004 = vmatprep.subr.bf16.mxu0 %v10749_v28  ;;  %4262 = vmatprep.subr.bf16.mxu1 %v10752_v45  ;;  %v10783_v45 = vld [vmem:[%s15349_s2 + $0xd50] ss:$24 sps:$4 sm:$0xff]   ;;  %v10786_v2 = vld [vmem:[%s15349_s2 + $0xd60] ss:$24 sps:$4 sm:$0xff]   ;;  %v10791_v29 = vld [vmem:[%s15349_s2 + $0xd84] ss:$24 sps:$4 sm:$0xff]  }
 0x1d0   : > { %v10789_v40 = vld [vmem:[%s15349_s2 + $0xd80] ss:$24 sps:$4 sm:$0xff]   ;;  %v10795_v49 = vld [vmem:[%s15349_s2 + $0xdb0] ss:$24 sps:$4 sm:$0xff]  }
 0x1d1   : > { %v10247_v51 = vpack.c.bf16 %v1683_v50, %v1682_v13  ;;  %4005 = vmatpush1.bf16.msra.mxu0 %v10747_v32  ;;  %4263 = vmatpush1.bf16.msra.mxu1 %v10750_v33  ;;  %v10800_v13 = vld [vmem:[%s15349_s2 + $0xdc4] ss:$24 sps:$4 sm:$0xff]   ;;  %v10798_v50 = vld [vmem:[%s15349_s2 + $0xdc0] ss:$24 sps:$4 sm:$0xff]  }
 0x1d2   : > { %v1758_v54 = vld [vmem:[#allocation3 + $0x10] sm:$0x22]  ;;  %4006 = vmatprep.subr.bf16.mxu0 %v10755_v41  ;;  %4264 = vmatprep.subr.bf16.mxu1 %v10758_v48  ;;  %v1784_v61 = vld [vmem:[#allocation3 + $0x10] sm:$0x11]  ;;  %v10792_v41 = vld [vmem:[%s15349_s2 + $0xd90] ss:$24 sps:$4 sm:$0xff]  }
 0x1d3   : > { %v8768_v58 = vrot.slane %v1758_v54, 9  ;;  %1752 = vst [vmem:[#allocation3 + $0x40] sm:$0x11] %v10247_v51  ;;  %v6181_v18 = vld [vmem:[#allocation3 + $0x10] sm:$0xee] }
 0x1d4   : > { %v1789_v1 = vld [vmem:[#allocation3 + $0x28] sm:$0x88]  ;;  %v9941_v24 = vcombine.high %v6181_v18, %v12817_v31  ;;  %v9940_v25 = vcombine.low %v6181_v18, %v12817_v31  ;;  %v10803_v51 = vld [vmem:[%s15349_s2 + $0xde4] ss:$24 sps:$4 sm:$0xff]   ;;  %v10804_v54 = vld [vmem:[%s15349_s2 + $0xdf0] ss:$24 sps:$4 sm:$0xff]  }
 0x1d5   : > { %v1785_v62 = vsel %vm12659_vm1, %v8768_v58, %v1784_v61  ;;  %4007 = vmatpush1.bf16.msra.mxu0 %v10753_v52  ;;  %4265 = vmatpush1.bf16.msra.mxu1 %v10756_v53  ;;  %v8771_v4 = vrot.slane %v1789_v1, 11  ;;  %v10797_v48 = vld [vmem:[%s15349_s2 + $0xdb4] ss:$24 sps:$4 sm:$0xff]   ;;  %v10801_v53 = vld [vmem:[%s15349_s2 + $0xde0] ss:$24 sps:$4 sm:$0xff]  }
 0x1d6   : > { %1786 = vst [vmem:[#allocation3 + $0x10] sm:$0x11] %v1785_v62  ;;  %4008 = vmatprep.subr.bf16.mxu0 %v10761_v56  ;;  %4266 = vmatprep.subr.bf16.mxu1 %v10764_v57  ;;  %v6501_v11 = vrot.slane %v9941_v24, 1  ;;  %v6498_v33 = vrot.slane %v9940_v25, 1  ;;  %v10806_v52 = vld [vmem:[%s15349_s2 + $0xdf4] ss:$24 sps:$4 sm:$0xff]  }
 0x1d7   : > { %v10809_v56 = vld [vmem:[%s15349_s2 + $0xe14] ss:$24 sps:$4 sm:$0xff]   ;;  %v10812_v57 = vld [vmem:[%s15349_s2 + $0xe24] ss:$24 sps:$4 sm:$0xff]   ;;  %v10807_v58 = vld [vmem:[%s15349_s2 + $0xe10] ss:$24 sps:$4 sm:$0xff]  }
 0x1d8   : > { %v10810_v61 = vld [vmem:[%s15349_s2 + $0xe20] ss:$24 sps:$4 sm:$0xff]   ;;  %v10815_v62 = vld [vmem:[%s15349_s2 + $0xe44] ss:$24 sps:$4 sm:$0xff]   ;;  %v10816_v1 = vld [vmem:[%s15349_s2 + $0xe50] ss:$24 sps:$4 sm:$0xff]  }
 0x1d9   : > { %4009 = vmatpush1.bf16.msra.mxu0 %v10759_v59  ;;  %4267 = vmatpush1.bf16.msra.mxu1 %v10762_v63  ;;  %v10818_v59 = vld [vmem:[%s15349_s2 + $0xe54] ss:$24 sps:$4 sm:$0xff]   ;;  %v10813_v63 = vld [vmem:[%s15349_s2 + $0xe40] ss:$24 sps:$4 sm:$0xff]   ;;  %v10836_v18 = vld [vmem:[%s15349_s2 + $0xee4] ss:$24 sps:$4 sm:$0xff]  }
 0x1da   : > { %v1813_v10 = vld [vmem:[#allocation3 + $0x40] sm:$0x11]  ;;  %4010 = vmatprep.subr.bf16.mxu0 %v10767_v3  ;;  %4268 = vmatprep.subr.bf16.mxu1 %v10770_v9  ;;  %v10824_v9 = vld [vmem:[%s15349_s2 + $0xe84] ss:$24 sps:$4 sm:$0xff]  }
 0x1db   : > { %v1814_v15 = vsel %vm12688_vm2, %v8771_v4, %v1813_v10  ;;  %v10821_v3 = vld [vmem:[%s15349_s2 + $0xe74] ss:$24 sps:$4 sm:$0xff]   ;;  %v10840_v25 = vld [vmem:[%s15349_s2 + $0xf04] ss:$24 sps:$4 sm:$0xff]  }
 0x1dc   : > { %1815 = vst [vmem:[#allocation3 + $0x40] sm:$0x11] %v1814_v15  ;;  %v11945_v10 = vld [vmem:[#allocation3 + $0x20] sm:$0xff] }
 0x1dd   : > { %4011 = vmatpush1.bf16.msra.mxu0 %v10765_v5  ;;  %4269 = vmatpush1.bf16.msra.mxu1 %v10768_v8  ;;  %v12997_v4 = vld [vmem:[#allocation3 + $0x10] sm:$0xff]  ;;  %v10819_v5 = vld [vmem:[%s15349_s2 + $0xe70] ss:$24 sps:$4 sm:$0xff]   ;;  %v10830_v15 = vld [vmem:[%s15349_s2 + $0xeb4] ss:$24 sps:$4 sm:$0xff]  }
 0x1de   : > { %4012 = vmatprep.subr.bf16.mxu0 %v10773_v12  ;;  %4270 = vmatprep.subr.bf16.mxu1 %v10776_v14  ;;  %v10822_v8 = vld [vmem:[%s15349_s2 + $0xe80] ss:$24 sps:$4 sm:$0xff]   ;;  %v13006_v12 = vcombine.low %v12781_v34, %v11945_v10  ;;  %v10827_v14 = vld [vmem:[%s15349_s2 + $0xea4] ss:$24 sps:$4 sm:$0xff]  }
 0x1df   : > { %v10825_v34 = vld [vmem:[%s15349_s2 + $0xea0] ss:$24 sps:$4 sm:$0xff]   ;;  %v10877_v10 = vld [vmem:[%s15349_s2 + $0x1024] ss:$24 sps:$4 sm:$0xff]  }
 0x1e1   : > { %4013 = vmatpush1.bf16.msra.mxu0 %v10771_v16  ;;  %4271 = vmatpush1.bf16.msra.mxu1 %v10774_v55  ;;  %v13016_v16 = vcombine.high %v12997_v4, %v12817_v31  ;;  %v10828_v55 = vld [vmem:[%s15349_s2 + $0xeb0] ss:$24 sps:$4 sm:$0xff]  }
 0x1e2   : > { %4014 = vmatprep.subr.bf16.mxu0 %v10779_v17  ;;  %4272 = vmatprep.subr.bf16.mxu1 %v10782_v26  ;;  %v2468_v17 = vshll.u32 %v13006_v12, 16  ;;  %v10833_v26 = vld [vmem:[%s15349_s2 + $0xed4] ss:$24 sps:$4 sm:$0xff]  }
 0x1e3   : > { %v2112_v23 = vld [vmem:[#allocation3 + $0x40] sm:$0x11] }
 0x1e4   : > { %v12913_v27 = vcombine.high %v2112_v23, %v2112_v23  ;;  %v12915_v28 = vcombine.low %v2112_v23, %v2112_v23  ;;  %v10834_v23 = vld [vmem:[%s15349_s2 + $0xee0] ss:$24 sps:$4 sm:$0xff]   ;;  %v2470_v24 = vrot.slane %v2468_v17, 1  ;;  %v10886_v17 = vld [vmem:[%s15349_s2 + $0x1064] ss:$24 sps:$4 sm:$0xff]  }
 0x1e5   : > { %4015 = vmatpush1.bf16.msra.mxu0 %v10777_v19  ;;  %4273 = vmatpush1.bf16.msra.mxu1 %v10780_v20  ;;  %v2504_v19 = vshll.u32 %v13016_v16, 16  ;;  %v2473_v20 = vshll.u32 %v12768_v60, 16  ;;  %v10843_v60 = vld [vmem:[%s15349_s2 + $0xf14] ss:$24 sps:$4 sm:$0xff]  }
 0x1e6   : > { %4016 = vmatprep.subr.bf16.mxu0 %v10785_v21  ;;  %4274 = vmatprep.subr.bf16.mxu1 %v10788_v22  ;;  %v6502_v32 = vrot.slane %v12913_v27, 1  ;;  %v6499_v39 = vrot.slane %v12915_v28, 1  ;;  %v2509_v21 = vshll.u32 %v12913_v27, 16  ;;  %v10831_v22 = vld [vmem:[%s15349_s2 + $0xed0] ss:$24 sps:$4 sm:$0xff]  }
 0x1e7   : > { %v2506_v27 = vrot.slane %v2504_v19, 1  ;;  %v10889_v19 = vld [vmem:[%s15349_s2 + $0x1084] ss:$24 sps:$4 sm:$0xff]  }
 0x1e8   : > { %v12938_v43 = vsel %vm1231_vm13, %v6501_v11, %v6502_v32  ;;  %v12941_v46 = vsel %vm1231_vm13, %v6498_v33, %v6499_v39  ;;  %v10838_v32 = vld [vmem:[%s15349_s2 + $0xf00] ss:$24 sps:$4 sm:$0xff]   ;;  %v10841_v33 = vld [vmem:[%s15349_s2 + $0xf10] ss:$24 sps:$4 sm:$0xff]  }
 0x1e9   : > { %4017 = vmatpush1.bf16.msra.mxu0 %v10783_v45  ;;  %4275 = vmatpush1.bf16.msra.mxu1 %v10786_v2  ;;  %v2466_v45 = vshrl.u32 %v13006_v12, 16  ;;  %v2475_v2 = vrot.slane %v2473_v20, 1  ;;  %v10892_v20 = vld [vmem:[%s15349_s2 + $0x1094] ss:$24 sps:$4 sm:$0xff]  }
 0x1ea   : > { %4018 = vmatprep.subr.bf16.mxu0 %v10791_v29  ;;  %4276 = vmatprep.subr.bf16.mxu1 %v10794_v42  ;;  %v2502_v29 = vshrl.u32 %v13016_v16, 16  ;;  %v2511_v42 = vrot.slane %v2509_v21, 1  ;;  %v10887_v21 = vld [vmem:[%s15349_s2 + $0x1080] ss:$24 sps:$4 sm:$0xff]  }
 0x1eb   : > { %v2471_v11 = vor.u32 %v2470_v24, %v2466_v45  ;;  %v10898_v24 = vld [vmem:[%s15349_s2 + $0x10c4] ss:$24 sps:$4 sm:$0xff]   ;;  %v10904_v45 = vld [vmem:[%s15349_s2 + $0x10f4] ss:$24 sps:$4 sm:$0xff]  }
 0x1ec   : > { %v2507_v39 = vor.u32 %v2506_v27, %v2502_v29  ;;  %v10901_v27 = vld [vmem:[%s15349_s2 + $0x10e4] ss:$24 sps:$4 sm:$0xff]   ;;  %v10902_v29 = vld [vmem:[%s15349_s2 + $0x10f0] ss:$24 sps:$4 sm:$0xff]  }
 0x1ed   : > { %4019 = vmatpush1.bf16.msra.mxu0 %v10789_v40  ;;  %4277 = vmatpush1.bf16.msra.mxu1 %v10792_v41  ;;  %v13055_v40 = vsel %vm369_vm12, %v2471_v11, %v2475_v2  ;;  %v10847_v41 = vld [vmem:[%s15349_s2 + $0xf34] ss:$24 sps:$4 sm:$0xff]   ;;  %v10899_v2 = vld [vmem:[%s15349_s2 + $0x10e0] ss:$24 sps:$4 sm:$0xff]   ;;  %v10910_v11 = vld [vmem:[%s15349_s2 + $0x1124] ss:$24 sps:$4 sm:$0xff]  }
 0x1ee   : > { %4020 = vmatprep.subr.bf16.mxu0 %v10797_v48  ;;  %4278 = vmatprep.subr.bf16.mxu1 %v10800_v13  ;;  %v10850_v48 = vld [vmem:[%s15349_s2 + $0xf44] ss:$24 sps:$4 sm:$0xff]   ;;  %v13066_v13 = vsel %vm369_vm12, %v2507_v39, %v2511_v42  ;;  %v10907_v42 = vld [vmem:[%s15349_s2 + $0x1114] ss:$24 sps:$4 sm:$0xff]  }
 0x1ef   : > { %v10913_v39 = vld [vmem:[%s15349_s2 + $0x1144] ss:$24 sps:$4 sm:$0xff]  }
 0x1f1   : > { %4021 = vmatpush1.bf16.msra.mxu0 %v10795_v49  ;;  %4279 = vmatpush1.bf16.msra.mxu1 %v10798_v50  ;;  %v10845_v49 = vld [vmem:[%s15349_s2 + $0xf30] ss:$24 sps:$4 sm:$0xff]   ;;  %v10848_v50 = vld [vmem:[%s15349_s2 + $0xf40] ss:$24 sps:$4 sm:$0xff]  }
 0x1f2   : > { %4022 = vmatprep.subr.bf16.mxu0 %v10803_v51  ;;  %4280 = vmatprep.subr.bf16.mxu1 %v10806_v52  ;;  %v10853_v51 = vld [vmem:[%s15349_s2 + $0xf64] ss:$24 sps:$4 sm:$0xff]   ;;  %v10856_v52 = vld [vmem:[%s15349_s2 + $0xf74] ss:$24 sps:$4 sm:$0xff]  }
 0x1f5   : > { %4023 = vmatpush1.bf16.msra.mxu0 %v10801_v53  ;;  %4281 = vmatpush1.bf16.msra.mxu1 %v10804_v54  ;;  %v10851_v53 = vld [vmem:[%s15349_s2 + $0xf60] ss:$24 sps:$4 sm:$0xff]   ;;  %v10854_v54 = vld [vmem:[%s15349_s2 + $0xf70] ss:$24 sps:$4 sm:$0xff]  }
 0x1f6   : > { %4024 = vmatprep.subr.bf16.mxu0 %v10809_v56  ;;  %4282 = vmatprep.subr.bf16.mxu1 %v10812_v57  ;;  %v10859_v56 = vld [vmem:[%s15349_s2 + $0xf94] ss:$24 sps:$4 sm:$0xff]   ;;  %v10862_v57 = vld [vmem:[%s15349_s2 + $0xfa4] ss:$24 sps:$4 sm:$0xff]  }
 0x1f9   : > { %4025 = vmatpush1.bf16.msra.mxu0 %v10807_v58  ;;  %4283 = vmatpush1.bf16.msra.mxu1 %v10810_v61  ;;  %v10857_v58 = vld [vmem:[%s15349_s2 + $0xf90] ss:$24 sps:$4 sm:$0xff]   ;;  %v10860_v61 = vld [vmem:[%s15349_s2 + $0xfa0] ss:$24 sps:$4 sm:$0xff]  }
 0x1fa   : > { %4026 = vmatprep.subr.bf16.mxu0 %v10815_v62  ;;  %4284 = vmatprep.subr.bf16.mxu1 %v10818_v59  ;;  %v10865_v62 = vld [vmem:[%s15349_s2 + $0xfc4] ss:$24 sps:$4 sm:$0xff]   ;;  %v10868_v59 = vld [vmem:[%s15349_s2 + $0xfd4] ss:$24 sps:$4 sm:$0xff]  }
 0x1fd   : > { %4027 = vmatpush1.bf16.msra.mxu0 %v10813_v63  ;;  %4285 = vmatpush1.bf16.msra.mxu1 %v10816_v1  ;;  %v10863_v63 = vld [vmem:[%s15349_s2 + $0xfc0] ss:$24 sps:$4 sm:$0xff]   ;;  %v10866_v1 = vld [vmem:[%s15349_s2 + $0xfd0] ss:$24 sps:$4 sm:$0xff]  }
 0x1fe   : > { %4028 = vmatprep.subr.bf16.mxu0 %v10821_v3  ;;  %4286 = vmatprep.subr.bf16.mxu1 %v10824_v9  ;;  %v10871_v3 = vld [vmem:[%s15349_s2 + $0xff4] ss:$24 sps:$4 sm:$0xff]   ;;  %v10874_v9 = vld [vmem:[%s15349_s2 + $0x1004] ss:$24 sps:$4 sm:$0xff]  }
 0x201   : > { %4029 = vmatpush1.bf16.msra.mxu0 %v10819_v5  ;;  %4287 = vmatpush1.bf16.msra.mxu1 %v10822_v8  ;;  %v10869_v5 = vld [vmem:[%s15349_s2 + $0xff0] ss:$24 sps:$4 sm:$0xff]   ;;  %v10872_v8 = vld [vmem:[%s15349_s2 + $0x1000] ss:$24 sps:$4 sm:$0xff]  }
 0x202   : > { %4030 = vmatprep.subr.bf16.mxu0 %v10827_v14  ;;  %4288 = vmatprep.subr.bf16.mxu1 %v10830_v15  ;;  %v10880_v14 = vld [vmem:[%s15349_s2 + $0x1034] ss:$24 sps:$4 sm:$0xff]   ;;  %v10875_v15 = vld [vmem:[%s15349_s2 + $0x1020] ss:$24 sps:$4 sm:$0xff]  }
 0x205   : > { %4031 = vmatpush1.bf16.msra.mxu0 %v10825_v34  ;;  %4289 = vmatpush1.bf16.msra.mxu1 %v10828_v55  ;;  %v10878_v34 = vld [vmem:[%s15349_s2 + $0x1030] ss:$24 sps:$4 sm:$0xff]   ;;  %v10883_v55 = vld [vmem:[%s15349_s2 + $0x1054] ss:$24 sps:$4 sm:$0xff]  }
 0x206   : > { %4032 = vmatprep.subr.bf16.mxu0 %v10833_v26  ;;  %4290 = vmatprep.subr.bf16.mxu1 %v10836_v18  ;;  %v10881_v26 = vld [vmem:[%s15349_s2 + $0x1050] ss:$24 sps:$4 sm:$0xff]   ;;  %v10884_v18 = vld [vmem:[%s15349_s2 + $0x1060] ss:$24 sps:$4 sm:$0xff]  }
 0x209   : > { %4033 = vmatpush1.bf16.msra.mxu0 %v10831_v22  ;;  %4291 = vmatpush1.bf16.msra.mxu1 %v10834_v23  ;;  %v10890_v22 = vld [vmem:[%s15349_s2 + $0x1090] ss:$24 sps:$4 sm:$0xff]   ;;  %v10895_v23 = vld [vmem:[%s15349_s2 + $0x10b4] ss:$24 sps:$4 sm:$0xff]  }
 0x20a   : > { %4045 = vmatprep.subr.bf16.mxu0 %v10840_v25  ;;  %4303 = vmatprep.subr.bf16.mxu1 %v10843_v60  ;;  %v10893_v25 = vld [vmem:[%s15349_s2 + $0x10b0] ss:$24 sps:$4 sm:$0xff]   ;;  %v10896_v60 = vld [vmem:[%s15349_s2 + $0x10c0] ss:$24 sps:$4 sm:$0xff]  }
 0x20c   : > { %4035 = vmatmul.mubr.bf16.vlgmr.msra.gmra.mrb[24].mxu0 %v13055_v40  ;;  %4293 = vmatmul.mubr.bf16.vlgmr.msra.gmra.mrb[8].mxu1 %v13055_v40 }
 0x20d   : > { %4046 = vmatpush1.bf16.msra.mxu0 %v10838_v32  ;;  %4077 = vmatprep.mubr.bf16.mxu0 %v13066_v13  ;;  %v10905_v32 = vld [vmem:[%s15349_s2 + $0x1110] ss:$24 sps:$4 sm:$0xff]  }
 0x20e   : > { %4304 = vmatpush1.bf16.msra.mxu1 %v10841_v33  ;;  %4335 = vmatprep.mubr.bf16.mxu1 %v13066_v13  ;;  %v10908_v33 = vld [vmem:[%s15349_s2 + $0x1120] ss:$24 sps:$4 sm:$0xff]  }
 0x20f   : > { %4047 = vmatprep.subr.bf16.mxu0 %v10847_v41  ;;  %4305 = vmatprep.subr.bf16.mxu1 %v10850_v48  ;;  %v10916_v41 = vld [vmem:[%s15349_s2 + $0x1154] ss:$24 sps:$4 sm:$0xff]   ;;  %v10911_v48 = vld [vmem:[%s15349_s2 + $0x1140] ss:$24 sps:$4 sm:$0xff]  }
 0x211   : > { %4048 = vmatpush1.bf16.msra.mxu0 %v10845_v49  ;;  %v10914_v49 = vld [vmem:[%s15349_s2 + $0x1150] ss:$24 sps:$4 sm:$0xff]  }
 0x212   : > { %4306 = vmatpush1.bf16.msra.mxu1 %v10848_v50  ;;  %4049 = vmatprep.subr.bf16.mxu0 %v10853_v51  ;;  %v10919_v50 = vld [vmem:[%s15349_s2 + $0x1174] ss:$24 sps:$4 sm:$0xff]   ;;  %v10922_v51 = vld [vmem:[%s15349_s2 + $0x1184] ss:$24 sps:$4 sm:$0xff]  }
 0x213   : > { %4307 = vmatprep.subr.bf16.mxu1 %v10856_v52  ;;  %v10917_v52 = vld [vmem:[%s15349_s2 + $0x1170] ss:$24 sps:$4 sm:$0xff]  }
 0x215   : > { %4050 = vmatpush1.bf16.msra.mxu0 %v10851_v53  ;;  %v13219_v53 = vcombine.low %v12997_v4, %v12817_v31  ;;  %v10923_v31 = vld [vmem:[%s15349_s2 + $0x11a0] ss:$24 sps:$4 sm:$0xff]  }
 0x216   : > { %4308 = vmatpush1.bf16.msra.mxu1 %v10854_v54  ;;  %4051 = vmatprep.subr.bf16.mxu0 %v10859_v56  ;;  %v10920_v54 = vld [vmem:[%s15349_s2 + $0x1180] ss:$24 sps:$4 sm:$0xff]   ;;  %v10925_v56 = vld [vmem:[%s15349_s2 + $0x11a4] ss:$24 sps:$4 sm:$0xff]  }
 0x217   : > { %4309 = vmatprep.subr.bf16.mxu1 %v10862_v57  ;;  %v10928_v57 = vld [vmem:[%s15349_s2 + $0x11b4] ss:$24 sps:$4 sm:$0xff]   ;;  %v2492_v4 = vshll.u32 %v13219_v53, 16 }
 0x219   : > { %4052 = vmatpush1.bf16.msra.mxu0 %v10857_v58  ;;  %v10926_v58 = vld [vmem:[%s15349_s2 + $0x11b0] ss:$24 sps:$4 sm:$0xff]  }
 0x21a   : > { %4310 = vmatpush1.bf16.msra.mxu1 %v10860_v61  ;;  %4053 = vmatprep.subr.bf16.mxu0 %v10865_v62  ;;  %v10931_v61 = vld [vmem:[%s15349_s2 + $0x11d4] ss:$24 sps:$4 sm:$0xff]   ;;  %v10934_v62 = vld [vmem:[%s15349_s2 + $0x11e4] ss:$24 sps:$4 sm:$0xff]  }
 0x21b   : > { %4311 = vmatprep.subr.bf16.mxu1 %v10868_v59  ;;  %v2497_v59 = vshll.u32 %v12915_v28, 16 }
 0x21d   : > { %4054 = vmatpush1.bf16.msra.mxu0 %v10863_v63  ;;  %v10929_v63 = vld [vmem:[%s15349_s2 + $0x11d0] ss:$24 sps:$4 sm:$0xff]   ;;  %v2499_v28 = vrot.slane %v2497_v59, 1  ;;  %v10998_v59 = vld [vmem:[%s15349_s2 + $0xaec] ss:$24 sps:$4 sm:$0xff]  }
 0x21e   : > { %4312 = vmatpush1.bf16.msra.mxu1 %v10866_v1  ;;  %4055 = vmatprep.subr.bf16.mxu0 %v10871_v3  ;;  %v2494_v1 = vrot.slane %v2492_v4, 1  ;;  %v10932_v3 = vld [vmem:[%s15349_s2 + $0x11e0] ss:$24 sps:$4 sm:$0xff]   ;;  %v10992_v4 = vld [vmem:[%s15349_s2 + $0xabc] ss:$24 sps:$4 sm:$0xff]  }
 0x21f   : > { %4313 = vmatprep.subr.bf16.mxu1 %v10874_v9  ;;  %v10938_v9 = vld [vmem:[%s15349_s2 + $0x90c] ss:$24 sps:$4 sm:$0xff]  }
 0x221   : > { %4056 = vmatpush1.bf16.msra.mxu0 %v10869_v5  ;;  %v2490_v5 = vshrl.u32 %v13219_v53, 16 }
 0x222   : > { %4314 = vmatpush1.bf16.msra.mxu1 %v10872_v8  ;;  %4057 = vmatprep.subr.bf16.mxu0 %v10877_v10  ;;  %v10941_v8 = vld [vmem:[%s15349_s2 + $0x4] ss:$24 sps:$4 sm:$0xff]  }
 0x223   : > { %4315 = vmatprep.subr.bf16.mxu1 %v10880_v14  ;;  %v2495_v10 = vor.u32 %v2494_v1, %v2490_v5  ;;  %v10936_v14 = vld [vmem:[%s15349_s2 + $0x908] ss:$24 sps:$4 sm:$0xff]   ;;  %v11007_v5 = vld [vmem:[%s15349_s2 + $0x214] ss:$24 sps:$4 sm:$0xff]  }
 0x224   : > { %v10996_v1 = vld [vmem:[%s15349_s2 + $0xae8] ss:$24 sps:$4 sm:$0xff]  }
 0x225   : > { %4058 = vmatpush1.bf16.msra.mxu0 %v10875_v15  ;;  %v10939_v15 = vld [vmem:[%s15349_s2] ss:$24 sps:$4 sm:$0xff]  }
 0x226   : > { %4316 = vmatpush1.bf16.msra.mxu1 %v10878_v34  ;;  %4059 = vmatprep.subr.bf16.mxu0 %v10883_v55  ;;  %v13264_v34 = vsel %vm369_vm12, %v2495_v10, %v2499_v28  ;;  %v10944_v55 = vld [vmem:[%s15349_s2 + $0x93c] ss:$24 sps:$4 sm:$0xff]   ;;  %v11002_v28 = vld [vmem:[%s15349_s2 + $0xb18] ss:$24 sps:$4 sm:$0xff]   ;;  %v11010_v10 = vld [vmem:[%s15349_s2 + $0xb4c] ss:$24 sps:$4 sm:$0xff]  }
 0x227   : > { %4317 = vmatprep.subr.bf16.mxu1 %v10886_v17  ;;  %v10947_v17 = vld [vmem:[%s15349_s2 + $0x34] ss:$24 sps:$4 sm:$0xff]  }
 0x229   : > { %4060 = vmatpush1.bf16.msra.mxu0 %v10881_v26  ;;  %v10942_v26 = vld [vmem:[%s15349_s2 + $0x938] ss:$24 sps:$4 sm:$0xff]  }
 0x22a   : > { %4318 = vmatpush1.bf16.msra.mxu1 %v10884_v18  ;;  %4061 = vmatprep.subr.bf16.mxu0 %v10889_v19  ;;  %v10945_v18 = vld [vmem:[%s15349_s2 + $0x30] ss:$24 sps:$4 sm:$0xff]   ;;  %v10950_v19 = vld [vmem:[%s15349_s2 + $0x96c] ss:$24 sps:$4 sm:$0xff]  }
 0x22b   : > { %4319 = vmatprep.subr.bf16.mxu1 %v10892_v20  ;;  %v10953_v20 = vld [vmem:[%s15349_s2 + $0x64] ss:$24 sps:$4 sm:$0xff]  }
 0x22d   : > { %4062 = vmatpush1.bf16.msra.mxu0 %v10887_v21  ;;  %v10951_v21 = vld [vmem:[%s15349_s2 + $0x60] ss:$24 sps:$4 sm:$0xff]  }
 0x22e   : > { %4320 = vmatpush1.bf16.msra.mxu1 %v10890_v22  ;;  %4063 = vmatprep.subr.bf16.mxu0 %v10895_v23  ;;  %v10956_v22 = vld [vmem:[%s15349_s2 + $0x99c] ss:$24 sps:$4 sm:$0xff]  }
 0x22f   : > { %4321 = vmatprep.subr.bf16.mxu1 %v10898_v24  ;;  %v10959_v23 = vld [vmem:[%s15349_s2 + $0x94] ss:$24 sps:$4 sm:$0xff]   ;;  %v10954_v24 = vld [vmem:[%s15349_s2 + $0x998] ss:$24 sps:$4 sm:$0xff]  }
 0x231   : > { %4064 = vmatpush1.bf16.msra.mxu0 %v10893_v25  ;;  %v10957_v25 = vld [vmem:[%s15349_s2 + $0x90] ss:$24 sps:$4 sm:$0xff]  }
 0x232   : > { %4322 = vmatpush1.bf16.msra.mxu1 %v10896_v60  ;;  %4065 = vmatprep.subr.bf16.mxu0 %v10901_v27  ;;  %v10962_v60 = vld [vmem:[%s15349_s2 + $0x9cc] ss:$24 sps:$4 sm:$0xff]  }
 0x233   : > { %4323 = vmatprep.subr.bf16.mxu1 %v10904_v45  ;;  %v10965_v27 = vld [vmem:[%s15349_s2 + $0xc4] ss:$24 sps:$4 sm:$0xff]   ;;  %v10960_v45 = vld [vmem:[%s15349_s2 + $0x9c8] ss:$24 sps:$4 sm:$0xff]  }
 0x235   : > { %4066 = vmatpush1.bf16.msra.mxu0 %v10899_v2  ;;  %v10963_v2 = vld [vmem:[%s15349_s2 + $0xc0] ss:$24 sps:$4 sm:$0xff]  }
 0x236   : > { %4324 = vmatpush1.bf16.msra.mxu1 %v10902_v29  ;;  %4067 = vmatprep.subr.bf16.mxu0 %v10907_v42  ;;  %v10968_v29 = vld [vmem:[%s15349_s2 + $0x9fc] ss:$24 sps:$4 sm:$0xff]  }
 0x237   : > { %4325 = vmatprep.subr.bf16.mxu1 %v10910_v11  ;;  %v10971_v42 = vld [vmem:[%s15349_s2 + $0xf4] ss:$24 sps:$4 sm:$0xff]   ;;  %v10966_v11 = vld [vmem:[%s15349_s2 + $0x9f8] ss:$24 sps:$4 sm:$0xff]  }
 0x239   : > { %4068 = vmatpush1.bf16.msra.mxu0 %v10905_v32  ;;  %v10969_v32 = vld [vmem:[%s15349_s2 + $0xf0] ss:$24 sps:$4 sm:$0xff]  }
 0x23a   : > { %4326 = vmatpush1.bf16.msra.mxu1 %v10908_v33  ;;  %4069 = vmatprep.subr.bf16.mxu0 %v10913_v39  ;;  %v10974_v33 = vld [vmem:[%s15349_s2 + $0xa2c] ss:$24 sps:$4 sm:$0xff]  }
 0x23b   : > { %4327 = vmatprep.subr.bf16.mxu1 %v10916_v41  ;;  %v10977_v39 = vld [vmem:[%s15349_s2 + $0x124] ss:$24 sps:$4 sm:$0xff]   ;;  %v10972_v41 = vld [vmem:[%s15349_s2 + $0xa28] ss:$24 sps:$4 sm:$0xff]  }
 0x23d   : > { %4070 = vmatpush1.bf16.msra.mxu0 %v10911_v48  ;;  %v10975_v48 = vld [vmem:[%s15349_s2 + $0x120] ss:$24 sps:$4 sm:$0xff]  }
 0x23e   : > { %4328 = vmatpush1.bf16.msra.mxu1 %v10914_v49  ;;  %4071 = vmatprep.subr.bf16.mxu0 %v10919_v50  ;;  %v10980_v49 = vld [vmem:[%s15349_s2 + $0xa5c] ss:$24 sps:$4 sm:$0xff]  }
 0x23f   : > { %4329 = vmatprep.subr.bf16.mxu1 %v10922_v51  ;;  %v10983_v50 = vld [vmem:[%s15349_s2 + $0x154] ss:$24 sps:$4 sm:$0xff]   ;;  %v10978_v51 = vld [vmem:[%s15349_s2 + $0xa58] ss:$24 sps:$4 sm:$0xff]  }
 0x241   : > { %4072 = vmatpush1.bf16.msra.mxu0 %v10917_v52  ;;  %v10981_v52 = vld [vmem:[%s15349_s2 + $0x150] ss:$24 sps:$4 sm:$0xff]  }
 0x242   : > { %4330 = vmatpush1.bf16.msra.mxu1 %v10920_v54  ;;  %4073 = vmatprep.subr.bf16.mxu0 %v10925_v56  ;;  %v10986_v54 = vld [vmem:[%s15349_s2 + $0xa8c] ss:$24 sps:$4 sm:$0xff]  }
 0x243   : > { %4331 = vmatprep.subr.bf16.mxu1 %v10928_v57  ;;  %v10989_v56 = vld [vmem:[%s15349_s2 + $0x184] ss:$24 sps:$4 sm:$0xff]   ;;  %v10984_v57 = vld [vmem:[%s15349_s2 + $0xa88] ss:$24 sps:$4 sm:$0xff]  }
 0x245   : > { %4074 = vmatpush1.bf16.msra.mxu0 %v10923_v31  ;;  %v10987_v31 = vld [vmem:[%s15349_s2 + $0x180] ss:$24 sps:$4 sm:$0xff]  }
 0x246   : > { %4332 = vmatpush1.bf16.msra.mxu1 %v10926_v58  ;;  %4075 = vmatprep.subr.bf16.mxu0 %v10931_v61  ;;  %v10995_v58 = vld [vmem:[%s15349_s2 + $0x1b4] ss:$24 sps:$4 sm:$0xff]   ;;  %v10990_v61 = vld [vmem:[%s15349_s2 + $0xab8] ss:$24 sps:$4 sm:$0xff]  }
 0x247   : > { %4333 = vmatprep.subr.bf16.mxu1 %v10934_v62  ;;  %v10993_v62 = vld [vmem:[%s15349_s2 + $0x1b0] ss:$24 sps:$4 sm:$0xff]  }
 0x249   : > { %4076 = vmatpush1.bf16.msra.mxu0 %v10929_v63  ;;  %v11001_v63 = vld [vmem:[%s15349_s2 + $0x1e4] ss:$24 sps:$4 sm:$0xff]  }
 0x24a   : > { %4334 = vmatpush1.bf16.msra.mxu1 %v10932_v3  ;;  %4088 = vmatprep.subr.bf16.mxu0 %v10938_v9  ;;  %v10999_v3 = vld [vmem:[%s15349_s2 + $0x1e0] ss:$24 sps:$4 sm:$0xff]   ;;  %v11004_v9 = vld [vmem:[%s15349_s2 + $0xb1c] ss:$24 sps:$4 sm:$0xff]  }
 0x24b   : > { %5792 = vmatprep.subr.bf16.mxu1 %v10941_v8  ;;  %v11005_v8 = vld [vmem:[%s15349_s2 + $0x210] ss:$24 sps:$4 sm:$0xff]  }
 0x24c   : > { %4078 = vmatmul.mubr.bf16.vlgmr.msra.gmra.mrb[24].mxu0 %v13264_v34 }
 0x24d   : > { %4336 = vmatmul.mubr.bf16.vlgmr.msra.gmra.mrb[8].mxu1 %v13264_v34  ;;  %4089 = vmatpush1.bf16.msra.mxu0 %v10936_v14  ;;  %v11013_v14 = vld [vmem:[%s15349_s2 + $0x244] ss:$24 sps:$4 sm:$0xff]  }
 0x24e   : > { %4120 = vmatprep.mubr.bf16.mxu0 %v12812_v30  ;;  %5793 = vmatpush1.bf16.msra.mxu1 %v10939_v15  ;;  %v10948_v30 = vld [vmem:[%s15349_s2 + $0x968] ss:$24 sps:$4 sm:$0xff]  }
 0x24f   : > { %5824 = vmatprep.mubr.bf16.mxu1 %v12792_v0  ;;  %4090 = vmatprep.subr.bf16.mxu0 %v10944_v55  ;;  %v11008_v15 = vld [vmem:[%s15349_s2 + $0xb48] ss:$24 sps:$4 sm:$0xff]  }
 0x250   : > { %5794 = vmatprep.subr.bf16.mxu1 %v10947_v17  ;;  %v11011_v55 = vld [vmem:[%s15349_s2 + $0x240] ss:$24 sps:$4 sm:$0xff]   ;;  %v11016_v17 = vld [vmem:[%s15349_s2 + $0xb7c] ss:$24 sps:$4 sm:$0xff]  }
 0x251   : > { %4091 = vmatpush1.bf16.msra.mxu0 %v10942_v26  ;;  %v11019_v26 = vld [vmem:[%s15349_s2 + $0x274] ss:$24 sps:$4 sm:$0xff]  }
 0x252   : > { %5795 = vmatpush1.bf16.msra.mxu1 %v10945_v18  ;;  %4092 = vmatprep.subr.bf16.mxu0 %v10950_v19  ;;  %v11014_v18 = vld [vmem:[%s15349_s2 + $0xb78] ss:$24 sps:$4 sm:$0xff]  }
 0x253   : > { %5796 = vmatprep.subr.bf16.mxu1 %v10953_v20  ;;  %v11017_v19 = vld [vmem:[%s15349_s2 + $0x270] ss:$24 sps:$4 sm:$0xff]   ;;  %v11022_v20 = vld [vmem:[%s15349_s2 + $0xbac] ss:$24 sps:$4 sm:$0xff]  }
 0x255   : > { %4093 = vmatpush1.bf16.msra.mxu0 %v10948_v30  ;;  %v11025_v30 = vld [vmem:[%s15349_s2 + $0x2a4] ss:$24 sps:$4 sm:$0xff]  }
 0x256   : > { %5797 = vmatpush1.bf16.msra.mxu1 %v10951_v21  ;;  %4094 = vmatprep.subr.bf16.mxu0 %v10956_v22  ;;  %v11020_v21 = vld [vmem:[%s15349_s2 + $0xba8] ss:$24 sps:$4 sm:$0xff]  }
 0x257   : > { %5798 = vmatprep.subr.bf16.mxu1 %v10959_v23  ;;  %v11023_v22 = vld [vmem:[%s15349_s2 + $0x2a0] ss:$24 sps:$4 sm:$0xff]   ;;  %v11028_v23 = vld [vmem:[%s15349_s2 + $0xbdc] ss:$24 sps:$4 sm:$0xff]  }
 0x259   : > { %4095 = vmatpush1.bf16.msra.mxu0 %v10954_v24  ;;  %v11031_v24 = vld [vmem:[%s15349_s2 + $0x2d4] ss:$24 sps:$4 sm:$0xff]  }
 0x25a   : > { %5799 = vmatpush1.bf16.msra.mxu1 %v10957_v25  ;;  %4096 = vmatprep.subr.bf16.mxu0 %v10962_v60  ;;  %v11026_v25 = vld [vmem:[%s15349_s2 + $0xbd8] ss:$24 sps:$4 sm:$0xff]  }
 0x25b   : > { %5800 = vmatprep.subr.bf16.mxu1 %v10965_v27  ;;  %v11029_v60 = vld [vmem:[%s15349_s2 + $0x2d0] ss:$24 sps:$4 sm:$0xff]   ;;  %v11034_v27 = vld [vmem:[%s15349_s2 + $0xc0c] ss:$24 sps:$4 sm:$0xff]  }
 0x25d   : > { %4097 = vmatpush1.bf16.msra.mxu0 %v10960_v45  ;;  %v11037_v45 = vld [vmem:[%s15349_s2 + $0x304] ss:$24 sps:$4 sm:$0xff]  }
 0x25e   : > { %5801 = vmatpush1.bf16.msra.mxu1 %v10963_v2  ;;  %4098 = vmatprep.subr.bf16.mxu0 %v10968_v29  ;;  %v11032_v2 = vld [vmem:[%s15349_s2 + $0xc08] ss:$24 sps:$4 sm:$0xff]  }
 0x25f   : > { %5802 = vmatprep.subr.bf16.mxu1 %v10971_v42  ;;  %v11035_v29 = vld [vmem:[%s15349_s2 + $0x300] ss:$24 sps:$4 sm:$0xff]   ;;  %v11040_v42 = vld [vmem:[%s15349_s2 + $0xc3c] ss:$24 sps:$4 sm:$0xff]  }
 0x261   : > { %4099 = vmatpush1.bf16.msra.mxu0 %v10966_v11  ;;  %v11043_v11 = vld [vmem:[%s15349_s2 + $0x334] ss:$24 sps:$4 sm:$0xff]  }
 0x262   : > { %5803 = vmatpush1.bf16.msra.mxu1 %v10969_v32  ;;  %4100 = vmatprep.subr.bf16.mxu0 %v10974_v33  ;;  %v11038_v32 = vld [vmem:[%s15349_s2 + $0xc38] ss:$24 sps:$4 sm:$0xff]  }
 0x263   : > { %5804 = vmatprep.subr.bf16.mxu1 %v10977_v39  ;;  %v11041_v33 = vld [vmem:[%s15349_s2 + $0x330] ss:$24 sps:$4 sm:$0xff]   ;;  %v11049_v39 = vld [vmem:[%s15349_s2 + $0x364] ss:$24 sps:$4 sm:$0xff]  }
 0x265   : > { %4101 = vmatpush1.bf16.msra.mxu0 %v10972_v41  ;;  %v11047_v41 = vld [vmem:[%s15349_s2 + $0x360] ss:$24 sps:$4 sm:$0xff]  }
 0x266   : > { %5805 = vmatpush1.bf16.msra.mxu1 %v10975_v48  ;;  %4102 = vmatprep.subr.bf16.mxu0 %v10980_v49  ;;  %v11052_v48 = vld [vmem:[%s15349_s2 + $0xc9c] ss:$24 sps:$4 sm:$0xff]  }
 0x267   : > { %5806 = vmatprep.subr.bf16.mxu1 %v10983_v50  ;;  %v11055_v49 = vld [vmem:[%s15349_s2 + $0x394] ss:$24 sps:$4 sm:$0xff]   ;;  %v11050_v50 = vld [vmem:[%s15349_s2 + $0xc98] ss:$24 sps:$4 sm:$0xff]  }
 0x269   : > { %4103 = vmatpush1.bf16.msra.mxu0 %v10978_v51  ;;  %v11053_v51 = vld [vmem:[%s15349_s2 + $0x390] ss:$24 sps:$4 sm:$0xff]  }
 0x26a   : > { %5807 = vmatpush1.bf16.msra.mxu1 %v10981_v52  ;;  %4104 = vmatprep.subr.bf16.mxu0 %v10986_v54  ;;  %v11058_v52 = vld [vmem:[%s15349_s2 + $0xccc] ss:$24 sps:$4 sm:$0xff]  }
 0x26b   : > { %5808 = vmatprep.subr.bf16.mxu1 %v10989_v56  ;;  %v11061_v54 = vld [vmem:[%s15349_s2 + $0x3c4] ss:$24 sps:$4 sm:$0xff]   ;;  %v11056_v56 = vld [vmem:[%s15349_s2 + $0xcc8] ss:$24 sps:$4 sm:$0xff]  }
 0x26d   : > { %4105 = vmatpush1.bf16.msra.mxu0 %v10984_v57  ;;  %v11059_v57 = vld [vmem:[%s15349_s2 + $0x3c0] ss:$24 sps:$4 sm:$0xff]  }
 0x26e   : > { %5809 = vmatpush1.bf16.msra.mxu1 %v10987_v31  ;;  %4106 = vmatprep.subr.bf16.mxu0 %v10992_v4  ;;  %v11064_v31 = vld [vmem:[%s15349_s2 + $0xcfc] ss:$24 sps:$4 sm:$0xff]  }
 0x26f   : > { %5810 = vmatprep.subr.bf16.mxu1 %v10995_v58  ;;  %v11067_v4 = vld [vmem:[%s15349_s2 + $0x3f4] ss:$24 sps:$4 sm:$0xff]   ;;  %v11062_v58 = vld [vmem:[%s15349_s2 + $0xcf8] ss:$24 sps:$4 sm:$0xff]  }
 0x271   : > { %4107 = vmatpush1.bf16.msra.mxu0 %v10990_v61  ;;  %v11065_v61 = vld [vmem:[%s15349_s2 + $0x3f0] ss:$24 sps:$4 sm:$0xff]  }
 0x272   : > { %5811 = vmatpush1.bf16.msra.mxu1 %v10993_v62  ;;  %4108 = vmatprep.subr.bf16.mxu0 %v10998_v59  ;;  %v11070_v62 = vld [vmem:[%s15349_s2 + $0xd2c] ss:$24 sps:$4 sm:$0xff]  }
 0x273   : > { %5812 = vmatprep.subr.bf16.mxu1 %v11001_v63  ;;  %v11073_v59 = vld [vmem:[%s15349_s2 + $0x424] ss:$24 sps:$4 sm:$0xff]   ;;  %v11068_v63 = vld [vmem:[%s15349_s2 + $0xd28] ss:$24 sps:$4 sm:$0xff]  }
 0x275   : > { %4109 = vmatpush1.bf16.msra.mxu0 %v10996_v1  ;;  %v11071_v1 = vld [vmem:[%s15349_s2 + $0x420] ss:$24 sps:$4 sm:$0xff]  }
 0x276   : > { %5813 = vmatpush1.bf16.msra.mxu1 %v10999_v3  ;;  %4110 = vmatprep.subr.bf16.mxu0 %v11004_v9  ;;  %v11076_v3 = vld [vmem:[%s15349_s2 + $0xd5c] ss:$24 sps:$4 sm:$0xff]  }
 0x277   : > { %5814 = vmatprep.subr.bf16.mxu1 %v11007_v5  ;;  %v11079_v9 = vld [vmem:[%s15349_s2 + $0x454] ss:$24 sps:$4 sm:$0xff]   ;;  %v11074_v5 = vld [vmem:[%s15349_s2 + $0xd58] ss:$24 sps:$4 sm:$0xff]  }
 0x279   : > { %4111 = vmatpush1.bf16.msra.mxu0 %v11002_v28  ;;  %v11077_v28 = vld [vmem:[%s15349_s2 + $0x450] ss:$24 sps:$4 sm:$0xff]  }
 0x27a   : > { %5815 = vmatpush1.bf16.msra.mxu1 %v11005_v8  ;;  %4112 = vmatprep.subr.bf16.mxu0 %v11010_v10  ;;  %v11082_v8 = vld [vmem:[%s15349_s2 + $0xd8c] ss:$24 sps:$4 sm:$0xff]  }
 0x27b   : > { %5816 = vmatprep.subr.bf16.mxu1 %v11013_v14  ;;  %v11085_v10 = vld [vmem:[%s15349_s2 + $0x484] ss:$24 sps:$4 sm:$0xff]   ;;  %v11080_v14 = vld [vmem:[%s15349_s2 + $0xd88] ss:$24 sps:$4 sm:$0xff]  }
 0x27d   : > { %4113 = vmatpush1.bf16.msra.mxu0 %v11008_v15  ;;  %v11083_v15 = vld [vmem:[%s15349_s2 + $0x480] ss:$24 sps:$4 sm:$0xff]  }
 0x27e   : > { %5817 = vmatpush1.bf16.msra.mxu1 %v11011_v55  ;;  %4114 = vmatprep.subr.bf16.mxu0 %v11016_v17  ;;  %v11088_v55 = vld [vmem:[%s15349_s2 + $0xdbc] ss:$24 sps:$4 sm:$0xff]  }
 0x27f   : > { %5818 = vmatprep.subr.bf16.mxu1 %v11019_v26  ;;  %v11091_v17 = vld [vmem:[%s15349_s2 + $0x4b4] ss:$24 sps:$4 sm:$0xff]   ;;  %v11086_v26 = vld [vmem:[%s15349_s2 + $0xdb8] ss:$24 sps:$4 sm:$0xff]  }
 0x281   : > { %4115 = vmatpush1.bf16.msra.mxu0 %v11014_v18  ;;  %v11089_v18 = vld [vmem:[%s15349_s2 + $0x4b0] ss:$24 sps:$4 sm:$0xff]  }
 0x282   : > { %5819 = vmatpush1.bf16.msra.mxu1 %v11017_v19  ;;  %4116 = vmatprep.subr.bf16.mxu0 %v11022_v20  ;;  %v11094_v19 = vld [vmem:[%s15349_s2 + $0xdec] ss:$24 sps:$4 sm:$0xff]  }
 0x283   : > { %5820 = vmatprep.subr.bf16.mxu1 %v11025_v30  ;;  %v11097_v20 = vld [vmem:[%s15349_s2 + $0x4e4] ss:$24 sps:$4 sm:$0xff]   ;;  %v11092_v30 = vld [vmem:[%s15349_s2 + $0xde8] ss:$24 sps:$4 sm:$0xff]  }
 0x285   : > { %4117 = vmatpush1.bf16.msra.mxu0 %v11020_v21  ;;  %v11095_v21 = vld [vmem:[%s15349_s2 + $0x4e0] ss:$24 sps:$4 sm:$0xff]  }
 0x286   : > { %5821 = vmatpush1.bf16.msra.mxu1 %v11023_v22  ;;  %4118 = vmatprep.subr.bf16.mxu0 %v11028_v23  ;;  %v11100_v22 = vld [vmem:[%s15349_s2 + $0xe1c] ss:$24 sps:$4 sm:$0xff]  }
 0x287   : > { %5822 = vmatprep.subr.bf16.mxu1 %v11031_v24  ;;  %v11103_v23 = vld [vmem:[%s15349_s2 + $0x514] ss:$24 sps:$4 sm:$0xff]   ;;  %v11098_v24 = vld [vmem:[%s15349_s2 + $0xe18] ss:$24 sps:$4 sm:$0xff]  }
 0x289   : > { %4119 = vmatpush1.bf16.msra.mxu0 %v11026_v25  ;;  %v11101_v25 = vld [vmem:[%s15349_s2 + $0x510] ss:$24 sps:$4 sm:$0xff]  }
 0x28a   : > { %5823 = vmatpush1.bf16.msra.mxu1 %v11029_v60  ;;  %4131 = vmatprep.subr.bf16.mxu0 %v11034_v27  ;;  %v11106_v60 = vld [vmem:[%s15349_s2 + $0xe4c] ss:$24 sps:$4 sm:$0xff]  }
 0x28b   : > { %5835 = vmatprep.subr.bf16.mxu1 %v11037_v45  ;;  %v11109_v27 = vld [vmem:[%s15349_s2 + $0x544] ss:$24 sps:$4 sm:$0xff]   ;;  %v11104_v45 = vld [vmem:[%s15349_s2 + $0xe48] ss:$24 sps:$4 sm:$0xff]  }
 0x28c   : > { %4121 = vmatmul.mubr.bf16.vlgmr.msra.gmra.mrb[28].mxu0 %v12815_v36  ;;  %v11046_v36 = vld [vmem:[%s15349_s2 + $0xc6c] ss:$24 sps:$4 sm:$0xff]  }
 0x28d   : > { %5825 = vmatmul.mubr.bf16.vlgmr.msra.gmra.mrb[12].mxu1 %v12790_v44  ;;  %4132 = vmatpush1.bf16.msra.mxu0 %v11032_v2  ;;  %v11107_v2 = vld [vmem:[%s15349_s2 + $0x540] ss:$24 sps:$4 sm:$0xff]  }
 0x28e   : > { %4163 = vmatprep.mubr.bf16.mxu0 %v12840_v47  ;;  %5836 = vmatpush1.bf16.msra.mxu1 %v11035_v29  ;;  %v11044_v47 = vld [vmem:[%s15349_s2 + $0xc68] ss:$24 sps:$4 sm:$0xff]   ;;  %v11112_v29 = vld [vmem:[%s15349_s2 + $0xe7c] ss:$24 sps:$4 sm:$0xff]  }
 0x28f   : > { %5867 = vmatprep.mubr.bf16.mxu1 %v12785_v37  ;;  %4133 = vmatprep.subr.bf16.mxu0 %v11040_v42  ;;  %v11115_v42 = vld [vmem:[%s15349_s2 + $0x574] ss:$24 sps:$4 sm:$0xff]  }
 0x290   : > { %5837 = vmatprep.subr.bf16.mxu1 %v11043_v11  ;;  %v11110_v11 = vld [vmem:[%s15349_s2 + $0xe78] ss:$24 sps:$4 sm:$0xff]  }
 0x291   : > { %4134 = vmatpush1.bf16.msra.mxu0 %v11038_v32  ;;  %v11113_v32 = vld [vmem:[%s15349_s2 + $0x570] ss:$24 sps:$4 sm:$0xff]  }
 0x292   : > { %5838 = vmatpush1.bf16.msra.mxu1 %v11041_v33  ;;  %4135 = vmatprep.subr.bf16.mxu0 %v11046_v36  ;;  %v11118_v33 = vld [vmem:[%s15349_s2 + $0xeac] ss:$24 sps:$4 sm:$0xff]  }
 0x293   : > { %5839 = vmatprep.subr.bf16.mxu1 %v11049_v39  ;;  %v11121_v36 = vld [vmem:[%s15349_s2 + $0x5a4] ss:$24 sps:$4 sm:$0xff]   ;;  %v11116_v39 = vld [vmem:[%s15349_s2 + $0xea8] ss:$24 sps:$4 sm:$0xff]  }
 0x295   : > { %4136 = vmatpush1.bf16.msra.mxu0 %v11044_v47  ;;  %v11119_v47 = vld [vmem:[%s15349_s2 + $0x5a0] ss:$24 sps:$4 sm:$0xff]  }
 0x296   : > { %5840 = vmatpush1.bf16.msra.mxu1 %v11047_v41  ;;  %4137 = vmatprep.subr.bf16.mxu0 %v11052_v48  ;;  %v11124_v41 = vld [vmem:[%s15349_s2 + $0xedc] ss:$24 sps:$4 sm:$0xff]  }
 0x297   : > { %5841 = vmatprep.subr.bf16.mxu1 %v11055_v49  ;;  %v11127_v48 = vld [vmem:[%s15349_s2 + $0x5d4] ss:$24 sps:$4 sm:$0xff]   ;;  %v11122_v49 = vld [vmem:[%s15349_s2 + $0xed8] ss:$24 sps:$4 sm:$0xff]  }
 0x299   : > { %4138 = vmatpush1.bf16.msra.mxu0 %v11050_v50  ;;  %v11125_v50 = vld [vmem:[%s15349_s2 + $0x5d0] ss:$24 sps:$4 sm:$0xff]  }
 0x29a   : > { %5842 = vmatpush1.bf16.msra.mxu1 %v11053_v51  ;;  %4139 = vmatprep.subr.bf16.mxu0 %v11058_v52  ;;  %v11130_v51 = vld [vmem:[%s15349_s2 + $0xf0c] ss:$24 sps:$4 sm:$0xff]  }
 0x29b   : > { %5843 = vmatprep.subr.bf16.mxu1 %v11061_v54  ;;  %v11133_v52 = vld [vmem:[%s15349_s2 + $0x604] ss:$24 sps:$4 sm:$0xff]   ;;  %v11128_v54 = vld [vmem:[%s15349_s2 + $0xf08] ss:$24 sps:$4 sm:$0xff]  }
 0x29d   : > { %4140 = vmatpush1.bf16.msra.mxu0 %v11056_v56  ;;  %v11131_v56 = vld [vmem:[%s15349_s2 + $0x600] ss:$24 sps:$4 sm:$0xff]  }
 0x29e   : > { %5844 = vmatpush1.bf16.msra.mxu1 %v11059_v57  ;;  %4141 = vmatprep.subr.bf16.mxu0 %v11064_v31  ;;  %v11136_v57 = vld [vmem:[%s15349_s2 + $0xf3c] ss:$24 sps:$4 sm:$0xff]  }
 0x29f   : > { %5845 = vmatprep.subr.bf16.mxu1 %v11067_v4  ;;  %v11139_v31 = vld [vmem:[%s15349_s2 + $0x634] ss:$24 sps:$4 sm:$0xff]   ;;  %v11134_v4 = vld [vmem:[%s15349_s2 + $0xf38] ss:$24 sps:$4 sm:$0xff]  }
 0x2a1   : > { %4142 = vmatpush1.bf16.msra.mxu0 %v11062_v58  ;;  %v11137_v58 = vld [vmem:[%s15349_s2 + $0x630] ss:$24 sps:$4 sm:$0xff]  }
 0x2a2   : > { %5846 = vmatpush1.bf16.msra.mxu1 %v11065_v61  ;;  %4143 = vmatprep.subr.bf16.mxu0 %v11070_v62  ;;  %v11145_v61 = vld [vmem:[%s15349_s2 + $0x664] ss:$24 sps:$4 sm:$0xff]   ;;  %v11143_v62 = vld [vmem:[%s15349_s2 + $0x660] ss:$24 sps:$4 sm:$0xff]  }
 0x2a3   : > { %5847 = vmatprep.subr.bf16.mxu1 %v11073_v59  ;;  %v11148_v59 = vld [vmem:[%s15349_s2 + $0xf9c] ss:$24 sps:$4 sm:$0xff]  }
 0x2a5   : > { %4144 = vmatpush1.bf16.msra.mxu0 %v11068_v63  ;;  %v11151_v63 = vld [vmem:[%s15349_s2 + $0x694] ss:$24 sps:$4 sm:$0xff]  }
 0x2a6   : > { %5848 = vmatpush1.bf16.msra.mxu1 %v11071_v1  ;;  %4145 = vmatprep.subr.bf16.mxu0 %v11076_v3  ;;  %v11146_v1 = vld [vmem:[%s15349_s2 + $0xf98] ss:$24 sps:$4 sm:$0xff]  }
 0x2a7   : > { %5849 = vmatprep.subr.bf16.mxu1 %v11079_v9  ;;  %v11149_v3 = vld [vmem:[%s15349_s2 + $0x690] ss:$24 sps:$4 sm:$0xff]   ;;  %v11154_v9 = vld [vmem:[%s15349_s2 + $0xfcc] ss:$24 sps:$4 sm:$0xff]  }
 0x2a9   : > { %4146 = vmatpush1.bf16.msra.mxu0 %v11074_v5  ;;  %v11157_v5 = vld [vmem:[%s15349_s2 + $0x6c4] ss:$24 sps:$4 sm:$0xff]  }
 0x2aa   : > { %5850 = vmatpush1.bf16.msra.mxu1 %v11077_v28  ;;  %4147 = vmatprep.subr.bf16.mxu0 %v11082_v8  ;;  %v11152_v28 = vld [vmem:[%s15349_s2 + $0xfc8] ss:$24 sps:$4 sm:$0xff]  }
 0x2ab   : > { %5851 = vmatprep.subr.bf16.mxu1 %v11085_v10  ;;  %v11155_v8 = vld [vmem:[%s15349_s2 + $0x6c0] ss:$24 sps:$4 sm:$0xff]   ;;  %v11160_v10 = vld [vmem:[%s15349_s2 + $0xffc] ss:$24 sps:$4 sm:$0xff]  }
 0x2ad   : > { %4148 = vmatpush1.bf16.msra.mxu0 %v11080_v14  ;;  %v11163_v14 = vld [vmem:[%s15349_s2 + $0x6f4] ss:$24 sps:$4 sm:$0xff]  }
 0x2ae   : > { %5852 = vmatpush1.bf16.msra.mxu1 %v11083_v15  ;;  %4149 = vmatprep.subr.bf16.mxu0 %v11088_v55  ;;  %v11158_v15 = vld [vmem:[%s15349_s2 + $0xff8] ss:$24 sps:$4 sm:$0xff]  }
 0x2af   : > { %5853 = vmatprep.subr.bf16.mxu1 %v11091_v17  ;;  %v11161_v55 = vld [vmem:[%s15349_s2 + $0x6f0] ss:$24 sps:$4 sm:$0xff]   ;;  %v11166_v17 = vld [vmem:[%s15349_s2 + $0x102c] ss:$24 sps:$4 sm:$0xff]  }
 0x2b1   : > { %4150 = vmatpush1.bf16.msra.mxu0 %v11086_v26  ;;  %v11169_v26 = vld [vmem:[%s15349_s2 + $0x724] ss:$24 sps:$4 sm:$0xff]  }
 0x2b2   : > { %5854 = vmatpush1.bf16.msra.mxu1 %v11089_v18  ;;  %4151 = vmatprep.subr.bf16.mxu0 %v11094_v19  ;;  %v11164_v18 = vld [vmem:[%s15349_s2 + $0x1028] ss:$24 sps:$4 sm:$0xff]  }
 0x2b3   : > { %5855 = vmatprep.subr.bf16.mxu1 %v11097_v20  ;;  %v11167_v19 = vld [vmem:[%s15349_s2 + $0x720] ss:$24 sps:$4 sm:$0xff]   ;;  %v11172_v20 = vld [vmem:[%s15349_s2 + $0x105c] ss:$24 sps:$4 sm:$0xff]  }
 0x2b5   : > { %4152 = vmatpush1.bf16.msra.mxu0 %v11092_v30  ;;  %v11175_v30 = vld [vmem:[%s15349_s2 + $0x754] ss:$24 sps:$4 sm:$0xff]  }
 0x2b6   : > { %5856 = vmatpush1.bf16.msra.mxu1 %v11095_v21  ;;  %4153 = vmatprep.subr.bf16.mxu0 %v11100_v22  ;;  %v11170_v21 = vld [vmem:[%s15349_s2 + $0x1058] ss:$24 sps:$4 sm:$0xff]  }
 0x2b7   : > { %5857 = vmatprep.subr.bf16.mxu1 %v11103_v23  ;;  %v11173_v22 = vld [vmem:[%s15349_s2 + $0x750] ss:$24 sps:$4 sm:$0xff]   ;;  %v11178_v23 = vld [vmem:[%s15349_s2 + $0x108c] ss:$24 sps:$4 sm:$0xff]  }
 0x2b9   : > { %4154 = vmatpush1.bf16.msra.mxu0 %v11098_v24  ;;  %v11181_v24 = vld [vmem:[%s15349_s2 + $0x784] ss:$24 sps:$4 sm:$0xff]  }
 0x2ba   : > { %5858 = vmatpush1.bf16.msra.mxu1 %v11101_v25  ;;  %4155 = vmatprep.subr.bf16.mxu0 %v11106_v60  ;;  %v11176_v25 = vld [vmem:[%s15349_s2 + $0x1088] ss:$24 sps:$4 sm:$0xff]  }
 0x2bb   : > { %5859 = vmatprep.subr.bf16.mxu1 %v11109_v27  ;;  %v11179_v60 = vld [vmem:[%s15349_s2 + $0x780] ss:$24 sps:$4 sm:$0xff]   ;;  %v11184_v27 = vld [vmem:[%s15349_s2 + $0x10bc] ss:$24 sps:$4 sm:$0xff]  }
 0x2bd   : > { %4156 = vmatpush1.bf16.msra.mxu0 %v11104_v45  ;;  %v11187_v45 = vld [vmem:[%s15349_s2 + $0x7b4] ss:$24 sps:$4 sm:$0xff]  }
 0x2be   : > { %5860 = vmatpush1.bf16.msra.mxu1 %v11107_v2  ;;  %4157 = vmatprep.subr.bf16.mxu0 %v11112_v29  ;;  %v11182_v2 = vld [vmem:[%s15349_s2 + $0x10b8] ss:$24 sps:$4 sm:$0xff]  }
 0x2bf   : > { %5861 = vmatprep.subr.bf16.mxu1 %v11115_v42  ;;  %v11185_v29 = vld [vmem:[%s15349_s2 + $0x7b0] ss:$24 sps:$4 sm:$0xff]   ;;  %v11190_v42 = vld [vmem:[%s15349_s2 + $0x10ec] ss:$24 sps:$4 sm:$0xff]  }
 0x2c1   : > { %4158 = vmatpush1.bf16.msra.mxu0 %v11110_v11  ;;  %v11193_v11 = vld [vmem:[%s15349_s2 + $0x7e4] ss:$24 sps:$4 sm:$0xff]  }
 0x2c2   : > { %5862 = vmatpush1.bf16.msra.mxu1 %v11113_v32  ;;  %4159 = vmatprep.subr.bf16.mxu0 %v11118_v33  ;;  %v11188_v32 = vld [vmem:[%s15349_s2 + $0x10e8] ss:$24 sps:$4 sm:$0xff]  }
 0x2c3   : > { %5863 = vmatprep.subr.bf16.mxu1 %v11121_v36  ;;  %v11191_v33 = vld [vmem:[%s15349_s2 + $0x7e0] ss:$24 sps:$4 sm:$0xff]   ;;  %v11196_v36 = vld [vmem:[%s15349_s2 + $0x111c] ss:$24 sps:$4 sm:$0xff]  }
 0x2c5   : > { %4160 = vmatpush1.bf16.msra.mxu0 %v11116_v39  ;;  %v11199_v39 = vld [vmem:[%s15349_s2 + $0x814] ss:$24 sps:$4 sm:$0xff]  }
 0x2c6   : > { %5864 = vmatpush1.bf16.msra.mxu1 %v11119_v47  ;;  %4161 = vmatprep.subr.bf16.mxu0 %v11124_v41  ;;  %v11194_v47 = vld [vmem:[%s15349_s2 + $0x1118] ss:$24 sps:$4 sm:$0xff]  }
 0x2c7   : > { %5865 = vmatprep.subr.bf16.mxu1 %v11127_v48  ;;  %v11197_v41 = vld [vmem:[%s15349_s2 + $0x810] ss:$24 sps:$4 sm:$0xff]   ;;  %v11202_v48 = vld [vmem:[%s15349_s2 + $0x114c] ss:$24 sps:$4 sm:$0xff]  }
 0x2c9   : > { %4162 = vmatpush1.bf16.msra.mxu0 %v11122_v49  ;;  %v11205_v49 = vld [vmem:[%s15349_s2 + $0x844] ss:$24 sps:$4 sm:$0xff]  }
 0x2ca   : > { %5866 = vmatpush1.bf16.msra.mxu1 %v11125_v50  ;;  %4174 = vmatprep.subr.bf16.mxu0 %v11130_v51  ;;  %v11200_v50 = vld [vmem:[%s15349_s2 + $0x1148] ss:$24 sps:$4 sm:$0xff]  }
 0x2cb   : > { %5878 = vmatprep.subr.bf16.mxu1 %v11133_v52  ;;  %v11203_v51 = vld [vmem:[%s15349_s2 + $0x840] ss:$24 sps:$4 sm:$0xff]   ;;  %v11208_v52 = vld [vmem:[%s15349_s2 + $0x117c] ss:$24 sps:$4 sm:$0xff]  }
 0x2cc   : > { %4164 = vmatmul.mubr.bf16.vlgmr.msra.gmra.mrb[28].mxu0 %v13055_v40  ;;  %v11142_v40 = vld [vmem:[%s15349_s2 + $0xf6c] ss:$24 sps:$4 sm:$0xff]  }
 0x2cd   : > { %5868 = vmatmul.mubr.bf16.vlgmr.msra.gmra.mrb[12].mxu1 %v13006_v12  ;;  %4175 = vmatpush1.bf16.msra.mxu0 %v11128_v54  ;;  %v11211_v54 = vld [vmem:[%s15349_s2 + $0x874] ss:$24 sps:$4 sm:$0xff]  }
 0x2ce   : > { %4206 = vmatprep.mubr.bf16.mxu0 %v13066_v13  ;;  %5879 = vmatpush1.bf16.msra.mxu1 %v11131_v56  ;;  %v11140_v13 = vld [vmem:[%s15349_s2 + $0xf68] ss:$24 sps:$4 sm:$0xff]   ;;  %v11206_v56 = vld [vmem:[%s15349_s2 + $0x1178] ss:$24 sps:$4 sm:$0xff]  }
 0x2cf   : > { %5910 = vmatprep.mubr.bf16.mxu1 %v13016_v16  ;;  %4176 = vmatprep.subr.bf16.mxu0 %v11136_v57  ;;  %v11209_v57 = vld [vmem:[%s15349_s2 + $0x870] ss:$24 sps:$4 sm:$0xff]  }
 0x2d0   : > { %5880 = vmatprep.subr.bf16.mxu1 %v11139_v31  ;;  %v11214_v31 = vld [vmem:[%s15349_s2 + $0x11ac] ss:$24 sps:$4 sm:$0xff]  }
 0x2d1   : > { %4177 = vmatpush1.bf16.msra.mxu0 %v11134_v4  ;;  %v11217_v4 = vld [vmem:[%s15349_s2 + $0x8a4] ss:$24 sps:$4 sm:$0xff]  }
 0x2d2   : > { %5881 = vmatpush1.bf16.msra.mxu1 %v11137_v58  ;;  %4178 = vmatprep.subr.bf16.mxu0 %v11142_v40  ;;  %v11212_v58 = vld [vmem:[%s15349_s2 + $0x11a8] ss:$24 sps:$4 sm:$0xff]  }
 0x2d3   : > { %5882 = vmatprep.subr.bf16.mxu1 %v11145_v61  ;;  %v11215_v40 = vld [vmem:[%s15349_s2 + $0x8a0] ss:$24 sps:$4 sm:$0xff]   ;;  %v11220_v61 = vld [vmem:[%s15349_s2 + $0x11dc] ss:$24 sps:$4 sm:$0xff]  }
 0x2d5   : > { %4179 = vmatpush1.bf16.msra.mxu0 %v11140_v13  ;;  %v11223_v13 = vld [vmem:[%s15349_s2 + $0x8d4] ss:$24 sps:$4 sm:$0xff]  }
 0x2d6   : > { %5883 = vmatpush1.bf16.msra.mxu1 %v11143_v62  ;;  %4180 = vmatprep.subr.bf16.mxu0 %v11148_v59  ;;  %v11218_v62 = vld [vmem:[%s15349_s2 + $0x11d8] ss:$24 sps:$4 sm:$0xff]  }
 0x2d7   : > { %5884 = vmatprep.subr.bf16.mxu1 %v11151_v63  ;;  %v11221_v59 = vld [vmem:[%s15349_s2 + $0x8d0] ss:$24 sps:$4 sm:$0xff]   ;;  %v11226_v63 = vld [vmem:[%s15349_s2 + $0xc] ss:$24 sps:$4 sm:$0xff]  }
 0x2d9   : > { %4181 = vmatpush1.bf16.msra.mxu0 %v11146_v1  ;;  %v11229_v1 = vld [vmem:[%s15349_s2 + $0x14] ss:$24 sps:$4 sm:$0xff]  }
 0x2da   : > { %5885 = vmatpush1.bf16.msra.mxu1 %v11149_v3  ;;  %4182 = vmatprep.subr.bf16.mxu0 %v11154_v9  ;;  %v11224_v3 = vld [vmem:[%s15349_s2 + $0x8] ss:$24 sps:$4 sm:$0xff]  }
 0x2db   : > { %5886 = vmatprep.subr.bf16.mxu1 %v11157_v5  ;;  %v11227_v9 = vld [vmem:[%s15349_s2 + $0x10] ss:$24 sps:$4 sm:$0xff]   ;;  %v11232_v5 = vld [vmem:[%s15349_s2 + $0x3c] ss:$24 sps:$4 sm:$0xff]  }
 0x2dd   : > { %4183 = vmatpush1.bf16.msra.mxu0 %v11152_v28  ;;  %v11235_v28 = vld [vmem:[%s15349_s2 + $0x44] ss:$24 sps:$4 sm:$0xff]  }
 0x2de   : > { %5887 = vmatpush1.bf16.msra.mxu1 %v11155_v8  ;;  %4184 = vmatprep.subr.bf16.mxu0 %v11160_v10  ;;  %v11230_v8 = vld [vmem:[%s15349_s2 + $0x38] ss:$24 sps:$4 sm:$0xff]  }
 0x2df   : > { %5888 = vmatprep.subr.bf16.mxu1 %v11163_v14  ;;  %v11233_v10 = vld [vmem:[%s15349_s2 + $0x40] ss:$24 sps:$4 sm:$0xff]   ;;  %v11241_v14 = vld [vmem:[%s15349_s2 + $0x74] ss:$24 sps:$4 sm:$0xff]  }
 0x2e1   : > { %4185 = vmatpush1.bf16.msra.mxu0 %v11158_v15  ;;  %v11236_v15 = vld [vmem:[%s15349_s2 + $0x68] ss:$24 sps:$4 sm:$0xff]  }
 0x2e2   : > { %5889 = vmatpush1.bf16.msra.mxu1 %v11161_v55  ;;  %4186 = vmatprep.subr.bf16.mxu0 %v11166_v17  ;;  %v11239_v55 = vld [vmem:[%s15349_s2 + $0x70] ss:$24 sps:$4 sm:$0xff]   ;;  %v11247_v17 = vld [vmem:[%s15349_s2 + $0xa4] ss:$24 sps:$4 sm:$0xff]  }
 0x2e3   : > { %5890 = vmatprep.subr.bf16.mxu1 %v11169_v26  ;;  %v11242_v26 = vld [vmem:[%s15349_s2 + $0x98] ss:$24 sps:$4 sm:$0xff]  }
 0x2e5   : > { %4187 = vmatpush1.bf16.msra.mxu0 %v11164_v18  ;;  %v11245_v18 = vld [vmem:[%s15349_s2 + $0xa0] ss:$24 sps:$4 sm:$0xff]  }
 0x2e6   : > { %5891 = vmatpush1.bf16.msra.mxu1 %v11167_v19  ;;  %4188 = vmatprep.subr.bf16.mxu0 %v11172_v20  ;;  %v11250_v19 = vld [vmem:[%s15349_s2 + $0xcc] ss:$24 sps:$4 sm:$0xff]  }
 0x2e7   : > { %5892 = vmatprep.subr.bf16.mxu1 %v11175_v30  ;;  %v11253_v20 = vld [vmem:[%s15349_s2 + $0xd4] ss:$24 sps:$4 sm:$0xff]   ;;  %v11248_v30 = vld [vmem:[%s15349_s2 + $0xc8] ss:$24 sps:$4 sm:$0xff]  }
 0x2e9   : > { %4189 = vmatpush1.bf16.msra.mxu0 %v11170_v21  ;;  %v11251_v21 = vld [vmem:[%s15349_s2 + $0xd0] ss:$24 sps:$4 sm:$0xff]  }
 0x2ea   : > { %5893 = vmatpush1.bf16.msra.mxu1 %v11173_v22  ;;  %4190 = vmatprep.subr.bf16.mxu0 %v11178_v23  ;;  %v11256_v22 = vld [vmem:[%s15349_s2 + $0xfc] ss:$24 sps:$4 sm:$0xff]  }
 0x2eb   : > { %5894 = vmatprep.subr.bf16.mxu1 %v11181_v24  ;;  %v11259_v23 = vld [vmem:[%s15349_s2 + $0x104] ss:$24 sps:$4 sm:$0xff]   ;;  %v11254_v24 = vld [vmem:[%s15349_s2 + $0xf8] ss:$24 sps:$4 sm:$0xff]  }
 0x2ed   : > { %4191 = vmatpush1.bf16.msra.mxu0 %v11176_v25  ;;  %v11257_v25 = vld [vmem:[%s15349_s2 + $0x100] ss:$24 sps:$4 sm:$0xff]  }
 0x2ee   : > { %5895 = vmatpush1.bf16.msra.mxu1 %v11179_v60  ;;  %4192 = vmatprep.subr.bf16.mxu0 %v11184_v27  ;;  %v11262_v60 = vld [vmem:[%s15349_s2 + $0x12c] ss:$24 sps:$4 sm:$0xff]  }
 0x2ef   : > { %5896 = vmatprep.subr.bf16.mxu1 %v11187_v45  ;;  %v11265_v45 = vld [vmem:[%s15349_s2 + $0x134] ss:$24 sps:$4 sm:$0xff]  }
 0x2f1   : > { %4193 = vmatpush1.bf16.msra.mxu0 %v11182_v2 }
 0x2f2   : > { %5897 = vmatpush1.bf16.msra.mxu1 %v11185_v29  ;;  %4194 = vmatprep.subr.bf16.mxu0 %v11190_v42  ;;  %v11260_v42 = vld [vmem:[%s15349_s2 + $0x128] ss:$24 sps:$4 sm:$0xff]  }
 0x2f3   : > { %5898 = vmatprep.subr.bf16.mxu1 %v11193_v11 }
 0x2f5   : > { %4195 = vmatpush1.bf16.msra.mxu0 %v11188_v32  ;;  %v11263_v32 = vld [vmem:[%s15349_s2 + $0x130] ss:$24 sps:$4 sm:$0xff]  }
 0x2f6   : > { %5899 = vmatpush1.bf16.msra.mxu1 %v11191_v33  ;;  %4196 = vmatprep.subr.bf16.mxu0 %v11196_v36  ;;  %v11268_v33 = vld [vmem:[%s15349_s2 + $0x15c] ss:$24 sps:$4 sm:$0xff]  }
 0x2f7   : > { %5900 = vmatprep.subr.bf16.mxu1 %v11199_v39  ;;  %v11271_v36 = vld [vmem:[%s15349_s2 + $0x164] ss:$24 sps:$4 sm:$0xff]   ;;  %v11266_v39 = vld [vmem:[%s15349_s2 + $0x158] ss:$24 sps:$4 sm:$0xff]  }
 0x2f9   : > { %4197 = vmatpush1.bf16.msra.mxu0 %v11194_v47  ;;  %v11269_v47 = vld [vmem:[%s15349_s2 + $0x160] ss:$24 sps:$4 sm:$0xff]  }
 0x2fa   : > { %5901 = vmatpush1.bf16.msra.mxu1 %v11197_v41  ;;  %4198 = vmatprep.subr.bf16.mxu0 %v11202_v48  ;;  %v11274_v41 = vld [vmem:[%s15349_s2 + $0x18c] ss:$24 sps:$4 sm:$0xff]  }
 0x2fb   : > { %5902 = vmatprep.subr.bf16.mxu1 %v11205_v49  ;;  %v11277_v48 = vld [vmem:[%s15349_s2 + $0x194] ss:$24 sps:$4 sm:$0xff]   ;;  %v11272_v49 = vld [vmem:[%s15349_s2 + $0x188] ss:$24 sps:$4 sm:$0xff]  }
 0x2fd   : > { %4199 = vmatpush1.bf16.msra.mxu0 %v11200_v50  ;;  %v11275_v50 = vld [vmem:[%s15349_s2 + $0x190] ss:$24 sps:$4 sm:$0xff]  }
 0x2fe   : > { %5903 = vmatpush1.bf16.msra.mxu1 %v11203_v51  ;;  %4200 = vmatprep.subr.bf16.mxu0 %v11208_v52  ;;  %v11280_v51 = vld [vmem:[%s15349_s2 + $0x1bc] ss:$24 sps:$4 sm:$0xff]  }
 0x2ff   : > { %5904 = vmatprep.subr.bf16.mxu1 %v11211_v54  ;;  %v11283_v52 = vld [vmem:[%s15349_s2 + $0x1c4] ss:$24 sps:$4 sm:$0xff]   ;;  %v11278_v54 = vld [vmem:[%s15349_s2 + $0x1b8] ss:$24 sps:$4 sm:$0xff]  }
 0x301   : > { %4201 = vmatpush1.bf16.msra.mxu0 %v11206_v56  ;;  %v11281_v56 = vld [vmem:[%s15349_s2 + $0x1c0] ss:$24 sps:$4 sm:$0xff]  }
 0x302   : > { %5905 = vmatpush1.bf16.msra.mxu1 %v11209_v57  ;;  %4202 = vmatprep.subr.bf16.mxu0 %v11214_v31  ;;  %v11286_v57 = vld [vmem:[%s15349_s2 + $0x1ec] ss:$24 sps:$4 sm:$0xff]  }
 0x303   : > { %5906 = vmatprep.subr.bf16.mxu1 %v11217_v4  ;;  %v11289_v31 = vld [vmem:[%s15349_s2 + $0x1f4] ss:$24 sps:$4 sm:$0xff]   ;;  %v11284_v4 = vld [vmem:[%s15349_s2 + $0x1e8] ss:$24 sps:$4 sm:$0xff]  }
 0x305   : > { %4203 = vmatpush1.bf16.msra.mxu0 %v11212_v58  ;;  %v11287_v58 = vld [vmem:[%s15349_s2 + $0x1f0] ss:$24 sps:$4 sm:$0xff]  }
 0x306   : > { %5907 = vmatpush1.bf16.msra.mxu1 %v11215_v40  ;;  %4204 = vmatprep.subr.bf16.mxu0 %v11220_v61  ;;  %v11292_v40 = vld [vmem:[%s15349_s2 + $0x21c] ss:$24 sps:$4 sm:$0xff]  }
 0x307   : > { %5908 = vmatprep.subr.bf16.mxu1 %v11223_v13  ;;  %v11295_v61 = vld [vmem:[%s15349_s2 + $0x224] ss:$24 sps:$4 sm:$0xff]   ;;  %v11290_v13 = vld [vmem:[%s15349_s2 + $0x218] ss:$24 sps:$4 sm:$0xff]  }
 0x309   : > { %4205 = vmatpush1.bf16.msra.mxu0 %v11218_v62  ;;  %v11293_v62 = vld [vmem:[%s15349_s2 + $0x220] ss:$24 sps:$4 sm:$0xff]  }
 0x30a   : > { %5909 = vmatpush1.bf16.msra.mxu1 %v11221_v59  ;;  %5921 = vmatprep.subr.bf16.mxu0 %v11226_v63  ;;  %v11298_v59 = vld [vmem:[%s15349_s2 + $0x24c] ss:$24 sps:$4 sm:$0xff]  }
 0x30b   : > { %6050 = vmatprep.subr.bf16.mxu1 %v11229_v1  ;;  %v11301_v63 = vld [vmem:[%s15349_s2 + $0x254] ss:$24 sps:$4 sm:$0xff]   ;;  %v11296_v1 = vld [vmem:[%s15349_s2 + $0x248] ss:$24 sps:$4 sm:$0xff]  }
 0x30c   : > { %4207 = vmatmul.mubr.bf16.vlgmr.msra.gmra.mrb[28].mxu0 %v13264_v34  ;;  %v11238_v34 = vld [vmem:[%s15349_s2 + $0x6c] ss:$24 sps:$4 sm:$0xff]  }
 0x30d   : > { %5911 = vmatmul.mubr.bf16.vlgmr.msra.gmra.mrb[12].mxu1 %v13219_v53  ;;  %5922 = vmatpush1.bf16.msra.mxu0 %v11224_v3  ;;  %v11299_v3 = vld [vmem:[%s15349_s2 + $0x250] ss:$24 sps:$4 sm:$0xff]  }
 0x30e   : > { %5953 = vmatprep.mubr.bf16.mxu0 %v12792_v0  ;;  %6051 = vmatpush1.bf16.msra.mxu1 %v11227_v9  ;;  %v11304_v9 = vld [vmem:[%s15349_s2 + $0x27c] ss:$24 sps:$4 sm:$0xff]  }
 0x30f   : > { %6082 = vmatprep.mubr.bf16.mxu1 %v12792_v0  ;;  %5923 = vmatprep.subr.bf16.mxu0 %v11232_v5  ;;  %v11244_v0 = vld [vmem:[%s15349_s2 + $0x9c] ss:$24 sps:$4 sm:$0xff]  }
 0x310   : > { %6052 = vmatprep.subr.bf16.mxu1 %v11235_v28  ;;  %v11307_v5 = vld [vmem:[%s15349_s2 + $0x284] ss:$24 sps:$4 sm:$0xff]   ;;  %v11302_v28 = vld [vmem:[%s15349_s2 + $0x278] ss:$24 sps:$4 sm:$0xff]  }
 0x311   : > { %5924 = vmatpush1.bf16.msra.mxu0 %v11230_v8  ;;  %v11305_v8 = vld [vmem:[%s15349_s2 + $0x280] ss:$24 sps:$4 sm:$0xff]  }
 0x312   : > { %6053 = vmatpush1.bf16.msra.mxu1 %v11233_v10  ;;  %5925 = vmatprep.subr.bf16.mxu0 %v11238_v34  ;;  %v11310_v10 = vld [vmem:[%s15349_s2 + $0x2ac] ss:$24 sps:$4 sm:$0xff]  }
 0x313   : > { %6054 = vmatprep.subr.bf16.mxu1 %v11241_v14  ;;  %v11313_v34 = vld [vmem:[%s15349_s2 + $0x2b4] ss:$24 sps:$4 sm:$0xff]   ;;  %v11308_v14 = vld [vmem:[%s15349_s2 + $0x2a8] ss:$24 sps:$4 sm:$0xff]  }
 0x315   : > { %5926 = vmatpush1.bf16.msra.mxu0 %v11236_v15  ;;  %v11311_v15 = vld [vmem:[%s15349_s2 + $0x2b0] ss:$24 sps:$4 sm:$0xff]  }
 0x316   : > { %6055 = vmatpush1.bf16.msra.mxu1 %v11239_v55  ;;  %5927 = vmatprep.subr.bf16.mxu0 %v11244_v0  ;;  %v11316_v55 = vld [vmem:[%s15349_s2 + $0x2dc] ss:$24 sps:$4 sm:$0xff]  }
 0x317   : > { %6056 = vmatprep.subr.bf16.mxu1 %v11247_v17  ;;  %v11319_v0 = vld [vmem:[%s15349_s2 + $0x2e4] ss:$24 sps:$4 sm:$0xff]   ;;  %v11314_v17 = vld [vmem:[%s15349_s2 + $0x2d8] ss:$24 sps:$4 sm:$0xff]  }
 0x319   : > { %5928 = vmatpush1.bf16.msra.mxu0 %v11242_v26  ;;  %v11317_v26 = vld [vmem:[%s15349_s2 + $0x2e0] ss:$24 sps:$4 sm:$0xff]  }
 0x31a   : > { %6057 = vmatpush1.bf16.msra.mxu1 %v11245_v18  ;;  %5929 = vmatprep.subr.bf16.mxu0 %v11250_v19  ;;  %v11322_v18 = vld [vmem:[%s15349_s2 + $0x30c] ss:$24 sps:$4 sm:$0xff]  }
 0x31b   : > { %6058 = vmatprep.subr.bf16.mxu1 %v11253_v20  ;;  %v11325_v19 = vld [vmem:[%s15349_s2 + $0x314] ss:$24 sps:$4 sm:$0xff]   ;;  %v11320_v20 = vld [vmem:[%s15349_s2 + $0x308] ss:$24 sps:$4 sm:$0xff]  }
 0x31d   : > { %5930 = vmatpush1.bf16.msra.mxu0 %v11248_v30  ;;  %v11323_v30 = vld [vmem:[%s15349_s2 + $0x310] ss:$24 sps:$4 sm:$0xff]  }
 0x31e   : > { %6059 = vmatpush1.bf16.msra.mxu1 %v11251_v21  ;;  %5931 = vmatprep.subr.bf16.mxu0 %v11256_v22  ;;  %v11328_v21 = vld [vmem:[%s15349_s2 + $0x33c] ss:$24 sps:$4 sm:$0xff]  }
 0x31f   : > { %v13921_v27 = vpop.f32.mrb[24].mxu0  ;;  %6060 = vmatprep.subr.bf16.mxu1 %v11259_v23  ;;  %v11331_v22 = vld [vmem:[%s15349_s2 + $0x344] ss:$24 sps:$4 sm:$0xff]   ;;  %v11326_v23 = vld [vmem:[%s15349_s2 + $0x338] ss:$24 sps:$4 sm:$0xff]  }
 0x320   : > { %v13926_v2 = vpop.f32.mrb[25].mxu0 }
 0x321   : > { %v13928_v29 = vpop.f32.mrb[26].mxu0  ;;  %5932 = vmatpush1.bf16.msra.mxu0 %v11254_v24  ;;  %v11329_v24 = vld [vmem:[%s15349_s2 + $0x340] ss:$24 sps:$4 sm:$0xff]  }
 0x322   : > { %6061 = vmatpush1.bf16.msra.mxu1 %v11257_v25  ;;  %v13933_v11 = vpop.f32.mrb[27].mxu0  ;;  %5933 = vmatprep.subr.bf16.mxu0 %v11262_v60  ;;  %v11334_v25 = vld [vmem:[%s15349_s2 + $0x36c] ss:$24 sps:$4 sm:$0xff]   ;;  %v11332_v60 = vld [vmem:[%s15349_s2 + $0x368] ss:$24 sps:$4 sm:$0xff]  }
 0x323   : > { %6062 = vmatprep.subr.bf16.mxu1 %v11265_v45  ;;  %v11335_v45 = vld [vmem:[%s15349_s2 + $0x370] ss:$24 sps:$4 sm:$0xff]  }
 0x325   : > { %5934 = vmatpush1.bf16.msra.mxu0 %v11260_v42  ;;  %v11343_v42 = vld [vmem:[%s15349_s2 + $0x3a4] ss:$24 sps:$4 sm:$0xff]  }
 0x326   : > { %6063 = vmatpush1.bf16.msra.mxu1 %v11263_v32  ;;  %5935 = vmatprep.subr.bf16.mxu0 %v11268_v33  ;;  %v11338_v32 = vld [vmem:[%s15349_s2 + $0x398] ss:$24 sps:$4 sm:$0xff]  }
 0x327   : > { %6064 = vmatprep.subr.bf16.mxu1 %v11271_v36  ;;  %v11341_v33 = vld [vmem:[%s15349_s2 + $0x3a0] ss:$24 sps:$4 sm:$0xff]   ;;  %v11346_v36 = vld [vmem:[%s15349_s2 + $0x3cc] ss:$24 sps:$4 sm:$0xff]  }
 0x329   : > { %5936 = vmatpush1.bf16.msra.mxu0 %v11266_v39  ;;  %v11349_v39 = vld [vmem:[%s15349_s2 + $0x3d4] ss:$24 sps:$4 sm:$0xff]  }
 0x32a   : > { %6065 = vmatpush1.bf16.msra.mxu1 %v11269_v47  ;;  %5937 = vmatprep.subr.bf16.mxu0 %v11274_v41  ;;  %v11344_v47 = vld [vmem:[%s15349_s2 + $0x3c8] ss:$24 sps:$4 sm:$0xff]  }
 0x32b   : > { %6066 = vmatprep.subr.bf16.mxu1 %v11277_v48  ;;  %v11347_v41 = vld [vmem:[%s15349_s2 + $0x3d0] ss:$24 sps:$4 sm:$0xff]   ;;  %v11352_v48 = vld [vmem:[%s15349_s2 + $0x3fc] ss:$24 sps:$4 sm:$0xff]  }
 0x32d   : > { %5938 = vmatpush1.bf16.msra.mxu0 %v11272_v49  ;;  %v11355_v49 = vld [vmem:[%s15349_s2 + $0x404] ss:$24 sps:$4 sm:$0xff]  }
 0x32e   : > { %6067 = vmatpush1.bf16.msra.mxu1 %v11275_v50  ;;  %5939 = vmatprep.subr.bf16.mxu0 %v11280_v51  ;;  %v11350_v50 = vld [vmem:[%s15349_s2 + $0x3f8] ss:$24 sps:$4 sm:$0xff]  }
 0x32f   : > { %6068 = vmatprep.subr.bf16.mxu1 %v11283_v52  ;;  %v11353_v51 = vld [vmem:[%s15349_s2 + $0x400] ss:$24 sps:$4 sm:$0xff]   ;;  %v11358_v52 = vld [vmem:[%s15349_s2 + $0x42c] ss:$24 sps:$4 sm:$0xff]  }
 0x331   : > { %5940 = vmatpush1.bf16.msra.mxu0 %v11278_v54  ;;  %v11361_v54 = vld [vmem:[%s15349_s2 + $0x434] ss:$24 sps:$4 sm:$0xff]  }
 0x332   : > { %6069 = vmatpush1.bf16.msra.mxu1 %v11281_v56  ;;  %5941 = vmatprep.subr.bf16.mxu0 %v11286_v57  ;;  %v11356_v56 = vld [vmem:[%s15349_s2 + $0x428] ss:$24 sps:$4 sm:$0xff]  }
 0x333   : > { %6070 = vmatprep.subr.bf16.mxu1 %v11289_v31  ;;  %v11359_v57 = vld [vmem:[%s15349_s2 + $0x430] ss:$24 sps:$4 sm:$0xff]   ;;  %v11364_v31 = vld [vmem:[%s15349_s2 + $0x45c] ss:$24 sps:$4 sm:$0xff]  }
 0x335   : > { %5942 = vmatpush1.bf16.msra.mxu0 %v11284_v4  ;;  %v11367_v4 = vld [vmem:[%s15349_s2 + $0x464] ss:$24 sps:$4 sm:$0xff]  }
 0x336   : > { %6071 = vmatpush1.bf16.msra.mxu1 %v11287_v58  ;;  %5943 = vmatprep.subr.bf16.mxu0 %v11292_v40  ;;  %v11362_v58 = vld [vmem:[%s15349_s2 + $0x458] ss:$24 sps:$4 sm:$0xff]  }
 0x337   : > { %6072 = vmatprep.subr.bf16.mxu1 %v11295_v61  ;;  %v11365_v40 = vld [vmem:[%s15349_s2 + $0x460] ss:$24 sps:$4 sm:$0xff]   ;;  %v11370_v61 = vld [vmem:[%s15349_s2 + $0x48c] ss:$24 sps:$4 sm:$0xff]  }
 0x339   : > { %5944 = vmatpush1.bf16.msra.mxu0 %v11290_v13  ;;  %v11373_v13 = vld [vmem:[%s15349_s2 + $0x494] ss:$24 sps:$4 sm:$0xff]  }
 0x33a   : > { %6073 = vmatpush1.bf16.msra.mxu1 %v11293_v62  ;;  %5945 = vmatprep.subr.bf16.mxu0 %v11298_v59  ;;  %v11368_v62 = vld [vmem:[%s15349_s2 + $0x488] ss:$24 sps:$4 sm:$0xff]  }
 0x33b   : > { %6074 = vmatprep.subr.bf16.mxu1 %v11301_v63  ;;  %v11371_v59 = vld [vmem:[%s15349_s2 + $0x490] ss:$24 sps:$4 sm:$0xff]   ;;  %v11376_v63 = vld [vmem:[%s15349_s2 + $0x4bc] ss:$24 sps:$4 sm:$0xff]  }
 0x33d   : > { %5946 = vmatpush1.bf16.msra.mxu0 %v11296_v1  ;;  %v11379_v1 = vld [vmem:[%s15349_s2 + $0x4c4] ss:$24 sps:$4 sm:$0xff]  }
 0x33e   : > { %6075 = vmatpush1.bf16.msra.mxu1 %v11299_v3  ;;  %5947 = vmatprep.subr.bf16.mxu0 %v11304_v9  ;;  %v11374_v3 = vld [vmem:[%s15349_s2 + $0x4b8] ss:$24 sps:$4 sm:$0xff]  }
 0x33f   : > { %6076 = vmatprep.subr.bf16.mxu1 %v11307_v5  ;;  %v11377_v9 = vld [vmem:[%s15349_s2 + $0x4c0] ss:$24 sps:$4 sm:$0xff]   ;;  %v11382_v5 = vld [vmem:[%s15349_s2 + $0x4ec] ss:$24 sps:$4 sm:$0xff]  }
 0x341   : > { %5948 = vmatpush1.bf16.msra.mxu0 %v11302_v28  ;;  %v11385_v28 = vld [vmem:[%s15349_s2 + $0x4f4] ss:$24 sps:$4 sm:$0xff]  }
 0x342   : > { %6077 = vmatpush1.bf16.msra.mxu1 %v11305_v8  ;;  %5949 = vmatprep.subr.bf16.mxu0 %v11310_v10  ;;  %v11380_v8 = vld [vmem:[%s15349_s2 + $0x4e8] ss:$24 sps:$4 sm:$0xff]  }
 0x343   : > { %6078 = vmatprep.subr.bf16.mxu1 %v11313_v34  ;;  %v11383_v10 = vld [vmem:[%s15349_s2 + $0x4f0] ss:$24 sps:$4 sm:$0xff]   ;;  %v11388_v34 = vld [vmem:[%s15349_s2 + $0x51c] ss:$24 sps:$4 sm:$0xff]  }
 0x345   : > { %5950 = vmatpush1.bf16.msra.mxu0 %v11308_v14  ;;  %v11391_v14 = vld [vmem:[%s15349_s2 + $0x524] ss:$24 sps:$4 sm:$0xff]  }
 0x346   : > { %6079 = vmatpush1.bf16.msra.mxu1 %v11311_v15  ;;  %5951 = vmatprep.subr.bf16.mxu0 %v11316_v55  ;;  %v11386_v15 = vld [vmem:[%s15349_s2 + $0x518] ss:$24 sps:$4 sm:$0xff]  }
 0x347   : > { %6080 = vmatprep.subr.bf16.mxu1 %v11319_v0  ;;  %v11389_v55 = vld [vmem:[%s15349_s2 + $0x520] ss:$24 sps:$4 sm:$0xff]   ;;  %v11394_v0 = vld [vmem:[%s15349_s2 + $0x54c] ss:$24 sps:$4 sm:$0xff]  }
 0x349   : > { %5952 = vmatpush1.bf16.msra.mxu0 %v11314_v17  ;;  %v11397_v17 = vld [vmem:[%s15349_s2 + $0x554] ss:$24 sps:$4 sm:$0xff]  }
 0x34a   : > { %6081 = vmatpush1.bf16.msra.mxu1 %v11317_v26  ;;  %5964 = vmatprep.subr.bf16.mxu0 %v11322_v18  ;;  %v11392_v26 = vld [vmem:[%s15349_s2 + $0x548] ss:$24 sps:$4 sm:$0xff]  }
 0x34b   : > { %6093 = vmatprep.subr.bf16.mxu1 %v11325_v19  ;;  %v11395_v18 = vld [vmem:[%s15349_s2 + $0x550] ss:$24 sps:$4 sm:$0xff]   ;;  %v11400_v19 = vld [vmem:[%s15349_s2 + $0x57c] ss:$24 sps:$4 sm:$0xff]  }
 0x34c   : > { %5954 = vmatmul.mubr.bf16.vlgmr.msra.gmra.mrb[28].mxu0 %v12790_v44 }
 0x34d   : > { %6083 = vmatmul.mubr.bf16.vlgmr.msra.gmra.mrb[8].mxu1 %v12790_v44  ;;  %5965 = vmatpush1.bf16.msra.mxu0 %v11320_v20  ;;  %v11337_v44 = vld [vmem:[%s15349_s2 + $0x374] ss:$24 sps:$4 sm:$0xff]   ;;  %v11403_v20 = vld [vmem:[%s15349_s2 + $0x584] ss:$24 sps:$4 sm:$0xff]  }
 0x34e   : > { %5996 = vmatprep.mubr.bf16.mxu0 %v12785_v37  ;;  %6094 = vmatpush1.bf16.msra.mxu1 %v11323_v30  ;;  %v11398_v30 = vld [vmem:[%s15349_s2 + $0x578] ss:$24 sps:$4 sm:$0xff]  }
 0x34f   : > { %6125 = vmatprep.mubr.bf16.mxu1 %v12785_v37  ;;  %5966 = vmatprep.subr.bf16.mxu0 %v11328_v21  ;;  %v11340_v37 = vld [vmem:[%s15349_s2 + $0x39c] ss:$24 sps:$4 sm:$0xff]   ;;  %v11401_v21 = vld [vmem:[%s15349_s2 + $0x580] ss:$24 sps:$4 sm:$0xff]  }
 0x350   : > { %6095 = vmatprep.subr.bf16.mxu1 %v11331_v22  ;;  %v11406_v22 = vld [vmem:[%s15349_s2 + $0x5ac] ss:$24 sps:$4 sm:$0xff]  }
 0x351   : > { %5967 = vmatpush1.bf16.msra.mxu0 %v11326_v23  ;;  %v11409_v23 = vld [vmem:[%s15349_s2 + $0x5b4] ss:$24 sps:$4 sm:$0xff]  }
 0x352   : > { %6096 = vmatpush1.bf16.msra.mxu1 %v11329_v24  ;;  %5968 = vmatprep.subr.bf16.mxu0 %v11334_v25  ;;  %v11404_v24 = vld [vmem:[%s15349_s2 + $0x5a8] ss:$24 sps:$4 sm:$0xff]  }
 0x353   : > { %6097 = vmatprep.subr.bf16.mxu1 %v11337_v44  ;;  %v11407_v25 = vld [vmem:[%s15349_s2 + $0x5b0] ss:$24 sps:$4 sm:$0xff]   ;;  %v11412_v44 = vld [vmem:[%s15349_s2 + $0x5dc] ss:$24 sps:$4 sm:$0xff]  }
 0x355   : > { %5969 = vmatpush1.bf16.msra.mxu0 %v11332_v60  ;;  %v11415_v60 = vld [vmem:[%s15349_s2 + $0x5e4] ss:$24 sps:$4 sm:$0xff]  }
 0x356   : > { %6098 = vmatpush1.bf16.msra.mxu1 %v11335_v45  ;;  %5970 = vmatprep.subr.bf16.mxu0 %v11340_v37  ;;  %v11410_v45 = vld [vmem:[%s15349_s2 + $0x5d8] ss:$24 sps:$4 sm:$0xff]  }
 0x357   : > { %6099 = vmatprep.subr.bf16.mxu1 %v11343_v42  ;;  %v11413_v37 = vld [vmem:[%s15349_s2 + $0x5e0] ss:$24 sps:$4 sm:$0xff]   ;;  %v11418_v42 = vld [vmem:[%s15349_s2 + $0x60c] ss:$24 sps:$4 sm:$0xff]  }
 0x359   : > { %5971 = vmatpush1.bf16.msra.mxu0 %v11338_v32  ;;  %v11421_v32 = vld [vmem:[%s15349_s2 + $0x614] ss:$24 sps:$4 sm:$0xff]  }
 0x35a   : > { %6100 = vmatpush1.bf16.msra.mxu1 %v11341_v33  ;;  %5972 = vmatprep.subr.bf16.mxu0 %v11346_v36  ;;  %v11416_v33 = vld [vmem:[%s15349_s2 + $0x608] ss:$24 sps:$4 sm:$0xff]  }
 0x35b   : > { %6101 = vmatprep.subr.bf16.mxu1 %v11349_v39  ;;  %v11419_v36 = vld [vmem:[%s15349_s2 + $0x610] ss:$24 sps:$4 sm:$0xff]   ;;  %v11424_v39 = vld [vmem:[%s15349_s2 + $0x63c] ss:$24 sps:$4 sm:$0xff]  }
 0x35d   : > { %5973 = vmatpush1.bf16.msra.mxu0 %v11344_v47  ;;  %v11427_v47 = vld [vmem:[%s15349_s2 + $0x644] ss:$24 sps:$4 sm:$0xff]  }
 0x35e   : > { %6102 = vmatpush1.bf16.msra.mxu1 %v11347_v41  ;;  %5974 = vmatprep.subr.bf16.mxu0 %v11352_v48  ;;  %v11422_v41 = vld [vmem:[%s15349_s2 + $0x638] ss:$24 sps:$4 sm:$0xff]  }
 0x35f   : > { %6103 = vmatprep.subr.bf16.mxu1 %v11355_v49  ;;  %v11425_v48 = vld [vmem:[%s15349_s2 + $0x640] ss:$24 sps:$4 sm:$0xff]   ;;  %v11430_v49 = vld [vmem:[%s15349_s2 + $0x66c] ss:$24 sps:$4 sm:$0xff]  }
 0x361   : > { %5975 = vmatpush1.bf16.msra.mxu0 %v11350_v50  ;;  %v11428_v50 = vld [vmem:[%s15349_s2 + $0x668] ss:$24 sps:$4 sm:$0xff]  }
 0x362   : > { %6104 = vmatpush1.bf16.msra.mxu1 %v11353_v51  ;;  %5976 = vmatprep.subr.bf16.mxu0 %v11358_v52  ;;  %v11431_v51 = vld [vmem:[%s15349_s2 + $0x670] ss:$24 sps:$4 sm:$0xff]   ;;  %v11439_v52 = vld [vmem:[%s15349_s2 + $0x6a4] ss:$24 sps:$4 sm:$0xff]  }
 0x363   : > { %6105 = vmatprep.subr.bf16.mxu1 %v11361_v54  ;;  %v11434_v54 = vld [vmem:[%s15349_s2 + $0x698] ss:$24 sps:$4 sm:$0xff]  }
 0x365   : > { %5977 = vmatpush1.bf16.msra.mxu0 %v11356_v56  ;;  %v11437_v56 = vld [vmem:[%s15349_s2 + $0x6a0] ss:$24 sps:$4 sm:$0xff]  }
 0x366   : > { %6106 = vmatpush1.bf16.msra.mxu1 %v11359_v57  ;;  %5978 = vmatprep.subr.bf16.mxu0 %v11364_v31  ;;  %v11442_v57 = vld [vmem:[%s15349_s2 + $0x6cc] ss:$24 sps:$4 sm:$0xff]  }
 0x367   : > { %6107 = vmatprep.subr.bf16.mxu1 %v11367_v4  ;;  %v11445_v31 = vld [vmem:[%s15349_s2 + $0x6d4] ss:$24 sps:$4 sm:$0xff]   ;;  %v11440_v4 = vld [vmem:[%s15349_s2 + $0x6c8] ss:$24 sps:$4 sm:$0xff]  }
 0x369   : > { %5979 = vmatpush1.bf16.msra.mxu0 %v11362_v58  ;;  %v11443_v58 = vld [vmem:[%s15349_s2 + $0x6d0] ss:$24 sps:$4 sm:$0xff]  }
 0x36a   : > { %6108 = vmatpush1.bf16.msra.mxu1 %v11365_v40  ;;  %5980 = vmatprep.subr.bf16.mxu0 %v11370_v61  ;;  %v11448_v40 = vld [vmem:[%s15349_s2 + $0x6fc] ss:$24 sps:$4 sm:$0xff]  }
 0x36b   : > { %6109 = vmatprep.subr.bf16.mxu1 %v11373_v13  ;;  %v11451_v61 = vld [vmem:[%s15349_s2 + $0x704] ss:$24 sps:$4 sm:$0xff]   ;;  %v11446_v13 = vld [vmem:[%s15349_s2 + $0x6f8] ss:$24 sps:$4 sm:$0xff]  }
 0x36d   : > { %5981 = vmatpush1.bf16.msra.mxu0 %v11368_v62  ;;  %v11449_v62 = vld [vmem:[%s15349_s2 + $0x700] ss:$24 sps:$4 sm:$0xff]  }
 0x36e   : > { %6110 = vmatpush1.bf16.msra.mxu1 %v11371_v59  ;;  %5982 = vmatprep.subr.bf16.mxu0 %v11376_v63  ;;  %v11454_v59 = vld [vmem:[%s15349_s2 + $0x72c] ss:$24 sps:$4 sm:$0xff]  }
 0x36f   : > { %6111 = vmatprep.subr.bf16.mxu1 %v11379_v1  ;;  %v11457_v63 = vld [vmem:[%s15349_s2 + $0x734] ss:$24 sps:$4 sm:$0xff]   ;;  %v11452_v1 = vld [vmem:[%s15349_s2 + $0x728] ss:$24 sps:$4 sm:$0xff]  }
 0x371   : > { %5983 = vmatpush1.bf16.msra.mxu0 %v11374_v3  ;;  %v11455_v3 = vld [vmem:[%s15349_s2 + $0x730] ss:$24 sps:$4 sm:$0xff]  }
 0x372   : > { %6112 = vmatpush1.bf16.msra.mxu1 %v11377_v9  ;;  %5984 = vmatprep.subr.bf16.mxu0 %v11382_v5  ;;  %v11460_v9 = vld [vmem:[%s15349_s2 + $0x75c] ss:$24 sps:$4 sm:$0xff]  }
 0x373   : > { %6113 = vmatprep.subr.bf16.mxu1 %v11385_v28  ;;  %v11463_v5 = vld [vmem:[%s15349_s2 + $0x764] ss:$24 sps:$4 sm:$0xff]   ;;  %v11458_v28 = vld [vmem:[%s15349_s2 + $0x758] ss:$24 sps:$4 sm:$0xff]  }
 0x375   : > { %5985 = vmatpush1.bf16.msra.mxu0 %v11380_v8  ;;  %v11461_v8 = vld [vmem:[%s15349_s2 + $0x760] ss:$24 sps:$4 sm:$0xff]  }
 0x376   : > { %6114 = vmatpush1.bf16.msra.mxu1 %v11383_v10  ;;  %5986 = vmatprep.subr.bf16.mxu0 %v11388_v34  ;;  %v11466_v10 = vld [vmem:[%s15349_s2 + $0x78c] ss:$24 sps:$4 sm:$0xff]  }
 0x377   : > { %6115 = vmatprep.subr.bf16.mxu1 %v11391_v14  ;;  %v11469_v34 = vld [vmem:[%s15349_s2 + $0x794] ss:$24 sps:$4 sm:$0xff]   ;;  %v11464_v14 = vld [vmem:[%s15349_s2 + $0x788] ss:$24 sps:$4 sm:$0xff]  }
 0x379   : > { %5987 = vmatpush1.bf16.msra.mxu0 %v11386_v15  ;;  %v11467_v15 = vld [vmem:[%s15349_s2 + $0x790] ss:$24 sps:$4 sm:$0xff]  }
 0x37a   : > { %6116 = vmatpush1.bf16.msra.mxu1 %v11389_v55  ;;  %5988 = vmatprep.subr.bf16.mxu0 %v11394_v0  ;;  %v11472_v55 = vld [vmem:[%s15349_s2 + $0x7bc] ss:$24 sps:$4 sm:$0xff]  }
 0x37b   : > { %6117 = vmatprep.subr.bf16.mxu1 %v11397_v17  ;;  %v11475_v0 = vld [vmem:[%s15349_s2 + $0x7c4] ss:$24 sps:$4 sm:$0xff]   ;;  %v11470_v17 = vld [vmem:[%s15349_s2 + $0x7b8] ss:$24 sps:$4 sm:$0xff]  }
 0x37d   : > { %5989 = vmatpush1.bf16.msra.mxu0 %v11392_v26  ;;  %v11473_v26 = vld [vmem:[%s15349_s2 + $0x7c0] ss:$24 sps:$4 sm:$0xff]  }
 0x37e   : > { %6118 = vmatpush1.bf16.msra.mxu1 %v11395_v18  ;;  %5990 = vmatprep.subr.bf16.mxu0 %v11400_v19  ;;  %v11478_v18 = vld [vmem:[%s15349_s2 + $0x7ec] ss:$24 sps:$4 sm:$0xff]  }
 0x37f   : > { %6119 = vmatprep.subr.bf16.mxu1 %v11403_v20  ;;  %v11481_v19 = vld [vmem:[%s15349_s2 + $0x7f4] ss:$24 sps:$4 sm:$0xff]   ;;  %v11476_v20 = vld [vmem:[%s15349_s2 + $0x7e8] ss:$24 sps:$4 sm:$0xff]  }
 0x381   : > { %5991 = vmatpush1.bf16.msra.mxu0 %v11398_v30  ;;  %v11479_v30 = vld [vmem:[%s15349_s2 + $0x7f0] ss:$24 sps:$4 sm:$0xff]  }
 0x382   : > { %6120 = vmatpush1.bf16.msra.mxu1 %v11401_v21  ;;  %5992 = vmatprep.subr.bf16.mxu0 %v11406_v22  ;;  %v11484_v21 = vld [vmem:[%s15349_s2 + $0x81c] ss:$24 sps:$4 sm:$0xff]  }
 0x383   : > { %6121 = vmatprep.subr.bf16.mxu1 %v11409_v23  ;;  %v11487_v22 = vld [vmem:[%s15349_s2 + $0x824] ss:$24 sps:$4 sm:$0xff]   ;;  %v11482_v23 = vld [vmem:[%s15349_s2 + $0x818] ss:$24 sps:$4 sm:$0xff]  }
 0x385   : > { %5993 = vmatpush1.bf16.msra.mxu0 %v11404_v24  ;;  %v11485_v24 = vld [vmem:[%s15349_s2 + $0x820] ss:$24 sps:$4 sm:$0xff]  }
 0x386   : > { %6122 = vmatpush1.bf16.msra.mxu1 %v11407_v25  ;;  %5994 = vmatprep.subr.bf16.mxu0 %v11412_v44  ;;  %v11490_v25 = vld [vmem:[%s15349_s2 + $0x84c] ss:$24 sps:$4 sm:$0xff]  }
 0x387   : > { %6123 = vmatprep.subr.bf16.mxu1 %v11415_v60  ;;  %v11493_v44 = vld [vmem:[%s15349_s2 + $0x854] ss:$24 sps:$4 sm:$0xff]   ;;  %v11488_v60 = vld [vmem:[%s15349_s2 + $0x848] ss:$24 sps:$4 sm:$0xff]  }
 0x389   : > { %5995 = vmatpush1.bf16.msra.mxu0 %v11410_v45  ;;  %v11491_v45 = vld [vmem:[%s15349_s2 + $0x850] ss:$24 sps:$4 sm:$0xff]  }
 0x38a   : > { %6124 = vmatpush1.bf16.msra.mxu1 %v11413_v37  ;;  %6007 = vmatprep.subr.bf16.mxu0 %v11418_v42  ;;  %v11496_v37 = vld [vmem:[%s15349_s2 + $0x87c] ss:$24 sps:$4 sm:$0xff]  }
 0x38b   : > { %6136 = vmatprep.subr.bf16.mxu1 %v11421_v32  ;;  %v11499_v42 = vld [vmem:[%s15349_s2 + $0x884] ss:$24 sps:$4 sm:$0xff]   ;;  %v11494_v32 = vld [vmem:[%s15349_s2 + $0x878] ss:$24 sps:$4 sm:$0xff]  }
 0x38c   : > { %5997 = vmatmul.mubr.bf16.vlgmr.msra.gmra.mrb[28].mxu0 %v13006_v12 }
 0x38d   : > { %6126 = vmatmul.mubr.bf16.vlgmr.msra.gmra.mrb[8].mxu1 %v13006_v12  ;;  %6008 = vmatpush1.bf16.msra.mxu0 %v11416_v33  ;;  %v11433_v12 = vld [vmem:[%s15349_s2 + $0x674] ss:$24 sps:$4 sm:$0xff]   ;;  %v11497_v33 = vld [vmem:[%s15349_s2 + $0x880] ss:$24 sps:$4 sm:$0xff]  }
 0x38e   : > { %6039 = vmatprep.mubr.bf16.mxu0 %v13016_v16  ;;  %6137 = vmatpush1.bf16.msra.mxu1 %v11419_v36  ;;  %v11502_v36 = vld [vmem:[%s15349_s2 + $0x8ac] ss:$24 sps:$4 sm:$0xff]  }
 0x38f   : > { %6168 = vmatprep.mubr.bf16.mxu1 %v13016_v16  ;;  %6009 = vmatprep.subr.bf16.mxu0 %v11424_v39  ;;  %v11436_v16 = vld [vmem:[%s15349_s2 + $0x69c] ss:$24 sps:$4 sm:$0xff]  }
 0x390   : > { %6138 = vmatprep.subr.bf16.mxu1 %v11427_v47  ;;  %v11505_v39 = vld [vmem:[%s15349_s2 + $0x8b4] ss:$24 sps:$4 sm:$0xff]   ;;  %v11500_v47 = vld [vmem:[%s15349_s2 + $0x8a8] ss:$24 sps:$4 sm:$0xff]  }
 0x391   : > { %6010 = vmatpush1.bf16.msra.mxu0 %v11422_v41  ;;  %v11503_v41 = vld [vmem:[%s15349_s2 + $0x8b0] ss:$24 sps:$4 sm:$0xff]  }
 0x392   : > { %6139 = vmatpush1.bf16.msra.mxu1 %v11425_v48  ;;  %6011 = vmatprep.subr.bf16.mxu0 %v11430_v49  ;;  %v11508_v48 = vld [vmem:[%s15349_s2 + $0x8dc] ss:$24 sps:$4 sm:$0xff]  }
 0x393   : > { %6140 = vmatprep.subr.bf16.mxu1 %v11433_v12  ;;  %v11511_v49 = vld [vmem:[%s15349_s2 + $0x8e4] ss:$24 sps:$4 sm:$0xff]   ;;  %v11506_v12 = vld [vmem:[%s15349_s2 + $0x8d8] ss:$24 sps:$4 sm:$0xff]  }
 0x395   : > { %6012 = vmatpush1.bf16.msra.mxu0 %v11428_v50  ;;  %v11509_v50 = vld [vmem:[%s15349_s2 + $0x8e0] ss:$24 sps:$4 sm:$0xff]  }
 0x396   : > { %6141 = vmatpush1.bf16.msra.mxu1 %v11431_v51  ;;  %6013 = vmatprep.subr.bf16.mxu0 %v11436_v16  ;;  %v11517_v51 = vld [vmem:[%s15349_s2 + $0x120c] ss:$24 sps:$4 sm:$0xff]  }
 0x397   : > { %6142 = vmatprep.subr.bf16.mxu1 %v11439_v52  ;;  %v11514_v16 = vld [vmem:[%s15349_s2 + $0x1204] ss:$24 sps:$4 sm:$0xff]   ;;  %v11515_v52 = vld [vmem:[%s15349_s2 + $0x1208] ss:$24 sps:$4 sm:$0xff]  }
 0x399   : > { %6014 = vmatpush1.bf16.msra.mxu0 %v11434_v54  ;;  %v11512_v54 = vld [vmem:[%s15349_s2 + $0x1200] ss:$24 sps:$4 sm:$0xff]  }
 0x39a   : > { %6143 = vmatpush1.bf16.msra.mxu1 %v11437_v56  ;;  %6015 = vmatprep.subr.bf16.mxu0 %v11442_v57  ;;  %v11520_v56 = vld [vmem:[%s15349_s2 + $0x1234] ss:$24 sps:$4 sm:$0xff]  }
 0x39b   : > { %6144 = vmatprep.subr.bf16.mxu1 %v11445_v31  ;;  %v11523_v57 = vld [vmem:[%s15349_s2 + $0x123c] ss:$24 sps:$4 sm:$0xff]   ;;  %v11521_v31 = vld [vmem:[%s15349_s2 + $0x1238] ss:$24 sps:$4 sm:$0xff]  }
 0x39d   : > { %6016 = vmatpush1.bf16.msra.mxu0 %v11440_v4  ;;  %v11518_v4 = vld [vmem:[%s15349_s2 + $0x1230] ss:$24 sps:$4 sm:$0xff]  }
 0x39e   : > { %6145 = vmatpush1.bf16.msra.mxu1 %v11443_v58  ;;  %6017 = vmatprep.subr.bf16.mxu0 %v11448_v40  ;;  %v11529_v58 = vld [vmem:[%s15349_s2 + $0x126c] ss:$24 sps:$4 sm:$0xff]   ;;  %v11527_v40 = vld [vmem:[%s15349_s2 + $0x1268] ss:$24 sps:$4 sm:$0xff]  }
 0x39f   : > { %6146 = vmatprep.subr.bf16.mxu1 %v11451_v61  ;;  %v11524_v61 = vld [vmem:[%s15349_s2 + $0x1260] ss:$24 sps:$4 sm:$0xff]  }
 0x3a1   : > { %6018 = vmatpush1.bf16.msra.mxu0 %v11446_v13  ;;  %v11535_v13 = vld [vmem:[%s15349_s2 + $0x129c] ss:$24 sps:$4 sm:$0xff]  }
 0x3a2   : > { %6147 = vmatpush1.bf16.msra.mxu1 %v11449_v62  ;;  %6019 = vmatprep.subr.bf16.mxu0 %v11454_v59  ;;  %v11532_v62 = vld [vmem:[%s15349_s2 + $0x1294] ss:$24 sps:$4 sm:$0xff]   ;;  %v11533_v59 = vld [vmem:[%s15349_s2 + $0x1298] ss:$24 sps:$4 sm:$0xff]  }
 0x3a3   : > { %6148 = vmatprep.subr.bf16.mxu1 %v11457_v63  ;;  %v11530_v63 = vld [vmem:[%s15349_s2 + $0x1290] ss:$24 sps:$4 sm:$0xff]  }
 0x3a5   : > { %6020 = vmatpush1.bf16.msra.mxu0 %v11452_v1  ;;  %v11541_v1 = vld [vmem:[%s15349_s2 + $0x12cc] ss:$24 sps:$4 sm:$0xff]  }
 0x3a6   : > { %6149 = vmatpush1.bf16.msra.mxu1 %v11455_v3  ;;  %6021 = vmatprep.subr.bf16.mxu0 %v11460_v9  ;;  %v11538_v3 = vld [vmem:[%s15349_s2 + $0x12c4] ss:$24 sps:$4 sm:$0xff]   ;;  %v11539_v9 = vld [vmem:[%s15349_s2 + $0x12c8] ss:$24 sps:$4 sm:$0xff]  }
 0x3a7   : > { %6150 = vmatprep.subr.bf16.mxu1 %v11463_v5  ;;  %v11536_v5 = vld [vmem:[%s15349_s2 + $0x12c0] ss:$24 sps:$4 sm:$0xff]  }
 0x3a9   : > { %6022 = vmatpush1.bf16.msra.mxu0 %v11458_v28  ;;  %v11547_v28 = vld [vmem:[%s15349_s2 + $0x12fc] ss:$24 sps:$4 sm:$0xff]  }
 0x3aa   : > { %6151 = vmatpush1.bf16.msra.mxu1 %v11461_v8  ;;  %6023 = vmatprep.subr.bf16.mxu0 %v11466_v10  ;;  %v11544_v8 = vld [vmem:[%s15349_s2 + $0x12f4] ss:$24 sps:$4 sm:$0xff]   ;;  %v11545_v10 = vld [vmem:[%s15349_s2 + $0x12f8] ss:$24 sps:$4 sm:$0xff]  }
 0x3ab   : > { %6152 = vmatprep.subr.bf16.mxu1 %v11469_v34  ;;  %v11542_v34 = vld [vmem:[%s15349_s2 + $0x12f0] ss:$24 sps:$4 sm:$0xff]  }
 0x3ad   : > { %6024 = vmatpush1.bf16.msra.mxu0 %v11464_v14  ;;  %v11553_v14 = vld [vmem:[%s15349_s2 + $0x132c] ss:$24 sps:$4 sm:$0xff]  }
 0x3ae   : > { %6153 = vmatpush1.bf16.msra.mxu1 %v11467_v15  ;;  %6025 = vmatprep.subr.bf16.mxu0 %v11472_v55  ;;  %v11550_v15 = vld [vmem:[%s15349_s2 + $0x1324] ss:$24 sps:$4 sm:$0xff]   ;;  %v11551_v55 = vld [vmem:[%s15349_s2 + $0x1328] ss:$24 sps:$4 sm:$0xff]  }
 0x3af   : > { %6154 = vmatprep.subr.bf16.mxu1 %v11475_v0  ;;  %v11548_v0 = vld [vmem:[%s15349_s2 + $0x1320] ss:$24 sps:$4 sm:$0xff]  }
 0x3b1   : > { %6026 = vmatpush1.bf16.msra.mxu0 %v11470_v17  ;;  %v11559_v17 = vld [vmem:[%s15349_s2 + $0x135c] ss:$24 sps:$4 sm:$0xff]  }
 0x3b2   : > { %6155 = vmatpush1.bf16.msra.mxu1 %v11473_v26  ;;  %6027 = vmatprep.subr.bf16.mxu0 %v11478_v18  ;;  %v11556_v26 = vld [vmem:[%s15349_s2 + $0x1354] ss:$24 sps:$4 sm:$0xff]   ;;  %v11557_v18 = vld [vmem:[%s15349_s2 + $0x1358] ss:$24 sps:$4 sm:$0xff]  }
 0x3b3   : > { %6156 = vmatprep.subr.bf16.mxu1 %v11481_v19  ;;  %v11554_v19 = vld [vmem:[%s15349_s2 + $0x1350] ss:$24 sps:$4 sm:$0xff]  }
 0x3b5   : > { %6028 = vmatpush1.bf16.msra.mxu0 %v11476_v20  ;;  %v11565_v20 = vld [vmem:[%s15349_s2 + $0x138c] ss:$24 sps:$4 sm:$0xff]  }
 0x3b6   : > { %6157 = vmatpush1.bf16.msra.mxu1 %v11479_v30  ;;  %6029 = vmatprep.subr.bf16.mxu0 %v11484_v21  ;;  %v11562_v30 = vld [vmem:[%s15349_s2 + $0x1384] ss:$24 sps:$4 sm:$0xff]   ;;  %v11563_v21 = vld [vmem:[%s15349_s2 + $0x1388] ss:$24 sps:$4 sm:$0xff]  }
 0x3b7   : > { %6158 = vmatprep.subr.bf16.mxu1 %v11487_v22  ;;  %v11560_v22 = vld [vmem:[%s15349_s2 + $0x1380] ss:$24 sps:$4 sm:$0xff]  }
 0x3b9   : > { %6030 = vmatpush1.bf16.msra.mxu0 %v11482_v23  ;;  %v11571_v23 = vld [vmem:[%s15349_s2 + $0x13bc] ss:$24 sps:$4 sm:$0xff]  }
 0x3ba   : > { %6159 = vmatpush1.bf16.msra.mxu1 %v11485_v24  ;;  %6031 = vmatprep.subr.bf16.mxu0 %v11490_v25  ;;  %v11568_v24 = vld [vmem:[%s15349_s2 + $0x13b4] ss:$24 sps:$4 sm:$0xff]   ;;  %v11569_v25 = vld [vmem:[%s15349_s2 + $0x13b8] ss:$24 sps:$4 sm:$0xff]  }
 0x3bb   : > { %6160 = vmatprep.subr.bf16.mxu1 %v11493_v44  ;;  %v11566_v44 = vld [vmem:[%s15349_s2 + $0x13b0] ss:$24 sps:$4 sm:$0xff]  }
 0x3bd   : > { %6032 = vmatpush1.bf16.msra.mxu0 %v11488_v60  ;;  %v11577_v60 = vld [vmem:[%s15349_s2 + $0x13ec] ss:$24 sps:$4 sm:$0xff]  }
 0x3be   : > { %6161 = vmatpush1.bf16.msra.mxu1 %v11491_v45  ;;  %6033 = vmatprep.subr.bf16.mxu0 %v11496_v37  ;;  %v11574_v45 = vld [vmem:[%s15349_s2 + $0x13e4] ss:$24 sps:$4 sm:$0xff]   ;;  %v11575_v37 = vld [vmem:[%s15349_s2 + $0x13e8] ss:$24 sps:$4 sm:$0xff]  }
 0x3bf   : > { %6162 = vmatprep.subr.bf16.mxu1 %v11499_v42  ;;  %v11572_v42 = vld [vmem:[%s15349_s2 + $0x13e0] ss:$24 sps:$4 sm:$0xff]  }
 0x3c1   : > { %6034 = vmatpush1.bf16.msra.mxu0 %v11494_v32  ;;  %v11583_v32 = vld [vmem:[%s15349_s2 + $0x141c] ss:$24 sps:$4 sm:$0xff]  }
 0x3c2   : > { %6163 = vmatpush1.bf16.msra.mxu1 %v11497_v33  ;;  %6035 = vmatprep.subr.bf16.mxu0 %v11502_v36  ;;  %v11580_v33 = vld [vmem:[%s15349_s2 + $0x1414] ss:$24 sps:$4 sm:$0xff]   ;;  %v11581_v36 = vld [vmem:[%s15349_s2 + $0x1418] ss:$24 sps:$4 sm:$0xff]  }
 0x3c3   : > { %6164 = vmatprep.subr.bf16.mxu1 %v11505_v39  ;;  %v11578_v39 = vld [vmem:[%s15349_s2 + $0x1410] ss:$24 sps:$4 sm:$0xff]  }
 0x3c5   : > { %6036 = vmatpush1.bf16.msra.mxu0 %v11500_v47  ;;  %v11589_v47 = vld [vmem:[%s15349_s2 + $0x144c] ss:$24 sps:$4 sm:$0xff]  }
 0x3c6   : > { %6165 = vmatpush1.bf16.msra.mxu1 %v11503_v41  ;;  %6037 = vmatprep.subr.bf16.mxu0 %v11508_v48  ;;  %v11586_v41 = vld [vmem:[%s15349_s2 + $0x1444] ss:$24 sps:$4 sm:$0xff]   ;;  %v11587_v48 = vld [vmem:[%s15349_s2 + $0x1448] ss:$24 sps:$4 sm:$0xff]  }
 0x3c7   : > { %6166 = vmatprep.subr.bf16.mxu1 %v11511_v49  ;;  %v11584_v49 = vld [vmem:[%s15349_s2 + $0x1440] ss:$24 sps:$4 sm:$0xff]  }
 0x3c9   : > { %6038 = vmatpush1.bf16.msra.mxu0 %v11506_v12  ;;  %v11595_v12 = vld [vmem:[%s15349_s2 + $0x147c] ss:$24 sps:$4 sm:$0xff]  }
 0x3ca   : > { %6167 = vmatpush1.bf16.msra.mxu1 %v11509_v50  ;;  %8079 = vmatprep.subr.bf16.mxu0 %v11517_v51  ;;  %v11592_v50 = vld [vmem:[%s15349_s2 + $0x1474] ss:$24 sps:$4 sm:$0xff]   ;;  %v11593_v51 = vld [vmem:[%s15349_s2 + $0x1478] ss:$24 sps:$4 sm:$0xff]  }
 0x3cb   : > { %7950 = vmatprep.subr.bf16.mxu1 %v11514_v16  ;;  %v11590_v16 = vld [vmem:[%s15349_s2 + $0x1470] ss:$24 sps:$4 sm:$0xff]  }
 0x3cc   : > { %6040 = vmatmul.mubr.bf16.vlgmr.msra.gmra.mrb[28].mxu0 %v13219_v53 }
 0x3cd   : > { %6169 = vmatmul.mubr.bf16.vlgmr.msra.gmra.mrb[8].mxu1 %v13219_v53  ;;  %8080 = vmatpush1.bf16.msra.mxu0 %v11515_v52  ;;  %v11526_v53 = vld [vmem:[%s15349_s2 + $0x1264] ss:$24 sps:$4 sm:$0xff]  }
 0x3ce   : > { %7951 = vmatpush1.bf16.msra.mxu1 %v11512_v54  ;;  %7982 = vmatprep.mubr.bf16.mxu1 %v12828_v35  ;;  %v11601_v52 = vld [vmem:[%s15349_s2 + $0x14ac] ss:$24 sps:$4 sm:$0xff]  }
 0x3cf   : > { %8111 = vmatprep.mubr.bf16.mxu0 %v12828_v35  ;;  %7952 = vmatprep.subr.bf16.mxu1 %v11520_v56  ;;  %v11598_v54 = vld [vmem:[%s15349_s2 + $0x14a4] ss:$24 sps:$4 sm:$0xff]   ;;  %v11599_v56 = vld [vmem:[%s15349_s2 + $0x14a8] ss:$24 sps:$4 sm:$0xff]  }
 0x3d0   : > { %8081 = vmatprep.subr.bf16.mxu0 %v11523_v57  ;;  %v11596_v57 = vld [vmem:[%s15349_s2 + $0x14a0] ss:$24 sps:$4 sm:$0xff]  }
 0x3d1   : > { %8082 = vmatpush1.bf16.msra.mxu0 %v11521_v31  ;;  %v11607_v31 = vld [vmem:[%s15349_s2 + $0x14dc] ss:$24 sps:$4 sm:$0xff]  }
 0x3d2   : > { %7953 = vmatpush1.bf16.msra.mxu1 %v11518_v4  ;;  %8083 = vmatprep.subr.bf16.mxu0 %v11529_v58  ;;  %v11604_v4 = vld [vmem:[%s15349_s2 + $0x14d4] ss:$24 sps:$4 sm:$0xff]   ;;  %v11605_v58 = vld [vmem:[%s15349_s2 + $0x14d8] ss:$24 sps:$4 sm:$0xff]  }
 0x3d3   : > { %7954 = vmatprep.subr.bf16.mxu1 %v11526_v53  ;;  %v11602_v53 = vld [vmem:[%s15349_s2 + $0x14d0] ss:$24 sps:$4 sm:$0xff]  }
 0x3d5   : > { %8084 = vmatpush1.bf16.msra.mxu0 %v11527_v40  ;;  %v11613_v40 = vld [vmem:[%s15349_s2 + $0x150c] ss:$24 sps:$4 sm:$0xff]  }
 0x3d6   : > { %7955 = vmatpush1.bf16.msra.mxu1 %v11524_v61  ;;  %8085 = vmatprep.subr.bf16.mxu0 %v11535_v13  ;;  %v11610_v61 = vld [vmem:[%s15349_s2 + $0x1504] ss:$24 sps:$4 sm:$0xff]   ;;  %v11611_v13 = vld [vmem:[%s15349_s2 + $0x1508] ss:$24 sps:$4 sm:$0xff]  }
 0x3d7   : > { %7956 = vmatprep.subr.bf16.mxu1 %v11532_v62  ;;  %v11608_v62 = vld [vmem:[%s15349_s2 + $0x1500] ss:$24 sps:$4 sm:$0xff]  }
 0x3d9   : > { %8086 = vmatpush1.bf16.msra.mxu0 %v11533_v59  ;;  %v11616_v59 = vld [vmem:[%s15349_s2 + $0x1534] ss:$24 sps:$4 sm:$0xff]  }
 0x3da   : > { %7957 = vmatpush1.bf16.msra.mxu1 %v11530_v63  ;;  %8087 = vmatprep.subr.bf16.mxu0 %v11541_v1  ;;  %v11619_v63 = vld [vmem:[%s15349_s2 + $0x153c] ss:$24 sps:$4 sm:$0xff]   ;;  %v11617_v1 = vld [vmem:[%s15349_s2 + $0x1538] ss:$24 sps:$4 sm:$0xff]  }
 0x3db   : > { %7958 = vmatprep.subr.bf16.mxu1 %v11538_v3  ;;  %v11614_v3 = vld [vmem:[%s15349_s2 + $0x1530] ss:$24 sps:$4 sm:$0xff]  }
 0x3dd   : > { %8088 = vmatpush1.bf16.msra.mxu0 %v11539_v9  ;;  %v11625_v9 = vld [vmem:[%s15349_s2 + $0x156c] ss:$24 sps:$4 sm:$0xff]  }
 0x3de   : > { %7959 = vmatpush1.bf16.msra.mxu1 %v11536_v5  ;;  %8089 = vmatprep.subr.bf16.mxu0 %v11547_v28  ;;  %v11622_v5 = vld [vmem:[%s15349_s2 + $0x1564] ss:$24 sps:$4 sm:$0xff]   ;;  %v11623_v28 = vld [vmem:[%s15349_s2 + $0x1568] ss:$24 sps:$4 sm:$0xff]  }
 0x3df   : > { %7960 = vmatprep.subr.bf16.mxu1 %v11544_v8  ;;  %v11620_v8 = vld [vmem:[%s15349_s2 + $0x1560] ss:$24 sps:$4 sm:$0xff]  }
 0x3e1   : > { %8090 = vmatpush1.bf16.msra.mxu0 %v11545_v10  ;;  %v11631_v10 = vld [vmem:[%s15349_s2 + $0x159c] ss:$24 sps:$4 sm:$0xff]  }
 0x3e2   : > { %7961 = vmatpush1.bf16.msra.mxu1 %v11542_v34  ;;  %8091 = vmatprep.subr.bf16.mxu0 %v11553_v14  ;;  %v11628_v34 = vld [vmem:[%s15349_s2 + $0x1594] ss:$24 sps:$4 sm:$0xff]   ;;  %v11629_v14 = vld [vmem:[%s15349_s2 + $0x1598] ss:$24 sps:$4 sm:$0xff]  }
 0x3e3   : > { %7962 = vmatprep.subr.bf16.mxu1 %v11550_v15  ;;  %v11626_v15 = vld [vmem:[%s15349_s2 + $0x1590] ss:$24 sps:$4 sm:$0xff]  }
 0x3e5   : > { %8092 = vmatpush1.bf16.msra.mxu0 %v11551_v55  ;;  %v11637_v55 = vld [vmem:[%s15349_s2 + $0x15cc] ss:$24 sps:$4 sm:$0xff]  }
 0x3e6   : > { %7963 = vmatpush1.bf16.msra.mxu1 %v11548_v0  ;;  %8093 = vmatprep.subr.bf16.mxu0 %v11559_v17  ;;  %v11634_v0 = vld [vmem:[%s15349_s2 + $0x15c4] ss:$24 sps:$4 sm:$0xff]   ;;  %v11635_v17 = vld [vmem:[%s15349_s2 + $0x15c8] ss:$24 sps:$4 sm:$0xff]  }
 0x3e7   : > { %7964 = vmatprep.subr.bf16.mxu1 %v11556_v26  ;;  %v11632_v26 = vld [vmem:[%s15349_s2 + $0x15c0] ss:$24 sps:$4 sm:$0xff]  }
 0x3e9   : > { %8094 = vmatpush1.bf16.msra.mxu0 %v11557_v18  ;;  %v11643_v18 = vld [vmem:[%s15349_s2 + $0x15fc] ss:$24 sps:$4 sm:$0xff]  }
 0x3ea   : > { %7965 = vmatpush1.bf16.msra.mxu1 %v11554_v19  ;;  %8095 = vmatprep.subr.bf16.mxu0 %v11565_v20  ;;  %v11640_v19 = vld [vmem:[%s15349_s2 + $0x15f4] ss:$24 sps:$4 sm:$0xff]   ;;  %v11641_v20 = vld [vmem:[%s15349_s2 + $0x15f8] ss:$24 sps:$4 sm:$0xff]  }
 0x3eb   : > { %7966 = vmatprep.subr.bf16.mxu1 %v11562_v30  ;;  %v11638_v30 = vld [vmem:[%s15349_s2 + $0x15f0] ss:$24 sps:$4 sm:$0xff]  }
 0x3ed   : > { %8096 = vmatpush1.bf16.msra.mxu0 %v11563_v21  ;;  %v11649_v21 = vld [vmem:[%s15349_s2 + $0x162c] ss:$24 sps:$4 sm:$0xff]  }
 0x3ee   : > { %7967 = vmatpush1.bf16.msra.mxu1 %v11560_v22  ;;  %8097 = vmatprep.subr.bf16.mxu0 %v11571_v23  ;;  %v11646_v22 = vld [vmem:[%s15349_s2 + $0x1624] ss:$24 sps:$4 sm:$0xff]   ;;  %v11647_v23 = vld [vmem:[%s15349_s2 + $0x1628] ss:$24 sps:$4 sm:$0xff]  }
 0x3ef   : > { %7968 = vmatprep.subr.bf16.mxu1 %v11568_v24  ;;  %v11644_v24 = vld [vmem:[%s15349_s2 + $0x1620] ss:$24 sps:$4 sm:$0xff]  }
 0x3f1   : > { %8098 = vmatpush1.bf16.msra.mxu0 %v11569_v25  ;;  %v11655_v25 = vld [vmem:[%s15349_s2 + $0x165c] ss:$24 sps:$4 sm:$0xff]  }
 0x3f2   : > { %7969 = vmatpush1.bf16.msra.mxu1 %v11566_v44  ;;  %8099 = vmatprep.subr.bf16.mxu0 %v11577_v60  ;;  %v11652_v44 = vld [vmem:[%s15349_s2 + $0x1654] ss:$24 sps:$4 sm:$0xff]   ;;  %v11653_v60 = vld [vmem:[%s15349_s2 + $0x1658] ss:$24 sps:$4 sm:$0xff]  }
 0x3f3   : > { %7970 = vmatprep.subr.bf16.mxu1 %v11574_v45  ;;  %v11650_v45 = vld [vmem:[%s15349_s2 + $0x1650] ss:$24 sps:$4 sm:$0xff]  }
 0x3f5   : > { %8100 = vmatpush1.bf16.msra.mxu0 %v11575_v37  ;;  %v11661_v37 = vld [vmem:[%s15349_s2 + $0x168c] ss:$24 sps:$4 sm:$0xff]  }
 0x3f6   : > { %7971 = vmatpush1.bf16.msra.mxu1 %v11572_v42  ;;  %8101 = vmatprep.subr.bf16.mxu0 %v11583_v32  ;;  %v11658_v42 = vld [vmem:[%s15349_s2 + $0x1684] ss:$24 sps:$4 sm:$0xff]   ;;  %v11659_v32 = vld [vmem:[%s15349_s2 + $0x1688] ss:$24 sps:$4 sm:$0xff]  }
 0x3f7   : > { %7972 = vmatprep.subr.bf16.mxu1 %v11580_v33  ;;  %v11656_v33 = vld [vmem:[%s15349_s2 + $0x1680] ss:$24 sps:$4 sm:$0xff]  }
 0x3f9   : > { %8102 = vmatpush1.bf16.msra.mxu0 %v11581_v36  ;;  %v11667_v36 = vld [vmem:[%s15349_s2 + $0x16bc] ss:$24 sps:$4 sm:$0xff]  }
 0x3fa   : > { %7973 = vmatpush1.bf16.msra.mxu1 %v11578_v39  ;;  %8103 = vmatprep.subr.bf16.mxu0 %v11589_v47  ;;  %v11664_v39 = vld [vmem:[%s15349_s2 + $0x16b4] ss:$24 sps:$4 sm:$0xff]   ;;  %v11665_v47 = vld [vmem:[%s15349_s2 + $0x16b8] ss:$24 sps:$4 sm:$0xff]  }
 0x3fb   : > { %7974 = vmatprep.subr.bf16.mxu1 %v11586_v41  ;;  %v11662_v41 = vld [vmem:[%s15349_s2 + $0x16b0] ss:$24 sps:$4 sm:$0xff]  }
 0x3fd   : > { %8104 = vmatpush1.bf16.msra.mxu0 %v11587_v48  ;;  %v11673_v48 = vld [vmem:[%s15349_s2 + $0x16ec] ss:$24 sps:$4 sm:$0xff]  }
 0x3fe   : > { %7975 = vmatpush1.bf16.msra.mxu1 %v11584_v49  ;;  %8105 = vmatprep.subr.bf16.mxu0 %v11595_v12  ;;  %v11670_v49 = vld [vmem:[%s15349_s2 + $0x16e4] ss:$24 sps:$4 sm:$0xff]   ;;  %v11671_v12 = vld [vmem:[%s15349_s2 + $0x16e8] ss:$24 sps:$4 sm:$0xff]  }
 0x3ff   : > { %7976 = vmatprep.subr.bf16.mxu1 %v11592_v50  ;;  %v11668_v50 = vld [vmem:[%s15349_s2 + $0x16e0] ss:$24 sps:$4 sm:$0xff]  }
 0x401   : > { %8106 = vmatpush1.bf16.msra.mxu0 %v11593_v51  ;;  %v11679_v51 = vld [vmem:[%s15349_s2 + $0x171c] ss:$24 sps:$4 sm:$0xff]  }
 0x402   : > { %7977 = vmatpush1.bf16.msra.mxu1 %v11590_v16  ;;  %8107 = vmatprep.subr.bf16.mxu0 %v11601_v52  ;;  %v11676_v16 = vld [vmem:[%s15349_s2 + $0x1714] ss:$24 sps:$4 sm:$0xff]   ;;  %v11677_v52 = vld [vmem:[%s15349_s2 + $0x1718] ss:$24 sps:$4 sm:$0xff]  }
 0x403   : > { %7978 = vmatprep.subr.bf16.mxu1 %v11598_v54  ;;  %v11674_v54 = vld [vmem:[%s15349_s2 + $0x1710] ss:$24 sps:$4 sm:$0xff]  }
 0x405   : > { %8108 = vmatpush1.bf16.msra.mxu0 %v11599_v56  ;;  %v11685_v56 = vld [vmem:[%s15349_s2 + $0x174c] ss:$24 sps:$4 sm:$0xff]  }
 0x406   : > { %7979 = vmatpush1.bf16.msra.mxu1 %v11596_v57  ;;  %8109 = vmatprep.subr.bf16.mxu0 %v11607_v31  ;;  %v11682_v57 = vld [vmem:[%s15349_s2 + $0x1744] ss:$24 sps:$4 sm:$0xff]   ;;  %v11683_v31 = vld [vmem:[%s15349_s2 + $0x1748] ss:$24 sps:$4 sm:$0xff]  }
 0x407   : > { %7980 = vmatprep.subr.bf16.mxu1 %v11604_v4  ;;  %v11680_v4 = vld [vmem:[%s15349_s2 + $0x1740] ss:$24 sps:$4 sm:$0xff]  }
 0x409   : > { %8110 = vmatpush1.bf16.msra.mxu0 %v11605_v58  ;;  %v11691_v58 = vld [vmem:[%s15349_s2 + $0x177c] ss:$24 sps:$4 sm:$0xff]  }
 0x40a   : > { %7981 = vmatpush1.bf16.msra.mxu1 %v11602_v53  ;;  %8122 = vmatprep.subr.bf16.mxu0 %v11613_v40  ;;  %v11688_v53 = vld [vmem:[%s15349_s2 + $0x1774] ss:$24 sps:$4 sm:$0xff]   ;;  %v11689_v40 = vld [vmem:[%s15349_s2 + $0x1778] ss:$24 sps:$4 sm:$0xff]  }
 0x40b   : > { %7993 = vmatprep.subr.bf16.mxu1 %v11610_v61  ;;  %v11686_v61 = vld [vmem:[%s15349_s2 + $0x1770] ss:$24 sps:$4 sm:$0xff]  }
 0x40c   : > { %8112 = vmatmul.mubr.bf16.vlgmr.msra.gmra.mrb[28].mxu0 %v12831_v38 }
 0x40d   : > { %7983 = vmatmul.mubr.bf16.vlgmr.msra.gmra.mrb[12].mxu1 %v12831_v38  ;;  %8123 = vmatpush1.bf16.msra.mxu0 %v11611_v13  ;;  %v11697_v13 = vld [vmem:[%s15349_s2 + $0x17ac] ss:$24 sps:$4 sm:$0xff]  }
 0x40e   : > { %7994 = vmatpush1.bf16.msra.mxu1 %v11608_v62  ;;  %8025 = vmatprep.mubr.bf16.mxu1 %v12774_v6  ;;  %v11694_v62 = vld [vmem:[%s15349_s2 + $0x17a4] ss:$24 sps:$4 sm:$0xff]  }
 0x40f   : > { %8154 = vmatprep.mubr.bf16.mxu0 %v12774_v6  ;;  %7995 = vmatprep.subr.bf16.mxu1 %v11616_v59  ;;  %v11695_v59 = vld [vmem:[%s15349_s2 + $0x17a8] ss:$24 sps:$4 sm:$0xff]  }
 0x410   : > { %8124 = vmatprep.subr.bf16.mxu0 %v11619_v63  ;;  %v11692_v63 = vld [vmem:[%s15349_s2 + $0x17a0] ss:$24 sps:$4 sm:$0xff]  }
 0x411   : > { %8125 = vmatpush1.bf16.msra.mxu0 %v11617_v1  ;;  %v11703_v1 = vld [vmem:[%s15349_s2 + $0x17dc] ss:$24 sps:$4 sm:$0xff]  }
 0x412   : > { %7996 = vmatpush1.bf16.msra.mxu1 %v11614_v3  ;;  %8126 = vmatprep.subr.bf16.mxu0 %v11625_v9  ;;  %v11700_v3 = vld [vmem:[%s15349_s2 + $0x17d4] ss:$24 sps:$4 sm:$0xff]   ;;  %v11701_v9 = vld [vmem:[%s15349_s2 + $0x17d8] ss:$24 sps:$4 sm:$0xff]  }
 0x413   : > { %7997 = vmatprep.subr.bf16.mxu1 %v11622_v5  ;;  %v11698_v5 = vld [vmem:[%s15349_s2 + $0x17d0] ss:$24 sps:$4 sm:$0xff]  }
 0x415   : > { %8127 = vmatpush1.bf16.msra.mxu0 %v11623_v28  ;;  %v11709_v28 = vld [vmem:[%s15349_s2 + $0x180c] ss:$24 sps:$4 sm:$0xff]  }
 0x416   : > { %7998 = vmatpush1.bf16.msra.mxu1 %v11620_v8  ;;  %8128 = vmatprep.subr.bf16.mxu0 %v11631_v10  ;;  %v11706_v8 = vld [vmem:[%s15349_s2 + $0x1804] ss:$24 sps:$4 sm:$0xff]   ;;  %v11707_v10 = vld [vmem:[%s15349_s2 + $0x1808] ss:$24 sps:$4 sm:$0xff]  }
 0x417   : > { %7999 = vmatprep.subr.bf16.mxu1 %v11628_v34  ;;  %v11704_v34 = vld [vmem:[%s15349_s2 + $0x1800] ss:$24 sps:$4 sm:$0xff]  }
 0x419   : > { %8129 = vmatpush1.bf16.msra.mxu0 %v11629_v14  ;;  %v11712_v14 = vld [vmem:[%s15349_s2 + $0x1834] ss:$24 sps:$4 sm:$0xff]  }
 0x41a   : > { %8000 = vmatpush1.bf16.msra.mxu1 %v11626_v15  ;;  %8130 = vmatprep.subr.bf16.mxu0 %v11637_v55  ;;  %v11715_v15 = vld [vmem:[%s15349_s2 + $0x183c] ss:$24 sps:$4 sm:$0xff]   ;;  %v11713_v55 = vld [vmem:[%s15349_s2 + $0x1838] ss:$24 sps:$4 sm:$0xff]  }
 0x41b   : > { %8001 = vmatprep.subr.bf16.mxu1 %v11634_v0  ;;  %v11710_v0 = vld [vmem:[%s15349_s2 + $0x1830] ss:$24 sps:$4 sm:$0xff]  }
 0x41d   : > { %8131 = vmatpush1.bf16.msra.mxu0 %v11635_v17  ;;  %v11721_v17 = vld [vmem:[%s15349_s2 + $0x186c] ss:$24 sps:$4 sm:$0xff]  }
 0x41e   : > { %8002 = vmatpush1.bf16.msra.mxu1 %v11632_v26  ;;  %8132 = vmatprep.subr.bf16.mxu0 %v11643_v18  ;;  %v11718_v26 = vld [vmem:[%s15349_s2 + $0x1864] ss:$24 sps:$4 sm:$0xff]   ;;  %v11719_v18 = vld [vmem:[%s15349_s2 + $0x1868] ss:$24 sps:$4 sm:$0xff]  }
 0x41f   : > { %8003 = vmatprep.subr.bf16.mxu1 %v11640_v19  ;;  %v11716_v19 = vld [vmem:[%s15349_s2 + $0x1860] ss:$24 sps:$4 sm:$0xff]  }
 0x421   : > { %8133 = vmatpush1.bf16.msra.mxu0 %v11641_v20  ;;  %v11727_v20 = vld [vmem:[%s15349_s2 + $0x189c] ss:$24 sps:$4 sm:$0xff]  }
 0x422   : > { %8004 = vmatpush1.bf16.msra.mxu1 %v11638_v30  ;;  %8134 = vmatprep.subr.bf16.mxu0 %v11649_v21  ;;  %v11724_v30 = vld [vmem:[%s15349_s2 + $0x1894] ss:$24 sps:$4 sm:$0xff]   ;;  %v11725_v21 = vld [vmem:[%s15349_s2 + $0x1898] ss:$24 sps:$4 sm:$0xff]  }
 0x423   : > { %8005 = vmatprep.subr.bf16.mxu1 %v11646_v22  ;;  %v11722_v22 = vld [vmem:[%s15349_s2 + $0x1890] ss:$24 sps:$4 sm:$0xff]  }
 0x425   : > { %8135 = vmatpush1.bf16.msra.mxu0 %v11647_v23  ;;  %v11733_v23 = vld [vmem:[%s15349_s2 + $0x18cc] ss:$24 sps:$4 sm:$0xff]  }
 0x426   : > { %8006 = vmatpush1.bf16.msra.mxu1 %v11644_v24  ;;  %8136 = vmatprep.subr.bf16.mxu0 %v11655_v25  ;;  %v11730_v24 = vld [vmem:[%s15349_s2 + $0x18c4] ss:$24 sps:$4 sm:$0xff]   ;;  %v11731_v25 = vld [vmem:[%s15349_s2 + $0x18c8] ss:$24 sps:$4 sm:$0xff]  }
 0x427   : > { %8007 = vmatprep.subr.bf16.mxu1 %v11652_v44  ;;  %v11728_v44 = vld [vmem:[%s15349_s2 + $0x18c0] ss:$24 sps:$4 sm:$0xff]  }
 0x429   : > { %8137 = vmatpush1.bf16.msra.mxu0 %v11653_v60  ;;  %v11739_v60 = vld [vmem:[%s15349_s2 + $0x18fc] ss:$24 sps:$4 sm:$0xff]  }
 0x42a   : > { %8008 = vmatpush1.bf16.msra.mxu1 %v11650_v45  ;;  %8138 = vmatprep.subr.bf16.mxu0 %v11661_v37  ;;  %v11736_v45 = vld [vmem:[%s15349_s2 + $0x18f4] ss:$24 sps:$4 sm:$0xff]   ;;  %v11737_v37 = vld [vmem:[%s15349_s2 + $0x18f8] ss:$24 sps:$4 sm:$0xff]  }
 0x42b   : > { %8009 = vmatprep.subr.bf16.mxu1 %v11658_v42  ;;  %v11734_v42 = vld [vmem:[%s15349_s2 + $0x18f0] ss:$24 sps:$4 sm:$0xff]  }
 0x42d   : > { %8139 = vmatpush1.bf16.msra.mxu0 %v11659_v32  ;;  %v11745_v32 = vld [vmem:[%s15349_s2 + $0x192c] ss:$24 sps:$4 sm:$0xff]  }
 0x42e   : > { %8010 = vmatpush1.bf16.msra.mxu1 %v11656_v33  ;;  %8140 = vmatprep.subr.bf16.mxu0 %v11667_v36  ;;  %v11742_v33 = vld [vmem:[%s15349_s2 + $0x1924] ss:$24 sps:$4 sm:$0xff]   ;;  %v11743_v36 = vld [vmem:[%s15349_s2 + $0x1928] ss:$24 sps:$4 sm:$0xff]  }
 0x42f   : > { %8011 = vmatprep.subr.bf16.mxu1 %v11664_v39  ;;  %v11740_v39 = vld [vmem:[%s15349_s2 + $0x1920] ss:$24 sps:$4 sm:$0xff]  }
 0x431   : > { %8141 = vmatpush1.bf16.msra.mxu0 %v11665_v47  ;;  %v11751_v47 = vld [vmem:[%s15349_s2 + $0x195c] ss:$24 sps:$4 sm:$0xff]  }
 0x432   : > { %8012 = vmatpush1.bf16.msra.mxu1 %v11662_v41  ;;  %8142 = vmatprep.subr.bf16.mxu0 %v11673_v48  ;;  %v11748_v41 = vld [vmem:[%s15349_s2 + $0x1954] ss:$24 sps:$4 sm:$0xff]   ;;  %v11749_v48 = vld [vmem:[%s15349_s2 + $0x1958] ss:$24 sps:$4 sm:$0xff]  }
 0x433   : > { %8013 = vmatprep.subr.bf16.mxu1 %v11670_v49  ;;  %v11746_v49 = vld [vmem:[%s15349_s2 + $0x1950] ss:$24 sps:$4 sm:$0xff]  }
 0x435   : > { %8143 = vmatpush1.bf16.msra.mxu0 %v11671_v12  ;;  %v11757_v12 = vld [vmem:[%s15349_s2 + $0x198c] ss:$24 sps:$4 sm:$0xff]  }
 0x436   : > { %8014 = vmatpush1.bf16.msra.mxu1 %v11668_v50  ;;  %8144 = vmatprep.subr.bf16.mxu0 %v11679_v51  ;;  %v11754_v50 = vld [vmem:[%s15349_s2 + $0x1984] ss:$24 sps:$4 sm:$0xff]   ;;  %v11755_v51 = vld [vmem:[%s15349_s2 + $0x1988] ss:$24 sps:$4 sm:$0xff]  }
 0x437   : > { %8015 = vmatprep.subr.bf16.mxu1 %v11676_v16  ;;  %v11752_v16 = vld [vmem:[%s15349_s2 + $0x1980] ss:$24 sps:$4 sm:$0xff]  }
 0x439   : > { %8145 = vmatpush1.bf16.msra.mxu0 %v11677_v52  ;;  %v11763_v52 = vld [vmem:[%s15349_s2 + $0x19bc] ss:$24 sps:$4 sm:$0xff]  }
 0x43a   : > { %8016 = vmatpush1.bf16.msra.mxu1 %v11674_v54  ;;  %8146 = vmatprep.subr.bf16.mxu0 %v11685_v56  ;;  %v11760_v54 = vld [vmem:[%s15349_s2 + $0x19b4] ss:$24 sps:$4 sm:$0xff]   ;;  %v11761_v56 = vld [vmem:[%s15349_s2 + $0x19b8] ss:$24 sps:$4 sm:$0xff]  }
 0x43b   : > { %8017 = vmatprep.subr.bf16.mxu1 %v11682_v57  ;;  %v11758_v57 = vld [vmem:[%s15349_s2 + $0x19b0] ss:$24 sps:$4 sm:$0xff]  }
 0x43d   : > { %8147 = vmatpush1.bf16.msra.mxu0 %v11683_v31  ;;  %v11769_v31 = vld [vmem:[%s15349_s2 + $0x19ec] ss:$24 sps:$4 sm:$0xff]  }
 0x43e   : > { %8018 = vmatpush1.bf16.msra.mxu1 %v11680_v4  ;;  %8148 = vmatprep.subr.bf16.mxu0 %v11691_v58  ;;  %v11766_v4 = vld [vmem:[%s15349_s2 + $0x19e4] ss:$24 sps:$4 sm:$0xff]   ;;  %v11767_v58 = vld [vmem:[%s15349_s2 + $0x19e8] ss:$24 sps:$4 sm:$0xff]  }
 0x43f   : > { %8019 = vmatprep.subr.bf16.mxu1 %v11688_v53  ;;  %v11764_v53 = vld [vmem:[%s15349_s2 + $0x19e0] ss:$24 sps:$4 sm:$0xff]  }
 0x441   : > { %8149 = vmatpush1.bf16.msra.mxu0 %v11689_v40  ;;  %v11775_v40 = vld [vmem:[%s15349_s2 + $0x1a1c] ss:$24 sps:$4 sm:$0xff]  }
 0x442   : > { %8020 = vmatpush1.bf16.msra.mxu1 %v11686_v61  ;;  %8150 = vmatprep.subr.bf16.mxu0 %v11697_v13  ;;  %v11772_v61 = vld [vmem:[%s15349_s2 + $0x1a14] ss:$24 sps:$4 sm:$0xff]   ;;  %v11773_v13 = vld [vmem:[%s15349_s2 + $0x1a18] ss:$24 sps:$4 sm:$0xff]  }
 0x443   : > { %8021 = vmatprep.subr.bf16.mxu1 %v11694_v62  ;;  %v11770_v62 = vld [vmem:[%s15349_s2 + $0x1a10] ss:$24 sps:$4 sm:$0xff]  }
 0x445   : > { %8151 = vmatpush1.bf16.msra.mxu0 %v11695_v59  ;;  %v11781_v59 = vld [vmem:[%s15349_s2 + $0x1a4c] ss:$24 sps:$4 sm:$0xff]  }
 0x446   : > { %8022 = vmatpush1.bf16.msra.mxu1 %v11692_v63  ;;  %8152 = vmatprep.subr.bf16.mxu0 %v11703_v1  ;;  %v11778_v63 = vld [vmem:[%s15349_s2 + $0x1a44] ss:$24 sps:$4 sm:$0xff]   ;;  %v11779_v1 = vld [vmem:[%s15349_s2 + $0x1a48] ss:$24 sps:$4 sm:$0xff]  }
 0x447   : > { %8023 = vmatprep.subr.bf16.mxu1 %v11700_v3  ;;  %v11776_v3 = vld [vmem:[%s15349_s2 + $0x1a40] ss:$24 sps:$4 sm:$0xff]  }
 0x449   : > { %8153 = vmatpush1.bf16.msra.mxu0 %v11701_v9  ;;  %v11787_v9 = vld [vmem:[%s15349_s2 + $0x1a7c] ss:$24 sps:$4 sm:$0xff]  }
 0x44a   : > { %8024 = vmatpush1.bf16.msra.mxu1 %v11698_v5  ;;  %8165 = vmatprep.subr.bf16.mxu0 %v11709_v28  ;;  %v11784_v5 = vld [vmem:[%s15349_s2 + $0x1a74] ss:$24 sps:$4 sm:$0xff]   ;;  %v11785_v28 = vld [vmem:[%s15349_s2 + $0x1a78] ss:$24 sps:$4 sm:$0xff]  }
 0x44b   : > { %8036 = vmatprep.subr.bf16.mxu1 %v11706_v8  ;;  %v11782_v8 = vld [vmem:[%s15349_s2 + $0x1a70] ss:$24 sps:$4 sm:$0xff]  }
 0x44c   : > { %8155 = vmatmul.mubr.bf16.vlgmr.msra.gmra.mrb[28].mxu0 %v12777_v7 }
 0x44d   : > { %8026 = vmatmul.mubr.bf16.vlgmr.msra.gmra.mrb[12].mxu1 %v12777_v7  ;;  %8166 = vmatpush1.bf16.msra.mxu0 %v11707_v10  ;;  %v11793_v10 = vld [vmem:[%s15349_s2 + $0x1aac] ss:$24 sps:$4 sm:$0xff]  }
 0x44e   : > { %8037 = vmatpush1.bf16.msra.mxu1 %v11704_v34  ;;  %8068 = vmatprep.mubr.bf16.mxu1 %v12938_v43  ;;  %v11790_v34 = vld [vmem:[%s15349_s2 + $0x1aa4] ss:$24 sps:$4 sm:$0xff]  }
 0x44f   : > { %8197 = vmatprep.mubr.bf16.mxu0 %v12938_v43  ;;  %8038 = vmatprep.subr.bf16.mxu1 %v11712_v14  ;;  %v11791_v14 = vld [vmem:[%s15349_s2 + $0x1aa8] ss:$24 sps:$4 sm:$0xff]  }
 0x450   : > { %8167 = vmatprep.subr.bf16.mxu0 %v11715_v15  ;;  %v11788_v15 = vld [vmem:[%s15349_s2 + $0x1aa0] ss:$24 sps:$4 sm:$0xff]  }
 0x451   : > { %8168 = vmatpush1.bf16.msra.mxu0 %v11713_v55  ;;  %v11799_v55 = vld [vmem:[%s15349_s2 + $0x1adc] ss:$24 sps:$4 sm:$0xff]  }
 0x452   : > { %8039 = vmatpush1.bf16.msra.mxu1 %v11710_v0  ;;  %8169 = vmatprep.subr.bf16.mxu0 %v11721_v17  ;;  %v11796_v0 = vld [vmem:[%s15349_s2 + $0x1ad4] ss:$24 sps:$4 sm:$0xff]   ;;  %v11797_v17 = vld [vmem:[%s15349_s2 + $0x1ad8] ss:$24 sps:$4 sm:$0xff]  }
 0x453   : > { %8040 = vmatprep.subr.bf16.mxu1 %v11718_v26  ;;  %v11794_v26 = vld [vmem:[%s15349_s2 + $0x1ad0] ss:$24 sps:$4 sm:$0xff]  }
 0x455   : > { %8170 = vmatpush1.bf16.msra.mxu0 %v11719_v18  ;;  %v11802_v18 = vld [vmem:[%s15349_s2 + $0x1214] ss:$24 sps:$4 sm:$0xff]  }
 0x456   : > { %8041 = vmatpush1.bf16.msra.mxu1 %v11716_v19  ;;  %8171 = vmatprep.subr.bf16.mxu0 %v11727_v20  ;;  %v11800_v19 = vld [vmem:[%s15349_s2 + $0x1210] ss:$24 sps:$4 sm:$0xff]   ;;  %v11805_v20 = vld [vmem:[%s15349_s2 + $0x1244] ss:$24 sps:$4 sm:$0xff]  }
 0x457   : > { %8042 = vmatprep.subr.bf16.mxu1 %v11724_v30  ;;  %v11803_v30 = vld [vmem:[%s15349_s2 + $0x1240] ss:$24 sps:$4 sm:$0xff]  }
 0x459   : > { %8172 = vmatpush1.bf16.msra.mxu0 %v11725_v21  ;;  %v11808_v21 = vld [vmem:[%s15349_s2 + $0x1274] ss:$24 sps:$4 sm:$0xff]  }
 0x45a   : > { %8043 = vmatpush1.bf16.msra.mxu1 %v11722_v22  ;;  %8173 = vmatprep.subr.bf16.mxu0 %v11733_v23  ;;  %v11806_v22 = vld [vmem:[%s15349_s2 + $0x1270] ss:$24 sps:$4 sm:$0xff]   ;;  %v11811_v23 = vld [vmem:[%s15349_s2 + $0x12a4] ss:$24 sps:$4 sm:$0xff]  }
 0x45b   : > { %8044 = vmatprep.subr.bf16.mxu1 %v11730_v24  ;;  %v11814_v24 = vld [vmem:[%s15349_s2 + $0x12d4] ss:$24 sps:$4 sm:$0xff]  }
 0x45d   : > { %8174 = vmatpush1.bf16.msra.mxu0 %v11731_v25  ;;  %v11812_v25 = vld [vmem:[%s15349_s2 + $0x12d0] ss:$24 sps:$4 sm:$0xff]  }
 0x45e   : > { %8045 = vmatpush1.bf16.msra.mxu1 %v11728_v44  ;;  %8175 = vmatprep.subr.bf16.mxu0 %v11739_v60  ;;  %v11817_v44 = vld [vmem:[%s15349_s2 + $0x1304] ss:$24 sps:$4 sm:$0xff]   ;;  %v11815_v60 = vld [vmem:[%s15349_s2 + $0x1300] ss:$24 sps:$4 sm:$0xff]  }
 0x45f   : > { %8046 = vmatprep.subr.bf16.mxu1 %v11736_v45  ;;  %v11820_v45 = vld [vmem:[%s15349_s2 + $0x1334] ss:$24 sps:$4 sm:$0xff]  }
 0x461   : > { %8176 = vmatpush1.bf16.msra.mxu0 %v11737_v37  ;;  %v11818_v37 = vld [vmem:[%s15349_s2 + $0x1330] ss:$24 sps:$4 sm:$0xff]  }
 0x462   : > { %8047 = vmatpush1.bf16.msra.mxu1 %v11734_v42  ;;  %8177 = vmatprep.subr.bf16.mxu0 %v11745_v32  ;;  %v11823_v42 = vld [vmem:[%s15349_s2 + $0x1364] ss:$24 sps:$4 sm:$0xff]   ;;  %v11821_v32 = vld [vmem:[%s15349_s2 + $0x1360] ss:$24 sps:$4 sm:$0xff]  }
 0x463   : > { %8048 = vmatprep.subr.bf16.mxu1 %v11742_v33  ;;  %v11826_v33 = vld [vmem:[%s15349_s2 + $0x1394] ss:$24 sps:$4 sm:$0xff]  }
 0x465   : > { %8178 = vmatpush1.bf16.msra.mxu0 %v11743_v36  ;;  %v11824_v36 = vld [vmem:[%s15349_s2 + $0x1390] ss:$24 sps:$4 sm:$0xff]  }
 0x466   : > { %8049 = vmatpush1.bf16.msra.mxu1 %v11740_v39  ;;  %8179 = vmatprep.subr.bf16.mxu0 %v11751_v47  ;;  %v11829_v39 = vld [vmem:[%s15349_s2 + $0x13c4] ss:$24 sps:$4 sm:$0xff]   ;;  %v11827_v47 = vld [vmem:[%s15349_s2 + $0x13c0] ss:$24 sps:$4 sm:$0xff]  }
 0x467   : > { %8050 = vmatprep.subr.bf16.mxu1 %v11748_v41  ;;  %v11832_v41 = vld [vmem:[%s15349_s2 + $0x13f4] ss:$24 sps:$4 sm:$0xff]  }
 0x469   : > { %8180 = vmatpush1.bf16.msra.mxu0 %v11749_v48  ;;  %v11830_v48 = vld [vmem:[%s15349_s2 + $0x13f0] ss:$24 sps:$4 sm:$0xff]  }
 0x46a   : > { %8051 = vmatpush1.bf16.msra.mxu1 %v11746_v49  ;;  %8181 = vmatprep.subr.bf16.mxu0 %v11757_v12  ;;  %v11835_v49 = vld [vmem:[%s15349_s2 + $0x1424] ss:$24 sps:$4 sm:$0xff]   ;;  %v11833_v12 = vld [vmem:[%s15349_s2 + $0x1420] ss:$24 sps:$4 sm:$0xff]  }
 0x46b   : > { %8052 = vmatprep.subr.bf16.mxu1 %v11754_v50  ;;  %v11838_v50 = vld [vmem:[%s15349_s2 + $0x1454] ss:$24 sps:$4 sm:$0xff]  }
 0x46d   : > { %8182 = vmatpush1.bf16.msra.mxu0 %v11755_v51  ;;  %v11836_v51 = vld [vmem:[%s15349_s2 + $0x1450] ss:$24 sps:$4 sm:$0xff]  }
 0x46e   : > { %8053 = vmatpush1.bf16.msra.mxu1 %v11752_v16  ;;  %8183 = vmatprep.subr.bf16.mxu0 %v11763_v52  ;;  %v11841_v16 = vld [vmem:[%s15349_s2 + $0x1484] ss:$24 sps:$4 sm:$0xff]   ;;  %v11839_v52 = vld [vmem:[%s15349_s2 + $0x1480] ss:$24 sps:$4 sm:$0xff]  }
 0x46f   : > { %8054 = vmatprep.subr.bf16.mxu1 %v11760_v54  ;;  %v11844_v54 = vld [vmem:[%s15349_s2 + $0x14b4] ss:$24 sps:$4 sm:$0xff]  }
 0x471   : > { %8184 = vmatpush1.bf16.msra.mxu0 %v11761_v56  ;;  %v11842_v56 = vld [vmem:[%s15349_s2 + $0x14b0] ss:$24 sps:$4 sm:$0xff]  }
 0x472   : > { %8055 = vmatpush1.bf16.msra.mxu1 %v11758_v57  ;;  %8185 = vmatprep.subr.bf16.mxu0 %v11769_v31  ;;  %v11847_v57 = vld [vmem:[%s15349_s2 + $0x14e4] ss:$24 sps:$4 sm:$0xff]   ;;  %v11845_v31 = vld [vmem:[%s15349_s2 + $0x14e0] ss:$24 sps:$4 sm:$0xff]  }
 0x473   : > { %8056 = vmatprep.subr.bf16.mxu1 %v11766_v4  ;;  %v11850_v4 = vld [vmem:[%s15349_s2 + $0x1514] ss:$24 sps:$4 sm:$0xff]  }
 0x475   : > { %8186 = vmatpush1.bf16.msra.mxu0 %v11767_v58  ;;  %v11848_v58 = vld [vmem:[%s15349_s2 + $0x1510] ss:$24 sps:$4 sm:$0xff]  }
 0x476   : > { %8057 = vmatpush1.bf16.msra.mxu1 %v11764_v53  ;;  %8187 = vmatprep.subr.bf16.mxu0 %v11775_v40  ;;  %v11853_v53 = vld [vmem:[%s15349_s2 + $0x1544] ss:$24 sps:$4 sm:$0xff]   ;;  %v11851_v40 = vld [vmem:[%s15349_s2 + $0x1540] ss:$24 sps:$4 sm:$0xff]  }
 0x477   : > { %8058 = vmatprep.subr.bf16.mxu1 %v11772_v61  ;;  %v11856_v61 = vld [vmem:[%s15349_s2 + $0x1574] ss:$24 sps:$4 sm:$0xff]  }
 0x479   : > { %8188 = vmatpush1.bf16.msra.mxu0 %v11773_v13  ;;  %v11854_v13 = vld [vmem:[%s15349_s2 + $0x1570] ss:$24 sps:$4 sm:$0xff]  }
 0x47a   : > { %8059 = vmatpush1.bf16.msra.mxu1 %v11770_v62  ;;  %8189 = vmatprep.subr.bf16.mxu0 %v11781_v59  ;;  %v11862_v62 = vld [vmem:[%s15349_s2 + $0x15d4] ss:$24 sps:$4 sm:$0xff]   ;;  %v11860_v59 = vld [vmem:[%s15349_s2 + $0x15d0] ss:$24 sps:$4 sm:$0xff]  }
 0x47b   : > { %8060 = vmatprep.subr.bf16.mxu1 %v11778_v63  ;;  %v11865_v63 = vld [vmem:[%s15349_s2 + $0x1604] ss:$24 sps:$4 sm:$0xff]  }
 0x47d   : > { %8190 = vmatpush1.bf16.msra.mxu0 %v11779_v1  ;;  %v11863_v1 = vld [vmem:[%s15349_s2 + $0x1600] ss:$24 sps:$4 sm:$0xff]  }
 0x47e   : > { %8061 = vmatpush1.bf16.msra.mxu1 %v11776_v3  ;;  %8191 = vmatprep.subr.bf16.mxu0 %v11787_v9  ;;  %v11868_v3 = vld [vmem:[%s15349_s2 + $0x1634] ss:$24 sps:$4 sm:$0xff]   ;;  %v11866_v9 = vld [vmem:[%s15349_s2 + $0x1630] ss:$24 sps:$4 sm:$0xff]  }
 0x47f   : > { %8062 = vmatprep.subr.bf16.mxu1 %v11784_v5  ;;  %v11871_v5 = vld [vmem:[%s15349_s2 + $0x1664] ss:$24 sps:$4 sm:$0xff]  }
 0x481   : > { %8192 = vmatpush1.bf16.msra.mxu0 %v11785_v28  ;;  %v11869_v28 = vld [vmem:[%s15349_s2 + $0x1660] ss:$24 sps:$4 sm:$0xff]  }
 0x482   : > { %8063 = vmatpush1.bf16.msra.mxu1 %v11782_v8  ;;  %8193 = vmatprep.subr.bf16.mxu0 %v11793_v10  ;;  %v11874_v8 = vld [vmem:[%s15349_s2 + $0x1694] ss:$24 sps:$4 sm:$0xff]   ;;  %v11872_v10 = vld [vmem:[%s15349_s2 + $0x1690] ss:$24 sps:$4 sm:$0xff]  }
 0x483   : > { %8064 = vmatprep.subr.bf16.mxu1 %v11790_v34  ;;  %v11877_v34 = vld [vmem:[%s15349_s2 + $0x16c4] ss:$24 sps:$4 sm:$0xff]  }
 0x485   : > { %8194 = vmatpush1.bf16.msra.mxu0 %v11791_v14  ;;  %v11875_v14 = vld [vmem:[%s15349_s2 + $0x16c0] ss:$24 sps:$4 sm:$0xff]  }
 0x486   : > { %8065 = vmatpush1.bf16.msra.mxu1 %v11788_v15  ;;  %8195 = vmatprep.subr.bf16.mxu0 %v11799_v55  ;;  %v11880_v15 = vld [vmem:[%s15349_s2 + $0x16f4] ss:$24 sps:$4 sm:$0xff]   ;;  %v11878_v55 = vld [vmem:[%s15349_s2 + $0x16f0] ss:$24 sps:$4 sm:$0xff]  }
 0x487   : > { %8066 = vmatprep.subr.bf16.mxu1 %v11796_v0  ;;  %v11883_v0 = vld [vmem:[%s15349_s2 + $0x1724] ss:$24 sps:$4 sm:$0xff]  }
 0x489   : > { %8196 = vmatpush1.bf16.msra.mxu0 %v11797_v17  ;;  %v11881_v17 = vld [vmem:[%s15349_s2 + $0x1720] ss:$24 sps:$4 sm:$0xff]  }
 0x48a   : > { %8067 = vmatpush1.bf16.msra.mxu1 %v11794_v26  ;;  %v11886_v26 = vld [vmem:[%s15349_s2 + $0x1754] ss:$24 sps:$4 sm:$0xff]  }
 0x48b   : > { %8208 = vmatprep.subr.bf16.mxu1 %v11802_v18  ;;  %v11884_v18 = vld [vmem:[%s15349_s2 + $0x1750] ss:$24 sps:$4 sm:$0xff]  }
 0x48c   : > { %8198 = vmatmul.mubr.bf16.vlgmr.msra.gmra.mrb[28].mxu0 %v12941_v46 }
 0x48d   : > { %8069 = vmatmul.mubr.bf16.vlgmr.msra.gmra.mrb[12].mxu1 %v12941_v46 }
 0x48e   : > { %8209 = vmatpush1.bf16.msra.mxu1 %v11800_v19  ;;  %8240 = vmatprep.mubr.bf16.mxu1 %v12828_v35  ;;  %v11809_v35 = vld [vmem:[%s15349_s2 + $0x12a0] ss:$24 sps:$4 sm:$0xff]   ;;  %v11889_v19 = vld [vmem:[%s15349_s2 + $0x1784] ss:$24 sps:$4 sm:$0xff]  }
 0x48f   : > { %8210 = vmatprep.subr.bf16.mxu1 %v11805_v20  ;;  %v11887_v20 = vld [vmem:[%s15349_s2 + $0x1780] ss:$24 sps:$4 sm:$0xff]  }
 0x492   : > { %8211 = vmatpush1.bf16.msra.mxu1 %v11803_v30  ;;  %v11892_v30 = vld [vmem:[%s15349_s2 + $0x17b4] ss:$24 sps:$4 sm:$0xff]  }
 0x493   : > { %8212 = vmatprep.subr.bf16.mxu1 %v11808_v21  ;;  %v11890_v21 = vld [vmem:[%s15349_s2 + $0x17b0] ss:$24 sps:$4 sm:$0xff]  }
 0x496   : > { %8213 = vmatpush1.bf16.msra.mxu1 %v11806_v22  ;;  %v11895_v22 = vld [vmem:[%s15349_s2 + $0x17e4] ss:$24 sps:$4 sm:$0xff]  }
 0x497   : > { %8214 = vmatprep.subr.bf16.mxu1 %v11811_v23  ;;  %v11893_v23 = vld [vmem:[%s15349_s2 + $0x17e0] ss:$24 sps:$4 sm:$0xff]  }
 0x49a   : > { %8215 = vmatpush1.bf16.msra.mxu1 %v11809_v35  ;;  %v11898_v35 = vld [vmem:[%s15349_s2 + $0x1814] ss:$24 sps:$4 sm:$0xff]  }
 0x49b   : > { %8216 = vmatprep.subr.bf16.mxu1 %v11814_v24  ;;  %v11896_v24 = vld [vmem:[%s15349_s2 + $0x1810] ss:$24 sps:$4 sm:$0xff]  }
 0x49e   : > { %8217 = vmatpush1.bf16.msra.mxu1 %v11812_v25  ;;  %v11901_v25 = vld [vmem:[%s15349_s2 + $0x1844] ss:$24 sps:$4 sm:$0xff]  }
 0x49f   : > { %8218 = vmatprep.subr.bf16.mxu1 %v11817_v44  ;;  %v11899_v44 = vld [vmem:[%s15349_s2 + $0x1840] ss:$24 sps:$4 sm:$0xff]  }
 0x4a2   : > { %8219 = vmatpush1.bf16.msra.mxu1 %v11815_v60  ;;  %v11904_v60 = vld [vmem:[%s15349_s2 + $0x1874] ss:$24 sps:$4 sm:$0xff]  }
 0x4a3   : > { %8220 = vmatprep.subr.bf16.mxu1 %v11820_v45  ;;  %v11902_v45 = vld [vmem:[%s15349_s2 + $0x1870] ss:$24 sps:$4 sm:$0xff]  }
 0x4a6   : > { %8221 = vmatpush1.bf16.msra.mxu1 %v11818_v37  ;;  %v11910_v37 = vld [vmem:[%s15349_s2 + $0x18d4] ss:$24 sps:$4 sm:$0xff]  }
 0x4a7   : > { %8222 = vmatprep.subr.bf16.mxu1 %v11823_v42  ;;  %v11908_v42 = vld [vmem:[%s15349_s2 + $0x18d0] ss:$24 sps:$4 sm:$0xff]  }
 0x4aa   : > { %8223 = vmatpush1.bf16.msra.mxu1 %v11821_v32  ;;  %v11913_v32 = vld [vmem:[%s15349_s2 + $0x1904] ss:$24 sps:$4 sm:$0xff]  }
 0x4ab   : > { %8224 = vmatprep.subr.bf16.mxu1 %v11826_v33  ;;  %v11911_v33 = vld [vmem:[%s15349_s2 + $0x1900] ss:$24 sps:$4 sm:$0xff]  }
 0x4ae   : > { %8225 = vmatpush1.bf16.msra.mxu1 %v11824_v36  ;;  %v11916_v36 = vld [vmem:[%s15349_s2 + $0x1934] ss:$24 sps:$4 sm:$0xff]  }
 0x4af   : > { %8226 = vmatprep.subr.bf16.mxu1 %v11829_v39  ;;  %v11914_v39 = vld [vmem:[%s15349_s2 + $0x1930] ss:$24 sps:$4 sm:$0xff]  }
 0x4b2   : > { %8227 = vmatpush1.bf16.msra.mxu1 %v11827_v47  ;;  %v11919_v47 = vld [vmem:[%s15349_s2 + $0x1964] ss:$24 sps:$4 sm:$0xff]  }
 0x4b3   : > { %8228 = vmatprep.subr.bf16.mxu1 %v11832_v41  ;;  %v11917_v41 = vld [vmem:[%s15349_s2 + $0x1960] ss:$24 sps:$4 sm:$0xff]  }
 0x4b6   : > { %8229 = vmatpush1.bf16.msra.mxu1 %v11830_v48  ;;  %v11922_v48 = vld [vmem:[%s15349_s2 + $0x1994] ss:$24 sps:$4 sm:$0xff]  }
 0x4b7   : > { %8230 = vmatprep.subr.bf16.mxu1 %v11835_v49  ;;  %v11920_v49 = vld [vmem:[%s15349_s2 + $0x1990] ss:$24 sps:$4 sm:$0xff]  }
 0x4ba   : > { %8231 = vmatpush1.bf16.msra.mxu1 %v11833_v12  ;;  %v11925_v12 = vld [vmem:[%s15349_s2 + $0x19c4] ss:$24 sps:$4 sm:$0xff]  }
 0x4bb   : > { %8232 = vmatprep.subr.bf16.mxu1 %v11838_v50  ;;  %v11923_v50 = vld [vmem:[%s15349_s2 + $0x19c0] ss:$24 sps:$4 sm:$0xff]  }
 0x4be   : > { %8233 = vmatpush1.bf16.msra.mxu1 %v11836_v51  ;;  %v11928_v51 = vld [vmem:[%s15349_s2 + $0x19f4] ss:$24 sps:$4 sm:$0xff]  }
 0x4bf   : > { %8234 = vmatprep.subr.bf16.mxu1 %v11841_v16  ;;  %v11926_v16 = vld [vmem:[%s15349_s2 + $0x19f0] ss:$24 sps:$4 sm:$0xff]  }
 0x4c2   : > { %8235 = vmatpush1.bf16.msra.mxu1 %v11839_v52  ;;  %v11931_v52 = vld [vmem:[%s15349_s2 + $0x1a24] ss:$24 sps:$4 sm:$0xff]  }
 0x4c3   : > { %8236 = vmatprep.subr.bf16.mxu1 %v11844_v54  ;;  %v11929_v54 = vld [vmem:[%s15349_s2 + $0x1a20] ss:$24 sps:$4 sm:$0xff]  }
 0x4c6   : > { %8237 = vmatpush1.bf16.msra.mxu1 %v11842_v56  ;;  %v11934_v56 = vld [vmem:[%s15349_s2 + $0x1a54] ss:$24 sps:$4 sm:$0xff]  }
 0x4c7   : > { %8238 = vmatprep.subr.bf16.mxu1 %v11847_v57  ;;  %v11932_v57 = vld [vmem:[%s15349_s2 + $0x1a50] ss:$24 sps:$4 sm:$0xff]  }
 0x4ca   : > { %8239 = vmatpush1.bf16.msra.mxu1 %v11845_v31  ;;  %v11937_v31 = vld [vmem:[%s15349_s2 + $0x1a84] ss:$24 sps:$4 sm:$0xff]  }
 0x4cb   : > { %8251 = vmatprep.subr.bf16.mxu1 %v11850_v4  ;;  %v11935_v4 = vld [vmem:[%s15349_s2 + $0x1a80] ss:$24 sps:$4 sm:$0xff]  }
 0x4cd   : > { %8241 = vmatmul.mubr.bf16.vlgmr.msra.gmra.mrb[8].mxu1 %v12831_v38  ;;  %v11859_v38 = vld [vmem:[%s15349_s2 + $0x15a4] ss:$24 sps:$4 sm:$0xff]  }
 0x4ce   : > { %8252 = vmatpush1.bf16.msra.mxu1 %v11848_v58  ;;  %8283 = vmatprep.mubr.bf16.mxu1 %v12774_v6  ;;  %v11857_v6 = vld [vmem:[%s15349_s2 + $0x15a0] ss:$24 sps:$4 sm:$0xff]   ;;  %v11940_v58 = vld [vmem:[%s15349_s2 + $0x1ab4] ss:$24 sps:$4 sm:$0xff]  }
 0x4cf   : > { %8253 = vmatprep.subr.bf16.mxu1 %v11853_v53  ;;  %v11938_v53 = vld [vmem:[%s15349_s2 + $0x1ab0] ss:$24 sps:$4 sm:$0xff]  }
 0x4d2   : > { %8254 = vmatpush1.bf16.msra.mxu1 %v11851_v40  ;;  %v11943_v40 = vld [vmem:[%s15349_s2 + $0x1ae4] ss:$24 sps:$4 sm:$0xff]  }
 0x4d3   : > { %8255 = vmatprep.subr.bf16.mxu1 %v11856_v61  ;;  %v11941_v61 = vld [vmem:[%s15349_s2 + $0x1ae0] ss:$24 sps:$4 sm:$0xff]  }
 0x4d6   : > { %8256 = vmatpush1.bf16.msra.mxu1 %v11854_v13 }
 0x4d7   : > { %8257 = vmatprep.subr.bf16.mxu1 %v11859_v38 }
 0x4da   : > { %8258 = vmatpush1.bf16.msra.mxu1 %v11857_v6 }
 0x4db   : > { %8259 = vmatprep.subr.bf16.mxu1 %v11862_v62 }
 0x4de   : > { %8260 = vmatpush1.bf16.msra.mxu1 %v11860_v59 }
 0x4df   : > { %8261 = vmatprep.subr.bf16.mxu1 %v11865_v63 }
 0x4e2   : > { %8262 = vmatpush1.bf16.msra.mxu1 %v11863_v1 }
 0x4e3   : > { %8263 = vmatprep.subr.bf16.mxu1 %v11868_v3 }
 0x4e6   : > { %8264 = vmatpush1.bf16.msra.mxu1 %v11866_v9 }
 0x4e7   : > { %8265 = vmatprep.subr.bf16.mxu1 %v11871_v5 }
 0x4ea   : > { %8266 = vmatpush1.bf16.msra.mxu1 %v11869_v28 }
 0x4eb   : > { %8267 = vmatprep.subr.bf16.mxu1 %v11874_v8 }
 0x4ee   : > { %8268 = vmatpush1.bf16.msra.mxu1 %v11872_v10 }
 0x4ef   : > { %8269 = vmatprep.subr.bf16.mxu1 %v11877_v34 }
 0x4f2   : > { %8270 = vmatpush1.bf16.msra.mxu1 %v11875_v14 }
 0x4f3   : > { %8271 = vmatprep.subr.bf16.mxu1 %v11880_v15 }
 0x4f6   : > { %8272 = vmatpush1.bf16.msra.mxu1 %v11878_v55 }
 0x4f7   : > { %8273 = vmatprep.subr.bf16.mxu1 %v11883_v0 }
 0x4fa   : > { %8274 = vmatpush1.bf16.msra.mxu1 %v11881_v17 }
 0x4fb   : > { %8275 = vmatprep.subr.bf16.mxu1 %v11886_v26 }
 0x4fe   : > { %8276 = vmatpush1.bf16.msra.mxu1 %v11884_v18 }
 0x4ff   : > { %8277 = vmatprep.subr.bf16.mxu1 %v11889_v19 }
 0x502   : > { %8278 = vmatpush1.bf16.msra.mxu1 %v11887_v20 }
 0x503   : > { %8279 = vmatprep.subr.bf16.mxu1 %v11892_v30 }
 0x506   : > { %8280 = vmatpush1.bf16.msra.mxu1 %v11890_v21 }
 0x507   : > { %8281 = vmatprep.subr.bf16.mxu1 %v11895_v22 }
 0x50a   : > { %8282 = vmatpush1.bf16.msra.mxu1 %v11893_v23 }
 0x50b   : > { %8294 = vmatprep.subr.bf16.mxu1 %v11898_v35 }
 0x50d   : > { %8284 = vmatmul.mubr.bf16.vlgmr.msra.gmra.mrb[8].mxu1 %v12777_v7  ;;  %v11907_v7 = vld [vmem:[%s15349_s2 + $0x18a4] ss:$24 sps:$4 sm:$0xff]  }
 0x50e   : > { %8295 = vmatpush1.bf16.msra.mxu1 %v11896_v24  ;;  %8326 = vmatprep.mubr.bf16.mxu1 %v12938_v43  ;;  %v11905_v43 = vld [vmem:[%s15349_s2 + $0x18a0] ss:$24 sps:$4 sm:$0xff]  }
 0x50f   : > { %8296 = vmatprep.subr.bf16.mxu1 %v11901_v25 }
 0x512   : > { %8297 = vmatpush1.bf16.msra.mxu1 %v11899_v44 }
 0x513   : > { %8298 = vmatprep.subr.bf16.mxu1 %v11904_v60 }
 0x516   : > { %8299 = vmatpush1.bf16.msra.mxu1 %v11902_v45 }
 0x517   : > { %8300 = vmatprep.subr.bf16.mxu1 %v11907_v7 }
 0x51a   : > { %8301 = vmatpush1.bf16.msra.mxu1 %v11905_v43 }
 0x51b   : > { %8302 = vmatprep.subr.bf16.mxu1 %v11910_v37 }
 0x51e   : > { %8303 = vmatpush1.bf16.msra.mxu1 %v11908_v42 }
 0x51f   : > { %8304 = vmatprep.subr.bf16.mxu1 %v11913_v32 }
 0x522   : > { %8305 = vmatpush1.bf16.msra.mxu1 %v11911_v33 }
 0x523   : > { %8306 = vmatprep.subr.bf16.mxu1 %v11916_v36 }
 0x526   : > { %8307 = vmatpush1.bf16.msra.mxu1 %v11914_v39 }
 0x527   : > { %8308 = vmatprep.subr.bf16.mxu1 %v11919_v47 }
 0x52a   : > { %8309 = vmatpush1.bf16.msra.mxu1 %v11917_v41 }
 0x52b   : > { %8310 = vmatprep.subr.bf16.mxu1 %v11922_v48 }
 0x52e   : > { %8311 = vmatpush1.bf16.msra.mxu1 %v11920_v49 }
 0x52f   : > { %8312 = vmatprep.subr.bf16.mxu1 %v11925_v12 }
 0x532   : > { %8313 = vmatpush1.bf16.msra.mxu1 %v11923_v50 }
 0x533   : > { %8314 = vmatprep.subr.bf16.mxu1 %v11928_v51 }
 0x536   : > { %8315 = vmatpush1.bf16.msra.mxu1 %v11926_v16 }
 0x537   : > { %8316 = vmatprep.subr.bf16.mxu1 %v11931_v52 }
 0x53a   : > { %8317 = vmatpush1.bf16.msra.mxu1 %v11929_v54 }
 0x53b   : > { %8318 = vmatprep.subr.bf16.mxu1 %v11934_v56 }
 0x53e   : > { %8319 = vmatpush1.bf16.msra.mxu1 %v11932_v57 }
 0x53f   : > { %8320 = vmatprep.subr.bf16.mxu1 %v11937_v31 }
 0x542   : > { %8321 = vmatpush1.bf16.msra.mxu1 %v11935_v4 }
 0x543   : > { %8322 = vmatprep.subr.bf16.mxu1 %v11940_v58 }
 0x546   : > { %8323 = vmatpush1.bf16.msra.mxu1 %v11938_v53 }
 0x547   : > { %8324 = vmatprep.subr.bf16.mxu1 %v11943_v40 }
 0x54a   : > { %8325 = vmatpush1.bf16.msra.mxu1 %v11941_v61 }
 0x54d   : > { %8327 = vmatmul.mubr.bf16.vlgmr.msra.gmra.mrb[8].mxu1 %v12941_v46 }
 0x55f   : > { %v8199_v13 = vpop.f32.mrb[28].mxu0 }
 0x560   : > { %v8070_v38 = vpop.f32.mrb[12].mxu1  ;;  %v8351_v6 = vmul.f32 0.01, %v8199_v13  ;;  %v8201_v62 = vpop.f32.mrb[29].mxu0 }
 0x561   : > { %v10260_v59 = vadd.f32 %v8070_v38, %v13921_v27  ;;  %v8072_v63 = vpop.f32.mrb[13].mxu1  ;;  %v8352_v1 = vmul.f32 0.01, %v8201_v62  ;;  %v8203_v3 = vpop.f32.mrb[30].mxu0 }
 0x562   : > { %v8363_v9 = vmax.f32 %v8199_v13, %v8351_v6  ;;  %v10261_v5 = vadd.f32 %v8072_v63, %v13926_v2  ;;  %v8074_v28 = vpop.f32.mrb[14].mxu1  ;;  %v8357_v8 = vmul.f32 0.01, %v8203_v3  ;;  %v8205_v10 = vpop.f32.mrb[31].mxu0 }
 0x563   : > { %v8349_v34 = vmul.f32 0.01, %v10260_v59  ;;  %v8364_v14 = vmax.f32 %v8201_v62, %v8352_v1  ;;  %v10262_v46 = vadd.f32 %v8074_v28, %v13928_v29  ;;  %v8076_v15 = vpop.f32.mrb[15].mxu1  ;;  %v8358_v55 = vmul.f32 0.01, %v8205_v10 }
 0x564   : > { %v8350_v27 = vmul.f32 0.01, %v10261_v5  ;;  %v8369_v0 = vmax.f32 %v8203_v3, %v8357_v8  ;;  %v10263_v2 = vadd.f32 %v8076_v15, %v13933_v11 }
 0x565   : > { %v8361_v17 = vmax.f32 %v10260_v59, %v8349_v34  ;;  %v10249_v26 = vpack.c.bf16 %v8364_v14, %v8363_v9  ;;  %v8355_v18 = vmul.f32 0.01, %v10262_v46  ;;  %v8370_v19 = vmax.f32 %v8205_v10, %v8358_v55 }
 0x566   : > { %v8362_v29 = vmax.f32 %v10261_v5, %v8350_v27  ;;  %v8356_v20 = vmul.f32 0.01, %v10263_v2 }
 0x567   : > { %8410 = vst [vmem:[%s15329_s10 + $0x8] sm:$0xff] %v10249_v26  ;;  %v8367_v30 = vmax.f32 %v10262_v46, %v8355_v18  ;;  %v10252_v21 = vpack.c.bf16 %v8370_v19, %v8369_v0 }
 0x568   : > { %v10248_v22 = vpack.c.bf16 %v8362_v29, %v8361_v17  ;;  %v8368_v23 = vmax.f32 %v10263_v2, %v8356_v20 }
 0x569   : > { %8413 = vst [vmem:[%s15329_s10 + $0x20] sm:$0xff] %v10252_v21 }
 0x56a   : > { %8409 = vst [vmem:[%s15329_s10] sm:$0xff] %v10248_v22  ;;  %v10251_v35 = vpack.c.bf16 %v8368_v23, %v8367_v30 }
 0x56c   : > { %8412 = vst [vmem:[%s15329_s10 + $0x18] sm:$0xff] %v10251_v35 }
 0x620   : > { %v8328_v24 = vpop.f32.mrb[8].mxu1 }
 0x621   : > { %v8353_v25 = vmul.f32 0.01, %v8328_v24  ;;  %v8330_v11 = vpop.f32.mrb[9].mxu1 }
 0x622   : > { %v8354_v44 = vmul.f32 0.01, %v8330_v11  ;;  %v8332_v60 = vpop.f32.mrb[10].mxu1 }
 0x623   : > { %v8365_v45 = vmax.f32 %v8328_v24, %v8353_v25  ;;  %v8359_v7 = vmul.f32 0.01, %v8332_v60  ;;  %v8334_v43 = vpop.f32.mrb[11].mxu1 }
 0x624   : > { %v8366_v37 = vmax.f32 %v8330_v11, %v8354_v44  ;;  %v8360_v42 = vmul.f32 0.01, %v8334_v43 }
 0x625   : > { %v8371_v32 = vmax.f32 %v8332_v60, %v8359_v7 }
 0x626   : > { %v10250_v33 = vpack.c.bf16 %v8366_v37, %v8365_v45  ;;  %v8372_v36 = vmax.f32 %v8334_v43, %v8360_v42 }
 0x628   : > { %8411 = vst [vmem:[%s15329_s10 + $0x10] sm:$0xff] %v10250_v33  ;;  %v10253_v39 = vpack.c.bf16 %v8372_v36, %v8371_v32 }
 0x62a   : > { %8414 = vst [vmem:[%s15329_s10 + $0x28] sm:$0xff] %v10253_v39 }
 0x62b PF: > { %s13_s14 = sadd.s32 1, %s11968_s14   ;;  %s15361_s12 = smov %s11964_s13 }
 0x62c   : > { %p10_p5 = scmp.ge.s32.totalorder %s13_s14, 4   ;;  %s15362_s13 = smov %s15364_s15 }
 0x62e   :  { %12 = sbr.rel (!%p10_p5) target bundleno = 2 (0x2), region = 74 }

</bundles_post_ra>
